<compile_context>
chip_gen: v7x
topology: tpu7x:2x2x1
jax: 0.10.0
libtpu: 0.0.40
codegen_flags: <defaults>
</compile_context>

<pallas_src>
import math

import jax
import jax.numpy as jnp
from jax.experimental import pallas as pl
from jax.experimental.pallas import tpu as pltpu

EPS = 1e-5                      # PyTorch BatchNorm2d default eps
LANE = 128                      # TPU lane width; Cout is padded to this
VMEM_LIMIT = 32 * 1024 * 1024   # safe on v5e/v6e (128 MiB) and v7x (64 MiB)


def _round_up(x, m):
    return (x + m - 1) // m * m


def _pad_last(a, target):
    pad = target - a.shape[-1]
    if pad <= 0:
        return a
    cfg = [(0, 0)] * (a.ndim - 1) + [(0, pad)]
    return jnp.pad(a, cfg)


# ---------------------------------------------------------------------------
# Pass A: 3x3 conv (9 shifted matmuls over the flat padded image) + BN stats
# ---------------------------------------------------------------------------
def _make_conv_stats_kernel(n_phases, stride, tap_offsets, L, with_shortcut):
    def kernel(*refs):
        i = 0
        phase_refs = refs[i:i + n_phases]; i += n_phases
        w_ref, mask_ref = refs[i], refs[i + 1]; i += 2
        if with_shortcut:
            xs_ref, ws_ref = refs[i], refs[i + 1]; i += 2
        y_ref, s1_ref, s2_ref = refs[i], refs[i + 1], refs[i + 2]; i += 3
        if with_shortcut:
            t1_ref, t2_ref = refs[i], refs[i + 1]

        # 3x3 conv as 9 shifted matmuls: bf16 inputs, f32 MXU accumulation.
        acc = None
        for t, off in enumerate(tap_offsets):
            lhs = phase_refs[off % stride][pl.ds(off // stride, L), :]
            part = jnp.dot(lhs, w_ref[t], preferred_element_type=jnp.float32)
            acc = part if acc is None else acc + part
        y_ref[...] = acc

        # zero the cross-image stat accumulators on the first grid step
        @pl.when(pl.program_id(0) == 0)
        def _():
            s1_ref[...] = jnp.zeros_like(s1_ref)
            s2_ref[...] = jnp.zeros_like(s2_ref)
            if with_shortcut:
                t1_ref[...] = jnp.zeros_like(t1_ref)
                t2_ref[...] = jnp.zeros_like(t2_ref)

        # masked per-channel batch statistics (non-output rows of the flat
        # layout are excluded via the 0/1 mask)
        m = mask_ref[...]                       # (L, 1) f32
        ym = acc * m
        s1_ref[...] += jnp.sum(ym, axis=0, keepdims=True)
        s2_ref[...] += jnp.sum(ym * acc, axis=0, keepdims=True)

        if with_shortcut:
            # fused 1x1-shortcut conv: stats only (output recomputed in apply)
            ys = jnp.dot(xs_ref[...], ws_ref[...],
                         preferred_element_type=jnp.float32)
            ysm = ys * m
            t1_ref[...] += jnp.sum(ysm, axis=0, keepdims=True)
            t2_ref[...] += jnp.sum(ysm * ys, axis=0, keepdims=True)

    return kernel


def _conv3x3_stats(x_nhwc, w_hwio, stride, shortcut=None):
    """3x3 conv (pad=1) + per-channel sum / sum-of-squares (batch BN stats).

    Returns y in a flat per-image row layout of pitch Wp = Wi + 2:
    row q = ho*Wp + wo is a real output pixel iff (q % Wp) < Wo; other rows are
    cheap throw-away compute that is masked out of the stats and sliced away
    in glue.  `shortcut` is an optional (xs_flat_bf16, ws_pad_bf16) pair whose
    1x1-conv batch stats are accumulated alongside.
    """
    N, Hi, Wi, Cin = x_nhwc.shape
    Cout = w_hwio.shape[-1]
    Cp = _round_up(Cout, LANE)
    Hp, Wp = Hi + 2, Wi + 2
    Ho = (Hi - 1) // stride + 1
    Wo = (Wi - 1) // stride + 1
    L = Ho * Wp                               # flat output rows per image

    # tap offsets into the flat (h*Wp + w) index space of the padded image
    tap_offsets = [dh * Wp + dw for dh in range(3) for dw in range(3)]
    max_start = max(off // stride for off in tap_offsets)
    plen = L + max_start

    # glue: pad -> flatten -> split into `stride` row-phases -> bf16 (~1x traffic)
    xf = jnp.pad(x_nhwc, ((0, 0), (1, 1), (1, 1), (0, 0)))
    xf = xf.reshape(N, Hp * Wp, Cin)
    phases = []
    for p in range(stride):
        ph = xf[:, p::stride, :]
        ph = jnp.pad(ph, ((0, 0), (0, max(0, plen - ph.shape[1])), (0, 0)))
        phases.append(ph[:, :plen, :].astype(jnp.bfloat16))

    w_mat = _pad_last(w_hwio.reshape(9, Cin, Cout), Cp).astype(jnp.bfloat16)

    # 1.0 on rows that are real output pixels, 0.0 on layout filler rows
    mask = ((jnp.arange(L, dtype=jnp.int32) % Wp) < Wo)
    mask = mask.astype(jnp.float32).reshape(L, 1)

    with_short = shortcut is not None
    inputs, in_specs = [], []
    for ph in phases:
        inputs.append(ph)
        in_specs.append(pl.BlockSpec((None, plen, Cin), lambda n: (n, 0, 0)))
    inputs += [w_mat, mask]
    in_specs += [pl.BlockSpec((9, Cin, Cp), lambda n: (0, 0, 0)),
                 pl.BlockSpec((L, 1), lambda n: (0, 0))]
    if with_short:
        xs_flat, ws_pad = shortcut
        assert xs_flat.shape[1] == L, (xs_flat.shape, L)
        Cs = xs_flat.shape[-1]
        inputs += [xs_flat, ws_pad]
        in_specs += [pl.BlockSpec((None, L, Cs), lambda n: (n, 0, 0)),
                     pl.BlockSpec((Cs, Cp), lambda n: (0, 0))]

    stat = jax.ShapeDtypeStruct((1, Cp), jnp.float32)
    out_shape = [jax.ShapeDtypeStruct((N, L, Cp), jnp.float32), stat, stat]
    out_specs = [pl.BlockSpec((None, L, Cp), lambda n: (n, 0, 0)),
                 pl.BlockSpec((1, Cp), lambda n: (0, 0)),
                 pl.BlockSpec((1, Cp), lambda n: (0, 0))]
    if with_short:
        out_shape += [stat, stat]
        out_specs += [pl.BlockSpec((1, Cp), lambda n: (0, 0)),
                      pl.BlockSpec((1, Cp), lambda n: (0, 0))]

    kernel = _make_conv_stats_kernel(len(phases), stride, tap_offsets, L,
                                     with_short)
    outs = pl.pallas_call(
        kernel,
        out_shape=tuple(out_shape),
        grid=(N,),
        in_specs=in_specs,
        out_specs=tuple(out_specs),
        compiler_params=pltpu.CompilerParams(
            # stats accumulate across images -> reduction axis must be arbitrary
            dimension_semantics=("arbitrary",),
            vmem_limit_bytes=VMEM_LIMIT),
    )(*inputs)

    y, s1, s2 = outs[0], outs[1], outs[2]
    short_stats = (outs[3], outs[4]) if with_short else None
    return y, s1, s2, short_stats, (Ho, Wo, Wp, L, Cp)


# ---------------------------------------------------------------------------
# Pass B: BN apply (precomputed scale/shift) + optional residual + ReLU
# ---------------------------------------------------------------------------
def _make_apply_kernel(mode):
    def kernel(*refs):
        if mode == "plain":
            y_ref, sc_ref, sh_ref, o_ref = refs
        elif mode == "conv_short":
            y_ref, sc_ref, sh_ref, xs_ref, ws_ref, scs_ref, shs_ref, o_ref = refs
        else:  # "ident_short"
            y_ref, sc_ref, sh_ref, res_ref, o_ref = refs

        out = y_ref[...] * sc_ref[...] + sh_ref[...]        # 2 VPU ops / element
        if mode == "conv_short":
            # recompute the cheap 1x1 shortcut conv on the MXU; its BN'd output
            # never touches HBM
            ys = jnp.dot(xs_ref[...], ws_ref[...],
                         preferred_element_type=jnp.float32)
            out = out + (ys * scs_ref[...] + shs_ref[...])
        elif mode == "ident_short":
            out = out + res_ref[...]
        o_ref[...] = jnp.maximum(out, 0.0).astype(o_ref.dtype)

    return kernel


def _bn_apply(y, scale, shift, residual=None):
    """y: (N, L, Cp) f32; scale/shift: (1, Cp) f32.
    residual: None | ("conv", xs_flat, ws_pad, scale_s, shift_s)
                   | ("identity", res (N, L, Cp) f32)
    """
    N, L, Cp = y.shape
    inputs = [y, scale, shift]
    in_specs = [pl.BlockSpec((None, L, Cp), lambda n: (n, 0, 0)),
                pl.BlockSpec((1, Cp), lambda n: (0, 0)),
                pl.BlockSpec((1, Cp), lambda n: (0, 0))]
    if residual is None:
        mode = "plain"
    elif residual[0] == "conv":
        mode = "conv_short"
        _, xs_flat, ws_pad, scs, shs = residual
        Cs = xs_flat.shape[-1]
        inputs += [xs_flat, ws_pad, scs, shs]
        in_specs += [pl.BlockSpec((None, L, Cs), lambda n: (n, 0, 0)),
                     pl.BlockSpec((Cs, Cp), lambda n: (0, 0)),
                     pl.BlockSpec((1, Cp), lambda n: (0, 0)),
                     pl.BlockSpec((1, Cp), lambda n: (0, 0))]
    else:
        mode = "ident_short"
        _, res = residual
        inputs.append(res)
        in_specs.append(pl.BlockSpec((None, L, Cp), lambda n: (n, 0, 0)))

    return pl.pallas_call(
        _make_apply_kernel(mode),
        out_shape=jax.ShapeDtypeStruct((N, L, Cp), jnp.float32),
        grid=(N,),
        in_specs=in_specs,
        out_specs=pl.BlockSpec((None, L, Cp), lambda n: (n, 0, 0)),
        compiler_params=pltpu.CompilerParams(
            dimension_semantics=("parallel",),   # independent per image
            vmem_limit_bytes=VMEM_LIMIT),
    )(*inputs)


def _scale_shift(s1, s2, gamma, beta, count, cp):
    """Per-channel BN scale/shift from accumulated sum / sum-of-squares."""
    mean = s1 / float(count)
    var = s2 / float(count) - mean * mean          # biased variance (BN training)
    g = _pad_last(gamma.reshape(1, -1), cp)
    b = _pad_last(beta.reshape(1, -1), cp)
    scale = g * jax.lax.rsqrt(var + EPS)
    shift = b - mean * scale
    return scale, shift


# ---------------------------------------------------------------------------
# SimpleBlock with deterministic init matching init_layer() semantics
# ---------------------------------------------------------------------------
class SimpleBlockPallas:
    def __init__(self, indim, outdim, half_res, key):
        self.indim, self.outdim, self.half_res = indim, outdim, half_res
        k1, k2, k3 = jax.random.split(key, 3)

        std3 = math.sqrt(2.0 / float(3 * 3 * outdim))
        self.w1 = jax.random.normal(k1, (3, 3, indim, outdim), jnp.float32) * std3
        self.w2 = jax.random.normal(k2, (3, 3, outdim, outdim), jnp.float32) * std3
        self.g1 = jnp.ones((outdim,), jnp.float32)
        self.b1 = jnp.zeros((outdim,), jnp.float32)
        self.g2 = jnp.ones((outdim,), jnp.float32)
        self.b2 = jnp.zeros((outdim,), jnp.float32)

        if indim != outdim:
            std1 = math.sqrt(2.0 / float(1 * 1 * outdim))
            self.ws = jax.random.normal(k3, (indim, outdim), jnp.float32) * std1
            self.gs = jnp.ones((outdim,), jnp.float32)
            self.bs = jnp.zeros((outdim,), jnp.float32)
            self.shortcut_type = "1x1"
        else:
            self.shortcut_type = "identity"

    def __call__(self, x_nchw):
        # TODO(synk): drop the NCHW<->NHWC transposes if the surrounding model
        # can produce/consume NHWC directly (saves two activation round trips).
        x = jnp.transpose(x_nchw, (0, 2, 3, 1)).astype(jnp.float32)
        N, H, W, _ = x.shape
        s = 2 if self.half_res else 1
        if self.shortcut_type == "identity" and self.half_res:
            raise ValueError("identity shortcut with half_res shape-mismatches "
                             "(same limitation as the PyTorch module)")

        Cp = _round_up(self.outdim, LANE)

        # ---- conv1 + BN1 batch stats (pass A), then BN1-apply + ReLU ----
        y1, s11, s12, _, (Ho, Wo, Wp1, L1, _) = _conv3x3_stats(x, self.w1, s)
        count = N * Ho * Wo
        sc1, sh1 = _scale_shift(s11, s12, self.g1, self.b1, count, Cp)
        out1g = _bn_apply(y1, sc1, sh1)                    # (N, L1, Cp), relu'd

        # valid NHWC activation for conv2
        out1 = out1g.reshape(N, Ho, Wp1, Cp)[:, :, :Wo, :self.outdim]

        # ---- shortcut prep (shares conv2's flat row layout) ----
        Wp2, L2 = Wo + 2, Ho * (Wo + 2)
        if self.shortcut_type == "1x1":
            xs = x[:, ::s, ::s, :][:, :Ho, :Wo, :]
            xs_flat = jnp.pad(xs, ((0, 0), (0, 0), (0, Wp2 - Wo), (0, 0)))
            xs_flat = xs_flat.reshape(N, L2, self.indim).astype(jnp.bfloat16)
            ws_pad = _pad_last(self.ws, Cp).astype(jnp.bfloat16)
            shortcut_in = (xs_flat, ws_pad)
        else:
            shortcut_in = None

        # ---- conv2 + BN2 stats (+ fused 1x1-shortcut-BN stats) ----
        y2, s21, s22, short_stats, (_, _, wp2_chk, l2_chk, _) = _conv3x3_stats(
            out1, self.w2, 1, shortcut=shortcut_in)
        assert (wp2_chk, l2_chk) == (Wp2, L2)
        sc2, sh2 = _scale_shift(s21, s22, self.g2, self.b2, count, Cp)

        # ---- BN2-apply + shortcut + ReLU in one fused apply kernel ----
        if self.shortcut_type == "1x1":
            t1, t2 = short_stats
            scs, shs = _scale_shift(t1, t2, self.gs, self.bs, count, Cp)
            outg = _bn_apply(y2, sc2, sh2,
                             residual=("conv", xs_flat, ws_pad, scs, shs))
        else:
            res = jnp.pad(x, ((0, 0), (0, 0), (0, Wp2 - Wo),
                              (0, Cp - self.indim))).reshape(N, L2, Cp)
            outg = _bn_apply(y2, sc2, sh2, residual=("identity", res))

        out_nhwc = outg.reshape(N, Ho, Wp2, Cp)[:, :, :Wo, :self.outdim]
        return jnp.transpose(out_nhwc, (0, 3, 1, 2))       # back to NCHW


# ---------------------------------------------------------------------------
# Pure-JAX reference (lax.conv) for numerical checking.  Conv inputs are cast
# to bf16 exactly like the kernel path (accumulation stays f32).
# ---------------------------------------------------------------------------
def reference_forward(block, x_nchw):
    x = jnp.transpose(x_nchw, (0, 2, 3, 1)).astype(jnp.float32)
    s = 2 if block.half_res else 1

    def conv(v, w, stride, pad):
        return jax.lax.conv_general_dilated(
            v.astype(jnp.bfloat16), w.astype(jnp.bfloat16),
            (stride, stride), padding=((pad, pad), (pad, pad)),
            dimension_numbers=("NHWC", "HWIO", "NHWC"),
            preferred_element_type=jnp.float32)

    def bn(v, g, b):
        mean = jnp.mean(v, axis=(0, 1, 2), keepdims=True)
        var = jnp.mean(jnp.square(v - mean), axis=(0, 1, 2), keepdims=True)
        return (v - mean) * jax.lax.rsqrt(var + EPS) * g + b

    out = jnp.maximum(bn(conv(x, block.w1, s, 1), block.g1, block.b1), 0.0)
    out = bn(conv(out, block.w2, 1, 1), block.g2, block.b2)
    if block.shortcut_type == "1x1":
        short = bn(conv(x, block.ws.reshape(1, 1, block.indim, block.outdim),
                        s, 0), block.gs, block.bs)
    else:
        short = x
    out = jnp.maximum(out + short, 0.0)
    return jnp.transpose(out, (0, 3, 1, 2))


def _run_case(key, indim, outdim, half_res, spatial):
    kx, kp = jax.random.split(key)
    x = jax.random.normal(kx, (2, indim, spatial, spatial), jnp.float32)
    block = SimpleBlockPallas(indim, outdim, half_res, kp)
    fwd = jax.jit(block.__call__)
    y = jax.block_until_ready(fwd(x))
    y_ref = jax.block_until_ready(reference_forward(block, x))
    assert y.shape == y_ref.shape, (y.shape, y_ref.shape)
    err = float(jnp.max(jnp.abs(y - y_ref)))
    assert jnp.allclose(y, y_ref, rtol=5e-3, atol=5e-3), err
    return y.shape


if __name__ == "__main__":
    key = jax.random.PRNGKey(0)
    k1, k2 = jax.random.split(key)

    # case 1: 1x1-conv shortcut, stride 2 (half_res)
    shape1 = _run_case(k1, indim=4, outdim=8, half_res=True, spatial=16)
    assert shape1 == (2, 8, 8, 8), shape1

    # case 2: identity shortcut, stride 1
    shape2 = _run_case(k2, indim=8, outdim=8, half_res=False, spatial=16)
    assert shape2 == (2, 8, 16, 16), shape2

    print("KERNEL_OK")
</pallas_src>

<mosaic_0001>
module attributes {stable_mosaic.version = 11 : i64} {
  func.func @kernel(%arg0: i32, %arg1: memref<1x144x128xf32, #tpu.memory_space<vmem>>, %arg2: memref<1x128xf32, #tpu.memory_space<vmem>>, %arg3: memref<1x128xf32, #tpu.memory_space<vmem>>, %arg4: memref<1x144x128xf32, #tpu.memory_space<vmem>>) attributes {dimension_semantics = [#tpu.dimension_semantics<parallel>], iteration_bounds = array<i64: 2>, scalar_prefetch = 0 : i64, scratch_operands = 0 : i64, tpu.core_type = #tpu.core_type<tc>, window_params = [{transform_indices = @transform_0, window_bounds = array<i64: 1, 144, 128>}, {pipeline_mode = #tpu.pipeline_mode<synchronous>, transform_indices = @transform_1, window_bounds = array<i64: 1, 128>}, {pipeline_mode = #tpu.pipeline_mode<synchronous>, transform_indices = @transform_2, window_bounds = array<i64: 1, 128>}, {transform_indices = @transform_3, window_bounds = array<i64: 1, 144, 128>}]} {
    %c0 = arith.constant 0 : index
    %c0_0 = arith.constant 0 : index
    %c0_1 = arith.constant 0 : index
    %0 = vector.load %arg1[%c0, %c0_0, %c0_1] : memref<1x144x128xf32, #tpu.memory_space<vmem>>, vector<1x144x128xf32>
    %1 = vector.shape_cast %0 : vector<1x144x128xf32> to vector<144x128xf32>
    %c0_2 = arith.constant 0 : index
    %c0_3 = arith.constant 0 : index
    %2 = vector.load %arg2[%c0_2, %c0_3] : memref<1x128xf32, #tpu.memory_space<vmem>>, vector<1x128xf32>
    %3 = vector.broadcast %2 : vector<1x128xf32> to vector<144x128xf32>
    %4 = arith.mulf %1, %3 : vector<144x128xf32>
    %c0_4 = arith.constant 0 : index
    %c0_5 = arith.constant 0 : index
    %5 = vector.load %arg3[%c0_4, %c0_5] : memref<1x128xf32, #tpu.memory_space<vmem>>, vector<1x128xf32>
    %6 = vector.broadcast %5 : vector<1x128xf32> to vector<144x128xf32>
    %7 = arith.addf %4, %6 : vector<144x128xf32>
    %cst = arith.constant 0.000000e+00 : f32
    %8 = vector.broadcast %cst : f32 to vector<144x128xf32>
    %9 = arith.maximumf %7, %8 : vector<144x128xf32>
    %c0_6 = arith.constant 0 : index
    %c0_7 = arith.constant 0 : index
    %c0_8 = arith.constant 0 : index
    %10 = vector.load %arg4[%c0_6, %c0_7, %c0_8] : memref<1x144x128xf32, #tpu.memory_space<vmem>>, vector<1x144x128xf32>
    %11 = vector.shape_cast %10 : vector<1x144x128xf32> to vector<144x128xf32>
    %12 = vector.shape_cast %9 : vector<144x128xf32> to vector<1x144x128xf32>
    tpu.vector_store %arg4[%c0_6, %c0_7, %c0_8], %12 {strides = array<i32>} : memref<1x144x128xf32, #tpu.memory_space<vmem>>, vector<1x144x128xf32>,
    return
  }
  func.func @transform_0(%arg0: i32) -> (i32, i32, i32) {
    %c0_i32 = arith.constant 0 : i32
    %c0_i32_0 = arith.constant 0 : i32
    %c0_i32_1 = arith.constant 0 : i32
    return %arg0, %c0_i32, %c0_i32_0 : i32, i32, i32
  }
  func.func @transform_1(%arg0: i32) -> (i32, i32) {
    %c0_i32 = arith.constant 0 : i32
    %c0_i32_0 = arith.constant 0 : i32
    %c0_i32_1 = arith.constant 0 : i32
    return %c0_i32, %c0_i32_0 : i32, i32
  }
  func.func @transform_2(%arg0: i32) -> (i32, i32) {
    %c0_i32 = arith.constant 0 : i32
    %c0_i32_0 = arith.constant 0 : i32
    %c0_i32_1 = arith.constant 0 : i32
    return %c0_i32, %c0_i32_0 : i32, i32
  }
  func.func @transform_3(%arg0: i32) -> (i32, i32, i32) {
    %c0_i32 = arith.constant 0 : i32
    %c0_i32_0 = arith.constant 0 : i32
    %c0_i32_1 = arith.constant 0 : i32
    return %arg0, %c0_i32, %c0_i32_0 : i32, i32, i32
  }
}

module attributes {stable_mosaic.version = 11 : i64} {
  func.func @kernel(%arg0: i32, %arg1: memref<1x163x4xbf16, #tpu.memory_space<vmem>>, %arg2: memref<1x163x4xbf16, #tpu.memory_space<vmem>>, %arg3: memref<9x4x128xbf16, #tpu.memory_space<vmem>>, %arg4: memref<144x1xf32, #tpu.memory_space<vmem>>, %arg5: memref<1x144x128xf32, #tpu.memory_space<vmem>>, %arg6: memref<1x128xf32, #tpu.memory_space<vmem>>, %arg7: memref<1x128xf32, #tpu.memory_space<vmem>>) attributes {dimension_semantics = [#tpu.dimension_semantics<arbitrary>], iteration_bounds = array<i64: 2>, scalar_prefetch = 0 : i64, scratch_operands = 0 : i64, tpu.core_type = #tpu.core_type<tc>, window_params = [{transform_indices = @transform_0, window_bounds = array<i64: 1, 163, 4>}, {transform_indices = @transform_1, window_bounds = array<i64: 1, 163, 4>}, {pipeline_mode = #tpu.pipeline_mode<synchronous>, transform_indices = @transform_2, window_bounds = array<i64: 9, 4, 128>}, {pipeline_mode = #tpu.pipeline_mode<synchronous>, transform_indices = @transform_3, window_bounds = array<i64: 144, 1>}, {transform_indices = @transform_4, window_bounds = array<i64: 1, 144, 128>}, {pipeline_mode = #tpu.pipeline_mode<synchronous>, transform_indices = @transform_5, window_bounds = array<i64: 1, 128>}, {pipeline_mode = #tpu.pipeline_mode<synchronous>, transform_indices = @transform_6, window_bounds = array<i64: 1, 128>}]} {
    %c0 = arith.constant 0 : index
    %c0_0 = arith.constant 0 : index
    %c0_1 = arith.constant 0 : index
    %0 = vector.load %arg1[%c0, %c0_0, %c0_1] : memref<1x163x4xbf16, #tpu.memory_space<vmem>>, vector<1x144x4xbf16>
    %1 = vector.shape_cast %0 : vector<1x144x4xbf16> to vector<144x4xbf16>
    %c0_2 = arith.constant 0 : index
    %c0_3 = arith.constant 0 : index
    %c0_4 = arith.constant 0 : index
    %2 = vector.load %arg3[%c0_2, %c0_3, %c0_4] : memref<9x4x128xbf16, #tpu.memory_space<vmem>>, vector<1x4x128xbf16>
    %3 = vector.shape_cast %2 : vector<1x4x128xbf16> to vector<4x128xbf16>
    %cst = arith.constant dense<0.000000e+00> : vector<144x128xf32>
    %4 = tpu.matmul %1, %3, %cst {dimension_numbers = #tpu.dot_dimension_numbers<[1], [0], [0], [1], [0, 0, 1, 1], [], []>} : vector<144x4xbf16>, vector<4x128xbf16>, vector<144x128xf32> -> vector<144x128xf32>
    %c0_5 = arith.constant 0 : index
    %c0_6 = arith.constant 0 : index
    %c0_7 = arith.constant 0 : index
    %5 = vector.load %arg2[%c0_5, %c0_6, %c0_7] : memref<1x163x4xbf16, #tpu.memory_space<vmem>>, vector<1x144x4xbf16>
    %6 = vector.shape_cast %5 : vector<1x144x4xbf16> to vector<144x4xbf16>
    %c1 = arith.constant 1 : index
    %c0_8 = arith.constant 0 : index
    %c0_9 = arith.constant 0 : index
    %7 = vector.load %arg3[%c1, %c0_8, %c0_9] : memref<9x4x128xbf16, #tpu.memory_space<vmem>>, vector<1x4x128xbf16>
    %8 = vector.shape_cast %7 : vector<1x4x128xbf16> to vector<4x128xbf16>
    %cst_10 = arith.constant dense<0.000000e+00> : vector<144x128xf32>
    %9 = tpu.matmul %6, %8, %cst_10 {dimension_numbers = #tpu.dot_dimension_numbers<[1], [0], [0], [1], [0, 0, 1, 1], [], []>} : vector<144x4xbf16>, vector<4x128xbf16>, vector<144x128xf32> -> vector<144x128xf32>
    %10 = arith.addf %4, %9 : vector<144x128xf32>
    %c0_11 = arith.constant 0 : index
    %c1_12 = arith.constant 1 : index
    %c0_13 = arith.constant 0 : index
    %11 = vector.load %arg1[%c0_11, %c1_12, %c0_13] : memref<1x163x4xbf16, #tpu.memory_space<vmem>>, vector<1x144x4xbf16>
    %12 = vector.shape_cast %11 : vector<1x144x4xbf16> to vector<144x4xbf16>
    %c2 = arith.constant 2 : index
    %c0_14 = arith.constant 0 : index
    %c0_15 = arith.constant 0 : index
    %13 = vector.load %arg3[%c2, %c0_14, %c0_15] : memref<9x4x128xbf16, #tpu.memory_space<vmem>>, vector<1x4x128xbf16>
    %14 = vector.shape_cast %13 : vector<1x4x128xbf16> to vector<4x128xbf16>
    %cst_16 = arith.constant dense<0.000000e+00> : vector<144x128xf32>
    %15 = tpu.matmul %12, %14, %cst_16 {dimension_numbers = #tpu.dot_dimension_numbers<[1], [0], [0], [1], [0, 0, 1, 1], [], []>} : vector<144x4xbf16>, vector<4x128xbf16>, vector<144x128xf32> -> vector<144x128xf32>
    %16 = arith.addf %10, %15 : vector<144x128xf32>
    %c0_17 = arith.constant 0 : index
    %c9 = arith.constant 9 : index
    %c0_18 = arith.constant 0 : index
    %17 = vector.load %arg1[%c0_17, %c9, %c0_18] : memref<1x163x4xbf16, #tpu.memory_space<vmem>>, vector<1x144x4xbf16>
    %18 = vector.shape_cast %17 : vector<1x144x4xbf16> to vector<144x4xbf16>
    %c3 = arith.constant 3 : index
    %c0_19 = arith.constant 0 : index
    %c0_20 = arith.constant 0 : index
    %19 = vector.load %arg3[%c3, %c0_19, %c0_20] : memref<9x4x128xbf16, #tpu.memory_space<vmem>>, vector<1x4x128xbf16>
    %20 = vector.shape_cast %19 : vector<1x4x128xbf16> to vector<4x128xbf16>
    %cst_21 = arith.constant dense<0.000000e+00> : vector<144x128xf32>
    %21 = tpu.matmul %18, %20, %cst_21 {dimension_numbers = #tpu.dot_dimension_numbers<[1], [0], [0], [1], [0, 0, 1, 1], [], []>} : vector<144x4xbf16>, vector<4x128xbf16>, vector<144x128xf32> -> vector<144x128xf32>
    %22 = arith.addf %16, %21 : vector<144x128xf32>
    %c0_22 = arith.constant 0 : index
    %c9_23 = arith.constant 9 : index
    %c0_24 = arith.constant 0 : index
    %23 = vector.load %arg2[%c0_22, %c9_23, %c0_24] : memref<1x163x4xbf16, #tpu.memory_space<vmem>>, vector<1x144x4xbf16>
    %24 = vector.shape_cast %23 : vector<1x144x4xbf16> to vector<144x4xbf16>
    %c4 = arith.constant 4 : index
    %c0_25 = arith.constant 0 : index
    %c0_26 = arith.constant 0 : index
    %25 = vector.load %arg3[%c4, %c0_25, %c0_26] : memref<9x4x128xbf16, #tpu.memory_space<vmem>>, vector<1x4x128xbf16>
    %26 = vector.shape_cast %25 : vector<1x4x128xbf16> to vector<4x128xbf16>
    %cst_27 = arith.constant dense<0.000000e+00> : vector<144x128xf32>
    %27 = tpu.matmul %24, %26, %cst_27 {dimension_numbers = #tpu.dot_dimension_numbers<[1], [0], [0], [1], [0, 0, 1, 1], [], []>} : vector<144x4xbf16>, vector<4x128xbf16>, vector<144x128xf32> -> vector<144x128xf32>
    %28 = arith.addf %22, %27 : vector<144x128xf32>
    %c0_28 = arith.constant 0 : index
    %c10 = arith.constant 10 : index
    %c0_29 = arith.constant 0 : index
    %29 = vector.load %arg1[%c0_28, %c10, %c0_29] : memref<1x163x4xbf16, #tpu.memory_space<vmem>>, vector<1x144x4xbf16>
    %30 = vector.shape_cast %29 : vector<1x144x4xbf16> to vector<144x4xbf16>
    %c5 = arith.constant 5 : index
    %c0_30 = arith.constant 0 : index
    %c0_31 = arith.constant 0 : index
    %31 = vector.load %arg3[%c5, %c0_30, %c0_31] : memref<9x4x128xbf16, #tpu.memory_space<vmem>>, vector<1x4x128xbf16>
    %32 = vector.shape_cast %31 : vector<1x4x128xbf16> to vector<4x128xbf16>
    %cst_32 = arith.constant dense<0.000000e+00> : vector<144x128xf32>
    %33 = tpu.matmul %30, %32, %cst_32 {dimension_numbers = #tpu.dot_dimension_numbers<[1], [0], [0], [1], [0, 0, 1, 1], [], []>} : vector<144x4xbf16>, vector<4x128xbf16>, vector<144x128xf32> -> vector<144x128xf32>
    %34 = arith.addf %28, %33 : vector<144x128xf32>
    %c0_33 = arith.constant 0 : index
    %c18 = arith.constant 18 : index
    %c0_34 = arith.constant 0 : index
    %35 = vector.load %arg1[%c0_33, %c18, %c0_34] : memref<1x163x4xbf16, #tpu.memory_space<vmem>>, vector<1x144x4xbf16>
    %36 = vector.shape_cast %35 : vector<1x144x4xbf16> to vector<144x4xbf16>
    %c6 = arith.constant 6 : index
    %c0_35 = arith.constant 0 : index
    %c0_36 = arith.constant 0 : index
    %37 = vector.load %arg3[%c6, %c0_35, %c0_36] : memref<9x4x128xbf16, #tpu.memory_space<vmem>>, vector<1x4x128xbf16>
    %38 = vector.shape_cast %37 : vector<1x4x128xbf16> to vector<4x128xbf16>
    %cst_37 = arith.constant dense<0.000000e+00> : vector<144x128xf32>
    %39 = tpu.matmul %36, %38, %cst_37 {dimension_numbers = #tpu.dot_dimension_numbers<[1], [0], [0], [1], [0, 0, 1, 1], [], []>} : vector<144x4xbf16>, vector<4x128xbf16>, vector<144x128xf32> -> vector<144x128xf32>
    %40 = arith.addf %34, %39 : vector<144x128xf32>
    %c0_38 = arith.constant 0 : index
    %c18_39 = arith.constant 18 : index
    %c0_40 = arith.constant 0 : index
    %41 = vector.load %arg2[%c0_38, %c18_39, %c0_40] : memref<1x163x4xbf16, #tpu.memory_space<vmem>>, vector<1x144x4xbf16>
    %42 = vector.shape_cast %41 : vector<1x144x4xbf16> to vector<144x4xbf16>
    %c7 = arith.constant 7 : index
    %c0_41 = arith.constant 0 : index
    %c0_42 = arith.constant 0 : index
    %43 = vector.load %arg3[%c7, %c0_41, %c0_42] : memref<9x4x128xbf16, #tpu.memory_space<vmem>>, vector<1x4x128xbf16>
    %44 = vector.shape_cast %43 : vector<1x4x128xbf16> to vector<4x128xbf16>
    %cst_43 = arith.constant dense<0.000000e+00> : vector<144x128xf32>
    %45 = tpu.matmul %42, %44, %cst_43 {dimension_numbers = #tpu.dot_dimension_numbers<[1], [0], [0], [1], [0, 0, 1, 1], [], []>} : vector<144x4xbf16>, vector<4x128xbf16>, vector<144x128xf32> -> vector<144x128xf32>
    %46 = arith.addf %40, %45 : vector<144x128xf32>
    %c0_44 = arith.constant 0 : index
    %c19 = arith.constant 19 : index
    %c0_45 = arith.constant 0 : index
    %47 = vector.load %arg1[%c0_44, %c19, %c0_45] : memref<1x163x4xbf16, #tpu.memory_space<vmem>>, vector<1x144x4xbf16>
    %48 = vector.shape_cast %47 : vector<1x144x4xbf16> to vector<144x4xbf16>
    %c8 = arith.constant 8 : index
    %c0_46 = arith.constant 0 : index
    %c0_47 = arith.constant 0 : index
    %49 = vector.load %arg3[%c8, %c0_46, %c0_47] : memref<9x4x128xbf16, #tpu.memory_space<vmem>>, vector<1x4x128xbf16>
    %50 = vector.shape_cast %49 : vector<1x4x128xbf16> to vector<4x128xbf16>
    %cst_48 = arith.constant dense<0.000000e+00> : vector<144x128xf32>
    %51 = tpu.matmul %48, %50, %cst_48 {dimension_numbers = #tpu.dot_dimension_numbers<[1], [0], [0], [1], [0, 0, 1, 1], [], []>} : vector<144x4xbf16>, vector<4x128xbf16>, vector<144x128xf32> -> vector<144x128xf32>
    %52 = arith.addf %46, %51 : vector<144x128xf32>
    %c0_49 = arith.constant 0 : index
    %c0_50 = arith.constant 0 : index
    %c0_51 = arith.constant 0 : index
    %53 = vector.load %arg5[%c0_49, %c0_50, %c0_51] : memref<1x144x128xf32, #tpu.memory_space<vmem>>, vector<1x144x128xf32>
    %54 = vector.shape_cast %53 : vector<1x144x128xf32> to vector<144x128xf32>
    %55 = vector.shape_cast %52 : vector<144x128xf32> to vector<1x144x128xf32>
    tpu.vector_store %arg5[%c0_49, %c0_50, %c0_51], %55 {strides = array<i32>} : memref<1x144x128xf32, #tpu.memory_space<vmem>>, vector<1x144x128xf32>,
    %c0_i32 = arith.constant 0 : i32
    %56 = arith.cmpi eq, %arg0, %c0_i32 : i32
    %57 = arith.extui %56 : i1 to i32
    %c0_i32_52 = arith.constant 0 : i32
    %58 = arith.cmpi ne, %57, %c0_i32_52 : i32
    scf.if %58 {
      %cst_65 = arith.constant 0.000000e+00 : f32
      %73 = vector.broadcast %cst_65 : f32 to vector<1x128xf32>
      %c0_66 = arith.constant 0 : index
      %c0_67 = arith.constant 0 : index
      %74 = vector.load %arg6[%c0_66, %c0_67] : memref<1x128xf32, #tpu.memory_space<vmem>>, vector<1x128xf32>
      tpu.vector_store %arg6[%c0_66, %c0_67], %73 {strides = array<i32>} : memref<1x128xf32, #tpu.memory_space<vmem>>, vector<1x128xf32>,
      %cst_68 = arith.constant 0.000000e+00 : f32
      %75 = vector.broadcast %cst_68 : f32 to vector<1x128xf32>
      %c0_69 = arith.constant 0 : index
      %c0_70 = arith.constant 0 : index
      %76 = vector.load %arg7[%c0_69, %c0_70] : memref<1x128xf32, #tpu.memory_space<vmem>>, vector<1x128xf32>
      tpu.vector_store %arg7[%c0_69, %c0_70], %75 {strides = array<i32>} : memref<1x128xf32, #tpu.memory_space<vmem>>, vector<1x128xf32>,
    } else {
    }
    %c0_53 = arith.constant 0 : index
    %c0_54 = arith.constant 0 : index
    %59 = vector.load %arg4[%c0_53, %c0_54] : memref<144x1xf32, #tpu.memory_space<vmem>>, vector<144x1xf32>
    %60 = vector.broadcast %59 : vector<144x1xf32> to vector<144x128xf32>
    %61 = arith.mulf %52, %60 : vector<144x128xf32>
    %c0_55 = arith.constant 0 : index
    %c0_56 = arith.constant 0 : index
    %62 = vector.load %arg6[%c0_55, %c0_56] : memref<1x128xf32, #tpu.memory_space<vmem>>, vector<1x128xf32>
    %cst_57 = arith.constant dense<0.000000e+00> : vector<128xf32>
    %63 = vector.multi_reduction <add>, %61, %cst_57 [0] : vector<144x128xf32> to vector<128xf32>
    %64 = vector.shape_cast %63 : vector<128xf32> to vector<1x128xf32>
    %65 = arith.addf %62, %64 : vector<1x128xf32>
    %c0_58 = arith.constant 0 : index
    %c0_59 = arith.constant 0 : index
    %66 = vector.load %arg6[%c0_58, %c0_59] : memref<1x128xf32, #tpu.memory_space<vmem>>, vector<1x128xf32>
    tpu.vector_store %arg6[%c0_58, %c0_59], %65 {strides = array<i32>} : memref<1x128xf32, #tpu.memory_space<vmem>>, vector<1x128xf32>,
    %c0_60 = arith.constant 0 : index
    %c0_61 = arith.constant 0 : index
    %67 = vector.load %arg7[%c0_60, %c0_61] : memref<1x128xf32, #tpu.memory_space<vmem>>, vector<1x128xf32>
    %68 = arith.mulf %61, %52 : vector<144x128xf32>
    %cst_62 = arith.constant dense<0.000000e+00> : vector<128xf32>
    %69 = vector.multi_reduction <add>, %68, %cst_62 [0] : vector<144x128xf32> to vector<128xf32>
    %70 = vector.shape_cast %69 : vector<128xf32> to vector<1x128xf32>
    %71 = arith.addf %67, %70 : vector<1x128xf32>
    %c0_63 = arith.constant 0 : index
    %c0_64 = arith.constant 0 : index
    %72 = vector.load %arg7[%c0_63, %c0_64] : memref<1x128xf32, #tpu.memory_space<vmem>>, vector<1x128xf32>
    tpu.vector_store %arg7[%c0_63, %c0_64], %71 {strides = array<i32>} : memref<1x128xf32, #tpu.memory_space<vmem>>, vector<1x128xf32>,
    return
  }
  func.func @transform_0(%arg0: i32) -> (i32, i32, i32) {
    %c0_i32 = arith.constant 0 : i32
    %c0_i32_0 = arith.constant 0 : i32
    %c0_i32_1 = arith.constant 0 : i32
    return %arg0, %c0_i32, %c0_i32_0 : i32, i32, i32
  }
  func.func @transform_1(%arg0: i32) -> (i32, i32, i32) {
    %c0_i32 = arith.constant 0 : i32
    %c0_i32_0 = arith.constant 0 : i32
    %c0_i32_1 = arith.constant 0 : i32
    return %arg0, %c0_i32, %c0_i32_0 : i32, i32, i32
  }
  func.func @transform_2(%arg0: i32) -> (i32, i32, i32) {
    %c0_i32 = arith.constant 0 : i32
    %c0_i32_0 = arith.constant 0 : i32
    %c0_i32_1 = arith.constant 0 : i32
    %c0_i32_2 = arith.constant 0 : i32
    return %c0_i32, %c0_i32_0, %c0_i32_1 : i32, i32, i32
  }
  func.func @transform_3(%arg0: i32) -> (i32, i32) {
    %c0_i32 = arith.constant 0 : i32
    %c0_i32_0 = arith.constant 0 : i32
    %c0_i32_1 = arith.constant 0 : i32
    return %c0_i32, %c0_i32_0 : i32, i32
  }
  func.func @transform_4(%arg0: i32) -> (i32, i32, i32) {
    %c0_i32 = arith.constant 0 : i32
    %c0_i32_0 = arith.constant 0 : i32
    %c0_i32_1 = arith.constant 0 : i32
    return %arg0, %c0_i32, %c0_i32_0 : i32, i32, i32
  }
  func.func @transform_5(%arg0: i32) -> (i32, i32) {
    %c0_i32 = arith.constant 0 : i32
    %c0_i32_0 = arith.constant 0 : i32
    %c0_i32_1 = arith.constant 0 : i32
    return %c0_i32, %c0_i32_0 : i32, i32
  }
  func.func @transform_6(%arg0: i32) -> (i32, i32) {
    %c0_i32 = arith.constant 0 : i32
    %c0_i32_0 = arith.constant 0 : i32
    %c0_i32_1 = arith.constant 0 : i32
    return %c0_i32, %c0_i32_0 : i32, i32
  }
}

module attributes {stable_mosaic.version = 11 : i64} {
  func.func @kernel(%arg0: i32, %arg1: memref<1x102x8xbf16, #tpu.memory_space<vmem>>, %arg2: memref<9x8x128xbf16, #tpu.memory_space<vmem>>, %arg3: memref<80x1xf32, #tpu.memory_space<vmem>>, %arg4: memref<1x80x4xbf16, #tpu.memory_space<vmem>>, %arg5: memref<4x128xbf16, #tpu.memory_space<vmem>>, %arg6: memref<1x80x128xf32, #tpu.memory_space<vmem>>, %arg7: memref<1x128xf32, #tpu.memory_space<vmem>>, %arg8: memref<1x128xf32, #tpu.memory_space<vmem>>, %arg9: memref<1x128xf32, #tpu.memory_space<vmem>>, %arg10: memref<1x128xf32, #tpu.memory_space<vmem>>) attributes {dimension_semantics = [#tpu.dimension_semantics<arbitrary>], iteration_bounds = array<i64: 2>, scalar_prefetch = 0 : i64, scratch_operands = 0 : i64, tpu.core_type = #tpu.core_type<tc>, window_params = [{transform_indices = @transform_0, window_bounds = array<i64: 1, 102, 8>}, {pipeline_mode = #tpu.pipeline_mode<synchronous>, transform_indices = @transform_1, window_bounds = array<i64: 9, 8, 128>}, {pipeline_mode = #tpu.pipeline_mode<synchronous>, transform_indices = @transform_2, window_bounds = array<i64: 80, 1>}, {transform_indices = @transform_3, window_bounds = array<i64: 1, 80, 4>}, {pipeline_mode = #tpu.pipeline_mode<synchronous>, transform_indices = @transform_4, window_bounds = array<i64: 4, 128>}, {transform_indices = @transform_5, window_bounds = array<i64: 1, 80, 128>}, {pipeline_mode = #tpu.pipeline_mode<synchronous>, transform_indices = @transform_6, window_bounds = array<i64: 1, 128>}, {pipeline_mode = #tpu.pipeline_mode<synchronous>, transform_indices = @transform_7, window_bounds = array<i64: 1, 128>}, {pipeline_mode = #tpu.pipeline_mode<synchronous>, transform_indices = @transform_8, window_bounds = array<i64: 1, 128>}, {pipeline_mode = #tpu.pipeline_mode<synchronous>, transform_indices = @transform_9, window_bounds = array<i64: 1, 128>}]} {
    %c0 = arith.constant 0 : index
    %c0_0 = arith.constant 0 : index
    %c0_1 = arith.constant 0 : index
    %0 = vector.load %arg1[%c0, %c0_0, %c0_1] : memref<1x102x8xbf16, #tpu.memory_space<vmem>>, vector<1x80x8xbf16>
    %1 = vector.shape_cast %0 : vector<1x80x8xbf16> to vector<80x8xbf16>
    %c0_2 = arith.constant 0 : index
    %c0_3 = arith.constant 0 : index
    %c0_4 = arith.constant 0 : index
    %2 = vector.load %arg2[%c0_2, %c0_3, %c0_4] : memref<9x8x128xbf16, #tpu.memory_space<vmem>>, vector<1x8x128xbf16>
    %3 = vector.shape_cast %2 : vector<1x8x128xbf16> to vector<8x128xbf16>
    %cst = arith.constant dense<0.000000e+00> : vector<80x128xf32>
    %4 = tpu.matmul %1, %3, %cst {dimension_numbers = #tpu.dot_dimension_numbers<[1], [0], [0], [1], [0, 0, 1, 1], [], []>} : vector<80x8xbf16>, vector<8x128xbf16>, vector<80x128xf32> -> vector<80x128xf32>
    %c0_5 = arith.constant 0 : index
    %c1 = arith.constant 1 : index
    %c0_6 = arith.constant 0 : index
    %5 = vector.load %arg1[%c0_5, %c1, %c0_6] : memref<1x102x8xbf16, #tpu.memory_space<vmem>>, vector<1x80x8xbf16>
    %6 = vector.shape_cast %5 : vector<1x80x8xbf16> to vector<80x8xbf16>
    %c1_7 = arith.constant 1 : index
    %c0_8 = arith.constant 0 : index
    %c0_9 = arith.constant 0 : index
    %7 = vector.load %arg2[%c1_7, %c0_8, %c0_9] : memref<9x8x128xbf16, #tpu.memory_space<vmem>>, vector<1x8x128xbf16>
    %8 = vector.shape_cast %7 : vector<1x8x128xbf16> to vector<8x128xbf16>
    %cst_10 = arith.constant dense<0.000000e+00> : vector<80x128xf32>
    %9 = tpu.matmul %6, %8, %cst_10 {dimension_numbers = #tpu.dot_dimension_numbers<[1], [0], [0], [1], [0, 0, 1, 1], [], []>} : vector<80x8xbf16>, vector<8x128xbf16>, vector<80x128xf32> -> vector<80x128xf32>
    %10 = arith.addf %4, %9 : vector<80x128xf32>
    %c0_11 = arith.constant 0 : index
    %c2 = arith.constant 2 : index
    %c0_12 = arith.constant 0 : index
    %11 = vector.load %arg1[%c0_11, %c2, %c0_12] : memref<1x102x8xbf16, #tpu.memory_space<vmem>>, vector<1x80x8xbf16>
    %12 = vector.shape_cast %11 : vector<1x80x8xbf16> to vector<80x8xbf16>
    %c2_13 = arith.constant 2 : index
    %c0_14 = arith.constant 0 : index
    %c0_15 = arith.constant 0 : index
    %13 = vector.load %arg2[%c2_13, %c0_14, %c0_15] : memref<9x8x128xbf16, #tpu.memory_space<vmem>>, vector<1x8x128xbf16>
    %14 = vector.shape_cast %13 : vector<1x8x128xbf16> to vector<8x128xbf16>
    %cst_16 = arith.constant dense<0.000000e+00> : vector<80x128xf32>
    %15 = tpu.matmul %12, %14, %cst_16 {dimension_numbers = #tpu.dot_dimension_numbers<[1], [0], [0], [1], [0, 0, 1, 1], [], []>} : vector<80x8xbf16>, vector<8x128xbf16>, vector<80x128xf32> -> vector<80x128xf32>
    %16 = arith.addf %10, %15 : vector<80x128xf32>
    %c0_17 = arith.constant 0 : index
    %c10 = arith.constant 10 : index
    %c0_18 = arith.constant 0 : index
    %17 = vector.load %arg1[%c0_17, %c10, %c0_18] : memref<1x102x8xbf16, #tpu.memory_space<vmem>>, vector<1x80x8xbf16>
    %18 = vector.shape_cast %17 : vector<1x80x8xbf16> to vector<80x8xbf16>
    %c3 = arith.constant 3 : index
    %c0_19 = arith.constant 0 : index
    %c0_20 = arith.constant 0 : index
    %19 = vector.load %arg2[%c3, %c0_19, %c0_20] : memref<9x8x128xbf16, #tpu.memory_space<vmem>>, vector<1x8x128xbf16>
    %20 = vector.shape_cast %19 : vector<1x8x128xbf16> to vector<8x128xbf16>
    %cst_21 = arith.constant dense<0.000000e+00> : vector<80x128xf32>
    %21 = tpu.matmul %18, %20, %cst_21 {dimension_numbers = #tpu.dot_dimension_numbers<[1], [0], [0], [1], [0, 0, 1, 1], [], []>} : vector<80x8xbf16>, vector<8x128xbf16>, vector<80x128xf32> -> vector<80x128xf32>
    %22 = arith.addf %16, %21 : vector<80x128xf32>
    %c0_22 = arith.constant 0 : index
    %c11 = arith.constant 11 : index
    %c0_23 = arith.constant 0 : index
    %23 = vector.load %arg1[%c0_22, %c11, %c0_23] : memref<1x102x8xbf16, #tpu.memory_space<vmem>>, vector<1x80x8xbf16>
    %24 = vector.shape_cast %23 : vector<1x80x8xbf16> to vector<80x8xbf16>
    %c4 = arith.constant 4 : index
    %c0_24 = arith.constant 0 : index
    %c0_25 = arith.constant 0 : index
    %25 = vector.load %arg2[%c4, %c0_24, %c0_25] : memref<9x8x128xbf16, #tpu.memory_space<vmem>>, vector<1x8x128xbf16>
    %26 = vector.shape_cast %25 : vector<1x8x128xbf16> to vector<8x128xbf16>
    %cst_26 = arith.constant dense<0.000000e+00> : vector<80x128xf32>
    %27 = tpu.matmul %24, %26, %cst_26 {dimension_numbers = #tpu.dot_dimension_numbers<[1], [0], [0], [1], [0, 0, 1, 1], [], []>} : vector<80x8xbf16>, vector<8x128xbf16>, vector<80x128xf32> -> vector<80x128xf32>
    %28 = arith.addf %22, %27 : vector<80x128xf32>
    %c0_27 = arith.constant 0 : index
    %c12 = arith.constant 12 : index
    %c0_28 = arith.constant 0 : index
    %29 = vector.load %arg1[%c0_27, %c12, %c0_28] : memref<1x102x8xbf16, #tpu.memory_space<vmem>>, vector<1x80x8xbf16>
    %30 = vector.shape_cast %29 : vector<1x80x8xbf16> to vector<80x8xbf16>
    %c5 = arith.constant 5 : index
    %c0_29 = arith.constant 0 : index
    %c0_30 = arith.constant 0 : index
    %31 = vector.load %arg2[%c5, %c0_29, %c0_30] : memref<9x8x128xbf16, #tpu.memory_space<vmem>>, vector<1x8x128xbf16>
    %32 = vector.shape_cast %31 : vector<1x8x128xbf16> to vector<8x128xbf16>
    %cst_31 = arith.constant dense<0.000000e+00> : vector<80x128xf32>
    %33 = tpu.matmul %30, %32, %cst_31 {dimension_numbers = #tpu.dot_dimension_numbers<[1], [0], [0], [1], [0, 0, 1, 1], [], []>} : vector<80x8xbf16>, vector<8x128xbf16>, vector<80x128xf32> -> vector<80x128xf32>
    %34 = arith.addf %28, %33 : vector<80x128xf32>
    %c0_32 = arith.constant 0 : index
    %c20 = arith.constant 20 : index
    %c0_33 = arith.constant 0 : index
    %35 = vector.load %arg1[%c0_32, %c20, %c0_33] : memref<1x102x8xbf16, #tpu.memory_space<vmem>>, vector<1x80x8xbf16>
    %36 = vector.shape_cast %35 : vector<1x80x8xbf16> to vector<80x8xbf16>
    %c6 = arith.constant 6 : index
    %c0_34 = arith.constant 0 : index
    %c0_35 = arith.constant 0 : index
    %37 = vector.load %arg2[%c6, %c0_34, %c0_35] : memref<9x8x128xbf16, #tpu.memory_space<vmem>>, vector<1x8x128xbf16>
    %38 = vector.shape_cast %37 : vector<1x8x128xbf16> to vector<8x128xbf16>
    %cst_36 = arith.constant dense<0.000000e+00> : vector<80x128xf32>
    %39 = tpu.matmul %36, %38, %cst_36 {dimension_numbers = #tpu.dot_dimension_numbers<[1], [0], [0], [1], [0, 0, 1, 1], [], []>} : vector<80x8xbf16>, vector<8x128xbf16>, vector<80x128xf32> -> vector<80x128xf32>
    %40 = arith.addf %34, %39 : vector<80x128xf32>
    %c0_37 = arith.constant 0 : index
    %c21 = arith.constant 21 : index
    %c0_38 = arith.constant 0 : index
    %41 = vector.load %arg1[%c0_37, %c21, %c0_38] : memref<1x102x8xbf16, #tpu.memory_space<vmem>>, vector<1x80x8xbf16>
    %42 = vector.shape_cast %41 : vector<1x80x8xbf16> to vector<80x8xbf16>
    %c7 = arith.constant 7 : index
    %c0_39 = arith.constant 0 : index
    %c0_40 = arith.constant 0 : index
    %43 = vector.load %arg2[%c7, %c0_39, %c0_40] : memref<9x8x128xbf16, #tpu.memory_space<vmem>>, vector<1x8x128xbf16>
    %44 = vector.shape_cast %43 : vector<1x8x128xbf16> to vector<8x128xbf16>
    %cst_41 = arith.constant dense<0.000000e+00> : vector<80x128xf32>
    %45 = tpu.matmul %42, %44, %cst_41 {dimension_numbers = #tpu.dot_dimension_numbers<[1], [0], [0], [1], [0, 0, 1, 1], [], []>} : vector<80x8xbf16>, vector<8x128xbf16>, vector<80x128xf32> -> vector<80x128xf32>
    %46 = arith.addf %40, %45 : vector<80x128xf32>
    %c0_42 = arith.constant 0 : index
    %c22 = arith.constant 22 : index
    %c0_43 = arith.constant 0 : index
    %47 = vector.load %arg1[%c0_42, %c22, %c0_43] : memref<1x102x8xbf16, #tpu.memory_space<vmem>>, vector<1x80x8xbf16>
    %48 = vector.shape_cast %47 : vector<1x80x8xbf16> to vector<80x8xbf16>
    %c8 = arith.constant 8 : index
    %c0_44 = arith.constant 0 : index
    %c0_45 = arith.constant 0 : index
    %49 = vector.load %arg2[%c8, %c0_44, %c0_45] : memref<9x8x128xbf16, #tpu.memory_space<vmem>>, vector<1x8x128xbf16>
    %50 = vector.shape_cast %49 : vector<1x8x128xbf16> to vector<8x128xbf16>
    %cst_46 = arith.constant dense<0.000000e+00> : vector<80x128xf32>
    %51 = tpu.matmul %48, %50, %cst_46 {dimension_numbers = #tpu.dot_dimension_numbers<[1], [0], [0], [1], [0, 0, 1, 1], [], []>} : vector<80x8xbf16>, vector<8x128xbf16>, vector<80x128xf32> -> vector<80x128xf32>
    %52 = arith.addf %46, %51 : vector<80x128xf32>
    %c0_47 = arith.constant 0 : index
    %c0_48 = arith.constant 0 : index
    %c0_49 = arith.constant 0 : index
    %53 = vector.load %arg6[%c0_47, %c0_48, %c0_49] : memref<1x80x128xf32, #tpu.memory_space<vmem>>, vector<1x80x128xf32>
    %54 = vector.shape_cast %53 : vector<1x80x128xf32> to vector<80x128xf32>
    %55 = vector.shape_cast %52 : vector<80x128xf32> to vector<1x80x128xf32>
    tpu.vector_store %arg6[%c0_47, %c0_48, %c0_49], %55 {strides = array<i32>} : memref<1x80x128xf32, #tpu.memory_space<vmem>>, vector<1x80x128xf32>,
    %c0_i32 = arith.constant 0 : i32
    %56 = arith.cmpi eq, %arg0, %c0_i32 : i32
    %57 = arith.extui %56 : i1 to i32
    %c0_i32_50 = arith.constant 0 : i32
    %58 = arith.cmpi ne, %57, %c0_i32_50 : i32
    scf.if %58 {
      %cst_79 = arith.constant 0.000000e+00 : f32
      %90 = vector.broadcast %cst_79 : f32 to vector<1x128xf32>
      %c0_80 = arith.constant 0 : index
      %c0_81 = arith.constant 0 : index
      %91 = vector.load %arg7[%c0_80, %c0_81] : memref<1x128xf32, #tpu.memory_space<vmem>>, vector<1x128xf32>
      tpu.vector_store %arg7[%c0_80, %c0_81], %90 {strides = array<i32>} : memref<1x128xf32, #tpu.memory_space<vmem>>, vector<1x128xf32>,
      %cst_82 = arith.constant 0.000000e+00 : f32
      %92 = vector.broadcast %cst_82 : f32 to vector<1x128xf32>
      %c0_83 = arith.constant 0 : index
      %c0_84 = arith.constant 0 : index
      %93 = vector.load %arg8[%c0_83, %c0_84] : memref<1x128xf32, #tpu.memory_space<vmem>>, vector<1x128xf32>
      tpu.vector_store %arg8[%c0_83, %c0_84], %92 {strides = array<i32>} : memref<1x128xf32, #tpu.memory_space<vmem>>, vector<1x128xf32>,
      %cst_85 = arith.constant 0.000000e+00 : f32
      %94 = vector.broadcast %cst_85 : f32 to vector<1x128xf32>
      %c0_86 = arith.constant 0 : index
      %c0_87 = arith.constant 0 : index
      %95 = vector.load %arg9[%c0_86, %c0_87] : memref<1x128xf32, #tpu.memory_space<vmem>>, vector<1x128xf32>
      tpu.vector_store %arg9[%c0_86, %c0_87], %94 {strides = array<i32>} : memref<1x128xf32, #tpu.memory_space<vmem>>, vector<1x128xf32>,
      %cst_88 = arith.constant 0.000000e+00 : f32
      %96 = vector.broadcast %cst_88 : f32 to vector<1x128xf32>
      %c0_89 = arith.constant 0 : index
      %c0_90 = arith.constant 0 : index
      %97 = vector.load %arg10[%c0_89, %c0_90] : memref<1x128xf32, #tpu.memory_space<vmem>>, vector<1x128xf32>
      tpu.vector_store %arg10[%c0_89, %c0_90], %96 {strides = array<i32>} : memref<1x128xf32, #tpu.memory_space<vmem>>, vector<1x128xf32>,
    } else {
    }
    %c0_51 = arith.constant 0 : index
    %c0_52 = arith.constant 0 : index
    %59 = vector.load %arg3[%c0_51, %c0_52] : memref<80x1xf32, #tpu.memory_space<vmem>>, vector<80x1xf32>
    %60 = vector.broadcast %59 : vector<80x1xf32> to vector<80x128xf32>
    %61 = arith.mulf %52, %60 : vector<80x128xf32>
    %c0_53 = arith.constant 0 : index
    %c0_54 = arith.constant 0 : index
    %62 = vector.load %arg7[%c0_53, %c0_54] : memref<1x128xf32, #tpu.memory_space<vmem>>, vector<1x128xf32>
    %cst_55 = arith.constant dense<0.000000e+00> : vector<128xf32>
    %63 = vector.multi_reduction <add>, %61, %cst_55 [0] : vector<80x128xf32> to vector<128xf32>
    %64 = vector.shape_cast %63 : vector<128xf32> to vector<1x128xf32>
    %65 = arith.addf %62, %64 : vector<1x128xf32>
    %c0_56 = arith.constant 0 : index
    %c0_57 = arith.constant 0 : index
    %66 = vector.load %arg7[%c0_56, %c0_57] : memref<1x128xf32, #tpu.memory_space<vmem>>, vector<1x128xf32>
    tpu.vector_store %arg7[%c0_56, %c0_57], %65 {strides = array<i32>} : memref<1x128xf32, #tpu.memory_space<vmem>>, vector<1x128xf32>,
    %c0_58 = arith.constant 0 : index
    %c0_59 = arith.constant 0 : index
    %67 = vector.load %arg8[%c0_58, %c0_59] : memref<1x128xf32, #tpu.memory_space<vmem>>, vector<1x128xf32>
    %68 = arith.mulf %61, %52 : vector<80x128xf32>
    %cst_60 = arith.constant dense<0.000000e+00> : vector<128xf32>
    %69 = vector.multi_reduction <add>, %68, %cst_60 [0] : vector<80x128xf32> to vector<128xf32>
    %70 = vector.shape_cast %69 : vector<128xf32> to vector<1x128xf32>
    %71 = arith.addf %67, %70 : vector<1x128xf32>
    %c0_61 = arith.constant 0 : index
    %c0_62 = arith.constant 0 : index
    %72 = vector.load %arg8[%c0_61, %c0_62] : memref<1x128xf32, #tpu.memory_space<vmem>>, vector<1x128xf32>
    tpu.vector_store %arg8[%c0_61, %c0_62], %71 {strides = array<i32>} : memref<1x128xf32, #tpu.memory_space<vmem>>, vector<1x128xf32>,
    %c0_63 = arith.constant 0 : index
    %c0_64 = arith.constant 0 : index
    %c0_65 = arith.constant 0 : index
    %73 = vector.load %arg4[%c0_63, %c0_64, %c0_65] : memref<1x80x4xbf16, #tpu.memory_space<vmem>>, vector<1x80x4xbf16>
    %74 = vector.shape_cast %73 : vector<1x80x4xbf16> to vector<80x4xbf16>
    %c0_66 = arith.constant 0 : index
    %c0_67 = arith.constant 0 : index
    %75 = vector.load %arg5[%c0_66, %c0_67] : memref<4x128xbf16, #tpu.memory_space<vmem>>, vector<4x128xbf16>
    %cst_68 = arith.constant dense<0.000000e+00> : vector<80x128xf32>
    %76 = tpu.matmul %74, %75, %cst_68 {dimension_numbers = #tpu.dot_dimension_numbers<[1], [0], [0], [1], [0, 0, 1, 1], [], []>} : vector<80x4xbf16>, vector<4x128xbf16>, vector<80x128xf32> -> vector<80x128xf32>
    %77 = vector.broadcast %59 : vector<80x1xf32> to vector<80x128xf32>
    %78 = arith.mulf %76, %77 : vector<80x128xf32>
    %c0_69 = arith.constant 0 : index
    %c0_70 = arith.constant 0 : index
    %79 = vector.load %arg9[%c0_69, %c0_70] : memref<1x128xf32, #tpu.memory_space<vmem>>, vector<1x128xf32>
    %cst_71 = arith.constant dense<0.000000e+00> : vector<128xf32>
    %80 = vector.multi_reduction <add>, %78, %cst_71 [0] : vector<80x128xf32> to vector<128xf32>
    %81 = vector.shape_cast %80 : vector<128xf32> to vector<1x128xf32>
    %82 = arith.addf %79, %81 : vector<1x128xf32>
    %c0_72 = arith.constant 0 : index
    %c0_73 = arith.constant 0 : index
    %83 = vector.load %arg9[%c0_72, %c0_73] : memref<1x128xf32, #tpu.memory_space<vmem>>, vector<1x128xf32>
    tpu.vector_store %arg9[%c0_72, %c0_73], %82 {strides = array<i32>} : memref<1x128xf32, #tpu.memory_space<vmem>>, vector<1x128xf32>,
    %c0_74 = arith.constant 0 : index
    %c0_75 = arith.constant 0 : index
    %84 = vector.load %arg10[%c0_74, %c0_75] : memref<1x128xf32, #tpu.memory_space<vmem>>, vector<1x128xf32>
    %85 = arith.mulf %78, %76 : vector<80x128xf32>
    %cst_76 = arith.constant dense<0.000000e+00> : vector<128xf32>
    %86 = vector.multi_reduction <add>, %85, %cst_76 [0] : vector<80x128xf32> to vector<128xf32>
    %87 = vector.shape_cast %86 : vector<128xf32> to vector<1x128xf32>
    %88 = arith.addf %84, %87 : vector<1x128xf32>
    %c0_77 = arith.constant 0 : index
    %c0_78 = arith.constant 0 : index
    %89 = vector.load %arg10[%c0_77, %c0_78] : memref<1x128xf32, #tpu.memory_space<vmem>>, vector<1x128xf32>
    tpu.vector_store %arg10[%c0_77, %c0_78], %88 {strides = array<i32>} : memref<1x128xf32, #tpu.memory_space<vmem>>, vector<1x128xf32>,
    return
  }
  func.func @transform_0(%arg0: i32) -> (i32, i32, i32) {
    %c0_i32 = arith.constant 0 : i32
    %c0_i32_0 = arith.constant 0 : i32
    %c0_i32_1 = arith.constant 0 : i32
    return %arg0, %c0_i32, %c0_i32_0 : i32, i32, i32
  }
  func.func @transform_1(%arg0: i32) -> (i32, i32, i32) {
    %c0_i32 = arith.constant 0 : i32
    %c0_i32_0 = arith.constant 0 : i32
    %c0_i32_1 = arith.constant 0 : i32
    %c0_i32_2 = arith.constant 0 : i32
    return %c0_i32, %c0_i32_0, %c0_i32_1 : i32, i32, i32
  }
  func.func @transform_2(%arg0: i32) -> (i32, i32) {
    %c0_i32 = arith.constant 0 : i32
    %c0_i32_0 = arith.constant 0 : i32
    %c0_i32_1 = arith.constant 0 : i32
    return %c0_i32, %c0_i32_0 : i32, i32
  }
  func.func @transform_3(%arg0: i32) -> (i32, i32, i32) {
    %c0_i32 = arith.constant 0 : i32
    %c0_i32_0 = arith.constant 0 : i32
    %c0_i32_1 = arith.constant 0 : i32
    return %arg0, %c0_i32, %c0_i32_0 : i32, i32, i32
  }
  func.func @transform_4(%arg0: i32) -> (i32, i32) {
    %c0_i32 = arith.constant 0 : i32
    %c0_i32_0 = arith.constant 0 : i32
    %c0_i32_1 = arith.constant 0 : i32
    return %c0_i32, %c0_i32_0 : i32, i32
  }
  func.func @transform_5(%arg0: i32) -> (i32, i32, i32) {
    %c0_i32 = arith.constant 0 : i32
    %c0_i32_0 = arith.constant 0 : i32
    %c0_i32_1 = arith.constant 0 : i32
    return %arg0, %c0_i32, %c0_i32_0 : i32, i32, i32
  }
  func.func @transform_6(%arg0: i32) -> (i32, i32) {
    %c0_i32 = arith.constant 0 : i32
    %c0_i32_0 = arith.constant 0 : i32
    %c0_i32_1 = arith.constant 0 : i32
    return %c0_i32, %c0_i32_0 : i32, i32
  }
  func.func @transform_7(%arg0: i32) -> (i32, i32) {
    %c0_i32 = arith.constant 0 : i32
    %c0_i32_0 = arith.constant 0 : i32
    %c0_i32_1 = arith.constant 0 : i32
    return %c0_i32, %c0_i32_0 : i32, i32
  }
  func.func @transform_8(%arg0: i32) -> (i32, i32) {
    %c0_i32 = arith.constant 0 : i32
    %c0_i32_0 = arith.constant 0 : i32
    %c0_i32_1 = arith.constant 0 : i32
    return %c0_i32, %c0_i32_0 : i32, i32
  }
  func.func @transform_9(%arg0: i32) -> (i32, i32) {
    %c0_i32 = arith.constant 0 : i32
    %c0_i32_0 = arith.constant 0 : i32
    %c0_i32_1 = arith.constant 0 : i32
    return %c0_i32, %c0_i32_0 : i32, i32
  }
}

module attributes {stable_mosaic.version = 11 : i64} {
  func.func @kernel(%arg0: i32, %arg1: memref<1x80x128xf32, #tpu.memory_space<vmem>>, %arg2: memref<1x128xf32, #tpu.memory_space<vmem>>, %arg3: memref<1x128xf32, #tpu.memory_space<vmem>>, %arg4: memref<1x80x4xbf16, #tpu.memory_space<vmem>>, %arg5: memref<4x128xbf16, #tpu.memory_space<vmem>>, %arg6: memref<1x128xf32, #tpu.memory_space<vmem>>, %arg7: memref<1x128xf32, #tpu.memory_space<vmem>>, %arg8: memref<1x80x128xf32, #tpu.memory_space<vmem>>) attributes {dimension_semantics = [#tpu.dimension_semantics<parallel>], iteration_bounds = array<i64: 2>, scalar_prefetch = 0 : i64, scratch_operands = 0 : i64, tpu.core_type = #tpu.core_type<tc>, window_params = [{transform_indices = @transform_0, window_bounds = array<i64: 1, 80, 128>}, {pipeline_mode = #tpu.pipeline_mode<synchronous>, transform_indices = @transform_1, window_bounds = array<i64: 1, 128>}, {pipeline_mode = #tpu.pipeline_mode<synchronous>, transform_indices = @transform_2, window_bounds = array<i64: 1, 128>}, {transform_indices = @transform_3, window_bounds = array<i64: 1, 80, 4>}, {pipeline_mode = #tpu.pipeline_mode<synchronous>, transform_indices = @transform_4, window_bounds = array<i64: 4, 128>}, {pipeline_mode = #tpu.pipeline_mode<synchronous>, transform_indices = @transform_5, window_bounds = array<i64: 1, 128>}, {pipeline_mode = #tpu.pipeline_mode<synchronous>, transform_indices = @transform_6, window_bounds = array<i64: 1, 128>}, {transform_indices = @transform_7, window_bounds = array<i64: 1, 80, 128>}]} {
    %c0 = arith.constant 0 : index
    %c0_0 = arith.constant 0 : index
    %c0_1 = arith.constant 0 : index
    %0 = vector.load %arg1[%c0, %c0_0, %c0_1] : memref<1x80x128xf32, #tpu.memory_space<vmem>>, vector<1x80x128xf32>
    %1 = vector.shape_cast %0 : vector<1x80x128xf32> to vector<80x128xf32>
    %c0_2 = arith.constant 0 : index
    %c0_3 = arith.constant 0 : index
    %2 = vector.load %arg2[%c0_2, %c0_3] : memref<1x128xf32, #tpu.memory_space<vmem>>, vector<1x128xf32>
    %3 = vector.broadcast %2 : vector<1x128xf32> to vector<80x128xf32>
    %4 = arith.mulf %1, %3 : vector<80x128xf32>
    %c0_4 = arith.constant 0 : index
    %c0_5 = arith.constant 0 : index
    %5 = vector.load %arg3[%c0_4, %c0_5] : memref<1x128xf32, #tpu.memory_space<vmem>>, vector<1x128xf32>
    %6 = vector.broadcast %5 : vector<1x128xf32> to vector<80x128xf32>
    %7 = arith.addf %4, %6 : vector<80x128xf32>
    %c0_6 = arith.constant 0 : index
    %c0_7 = arith.constant 0 : index
    %c0_8 = arith.constant 0 : index
    %8 = vector.load %arg4[%c0_6, %c0_7, %c0_8] : memref<1x80x4xbf16, #tpu.memory_space<vmem>>, vector<1x80x4xbf16>
    %9 = vector.shape_cast %8 : vector<1x80x4xbf16> to vector<80x4xbf16>
    %c0_9 = arith.constant 0 : index
    %c0_10 = arith.constant 0 : index
    %10 = vector.load %arg5[%c0_9, %c0_10] : memref<4x128xbf16, #tpu.memory_space<vmem>>, vector<4x128xbf16>
    %cst = arith.constant dense<0.000000e+00> : vector<80x128xf32>
    %11 = tpu.matmul %9, %10, %cst {dimension_numbers = #tpu.dot_dimension_numbers<[1], [0], [0], [1], [0, 0, 1, 1], [], []>} : vector<80x4xbf16>, vector<4x128xbf16>, vector<80x128xf32> -> vector<80x128xf32>
    %c0_11 = arith.constant 0 : index
    %c0_12 = arith.constant 0 : index
    %12 = vector.load %arg6[%c0_11, %c0_12] : memref<1x128xf32, #tpu.memory_space<vmem>>, vector<1x128xf32>
    %13 = vector.broadcast %12 : vector<1x128xf32> to vector<80x128xf32>
    %14 = arith.mulf %11, %13 : vector<80x128xf32>
    %c0_13 = arith.constant 0 : index
    %c0_14 = arith.constant 0 : index
    %15 = vector.load %arg7[%c0_13, %c0_14] : memref<1x128xf32, #tpu.memory_space<vmem>>, vector<1x128xf32>
    %16 = vector.broadcast %15 : vector<1x128xf32> to vector<80x128xf32>
    %17 = arith.addf %14, %16 : vector<80x128xf32>
    %18 = arith.addf %7, %17 : vector<80x128xf32>
    %cst_15 = arith.constant 0.000000e+00 : f32
    %19 = vector.broadcast %cst_15 : f32 to vector<80x128xf32>
    %20 = arith.maximumf %18, %19 : vector<80x128xf32>
    %c0_16 = arith.constant 0 : index
    %c0_17 = arith.constant 0 : index
    %c0_18 = arith.constant 0 : index
    %21 = vector.load %arg8[%c0_16, %c0_17, %c0_18] : memref<1x80x128xf32, #tpu.memory_space<vmem>>, vector<1x80x128xf32>
    %22 = vector.shape_cast %21 : vector<1x80x128xf32> to vector<80x128xf32>
    %23 = vector.shape_cast %20 : vector<80x128xf32> to vector<1x80x128xf32>
    tpu.vector_store %arg8[%c0_16, %c0_17, %c0_18], %23 {strides = array<i32>} : memref<1x80x128xf32, #tpu.memory_space<vmem>>, vector<1x80x128xf32>,
    return
  }
  func.func @transform_0(%arg0: i32) -> (i32, i32, i32) {
    %c0_i32 = arith.constant 0 : i32
    %c0_i32_0 = arith.constant 0 : i32
    %c0_i32_1 = arith.constant 0 : i32
    return %arg0, %c0_i32, %c0_i32_0 : i32, i32, i32
  }
  func.func @transform_1(%arg0: i32) -> (i32, i32) {
    %c0_i32 = arith.constant 0 : i32
    %c0_i32_0 = arith.constant 0 : i32
    %c0_i32_1 = arith.constant 0 : i32
    return %c0_i32, %c0_i32_0 : i32, i32
  }
  func.func @transform_2(%arg0: i32) -> (i32, i32) {
    %c0_i32 = arith.constant 0 : i32
    %c0_i32_0 = arith.constant 0 : i32
    %c0_i32_1 = arith.constant 0 : i32
    return %c0_i32, %c0_i32_0 : i32, i32
  }
  func.func @transform_3(%arg0: i32) -> (i32, i32, i32) {
    %c0_i32 = arith.constant 0 : i32
    %c0_i32_0 = arith.constant 0 : i32
    %c0_i32_1 = arith.constant 0 : i32
    return %arg0, %c0_i32, %c0_i32_0 : i32, i32, i32
  }
  func.func @transform_4(%arg0: i32) -> (i32, i32) {
    %c0_i32 = arith.constant 0 : i32
    %c0_i32_0 = arith.constant 0 : i32
    %c0_i32_1 = arith.constant 0 : i32
    return %c0_i32, %c0_i32_0 : i32, i32
  }
  func.func @transform_5(%arg0: i32) -> (i32, i32) {
    %c0_i32 = arith.constant 0 : i32
    %c0_i32_0 = arith.constant 0 : i32
    %c0_i32_1 = arith.constant 0 : i32
    return %c0_i32, %c0_i32_0 : i32, i32
  }
  func.func @transform_6(%arg0: i32) -> (i32, i32) {
    %c0_i32 = arith.constant 0 : i32
    %c0_i32_0 = arith.constant 0 : i32
    %c0_i32_1 = arith.constant 0 : i32
    return %c0_i32, %c0_i32_0 : i32, i32
  }
  func.func @transform_7(%arg0: i32) -> (i32, i32, i32) {
    %c0_i32 = arith.constant 0 : i32
    %c0_i32_0 = arith.constant 0 : i32
    %c0_i32_1 = arith.constant 0 : i32
    return %arg0, %c0_i32, %c0_i32_0 : i32, i32, i32
  }
}

</mosaic_0001>

<bundles_post_ra>
// kernel: a_call__.5
= control target key start
LH: loop header
LB: loop body
LE: loop exit
PB: predicated region body
PF: predicated region fallthrough
CT: control target
= control target key end

     0   :  { %s378_s12 = smov 0   ;;  %s481_s0 = inlined_call_operand.vmem [shape: f32[2,144,128], index: 0, kind: input, shape index: {}]   ;;  %s482_s1 = inlined_call_operand.vmem [shape: f32[1,128], index: 1, kind: input, shape index: {}]   ;;  %s483_s2 = inlined_call_operand.vmem [shape: f32[1,128], index: 2, kind: input, shape index: {}]   ;;  %s484_s3 = inlined_call_operand.vmem [shape: f32[2,144,128], index: 3, kind: output, shape index: {}]  }
   0x1 LB: > { %s330_s13 = sadd.s32 4294967295, %s356_s12   ;;  %p334_p0 = scmp.ge.s32.totalorder %s356_s12, 1  ;;  %s356_s12 = sphi %s378_s12, %s13_s12  }
   0x2   : > { %p137_p1 = scmp.lt.s32.totalorder %s356_s12, 3 }
   0x4   : > { %p138_p2 = pnand %p334_p0, %p137_p1 }
   0x5   : > { %p161_p3 = scmp.lt.s32.totalorder (!%p138_p2), %s330_s13, 1  ;;  %v389_v0 = vld [vmem:[%s482_s1] ss:$0 sm:$0xff] (!%p138_p2) }
   0x6   : > { %141 = sbr.rel (%p138_p2) target bundleno = 37 (0x25), region = 32  ;;  %v399_v1 = vld [vmem:[%s483_s2] ss:$0 sm:$0xff] (!%p138_p2) }
   0xd   : > { %s486_s13 = smov (!%p161_p3, %s330_s13), 1 }
   0xe   : > { %s341_s14 = smul.u32 144, %s486_s13 }
  0x10   : > { %s394_s19 = scalar_lea.vmem %s481_s0, %s341_s14  ;;  %s422_s24 = scalar_lea.vmem %s484_s3, %s341_s14 }
  0x11   : > { %v171_v2 = vld [vmem:[%s394_s19] sm:$0xff]  ;;  %v172_v3 = vld [vmem:[%s394_s19 + $0x8] sm:$0xff]  ;;  %v173_v4 = vld [vmem:[%s394_s19 + $0x10] sm:$0xff] }
  0x12   : > { %v196_v5 = vmul.f32 %v389_v0, %v171_v2  ;;  %v197_v6 = vmul.f32 %v389_v0, %v172_v3  ;;  %v198_v7 = vmul.f32 %v389_v0, %v173_v4  ;;  %v174_v8 = vld [vmem:[%s394_s19 + $0x18] sm:$0xff]  ;;  %v175_v9 = vld [vmem:[%s394_s19 + $0x20] sm:$0xff]  ;;  %v176_v10 = vld [vmem:[%s394_s19 + $0x28] sm:$0xff] }
  0x13   : > { %v199_v11 = vmul.f32 %v389_v0, %v174_v8  ;;  %v200_v12 = vmul.f32 %v389_v0, %v175_v9  ;;  %v201_v13 = vmul.f32 %v389_v0, %v176_v10  ;;  %v177_v14 = vld [vmem:[%s394_s19 + $0x30] sm:$0xff]  ;;  %v178_v15 = vld [vmem:[%s394_s19 + $0x38] sm:$0xff]  ;;  %v179_v24 = vld [vmem:[%s394_s19 + $0x40] sm:$0xff] }
  0x14   : > { %v221_v16 = vadd.f32 %v399_v1, %v196_v5  ;;  %v222_v17 = vadd.f32 %v399_v1, %v197_v6  ;;  %v223_v18 = vadd.f32 %v399_v1, %v198_v7  ;;  %v202_v19 = vmul.f32 %v389_v0, %v177_v14  ;;  %v180_v25 = vld [vmem:[%s394_s19 + $0x48] sm:$0xff]  ;;  %v181_v26 = vld [vmem:[%s394_s19 + $0x50] sm:$0xff]  ;;  %v182_v31 = vld [vmem:[%s394_s19 + $0x58] sm:$0xff] }
  0x15   : > { %v224_v20 = vadd.f32 %v399_v1, %v199_v11  ;;  %v225_v21 = vadd.f32 %v399_v1, %v200_v12  ;;  %v226_v22 = vadd.f32 %v399_v1, %v201_v13  ;;  %v203_v23 = vmul.f32 %v389_v0, %v178_v15  ;;  %v183_v32 = vld [vmem:[%s394_s19 + $0x60] sm:$0xff]  ;;  %v184_v33 = vld [vmem:[%s394_s19 + $0x68] sm:$0xff]  ;;  %v185_v38 = vld [vmem:[%s394_s19 + $0x70] sm:$0xff] }
  0x16   : > { %v239_v27 = vmax.f32 %v221_v16, 0.0  ;;  %v240_v28 = vmax.f32 %v222_v17, 0.0  ;;  %v241_v29 = vmax.f32 %v223_v18, 0.0  ;;  %v227_v30 = vadd.f32 %v399_v1, %v202_v19  ;;  %v186_v43 = vld [vmem:[%s394_s19 + $0x78] sm:$0xff]  ;;  %v187_v56 = vld [vmem:[%s394_s19 + $0x80] sm:$0xff]  ;;  %v188_v57 = vld [vmem:[%s394_s19 + $0x88] sm:$0xff] }
  0x17   : > { %v242_v34 = vmax.f32 %v224_v20, 0.0  ;;  %v243_v35 = vmax.f32 %v225_v21, 0.0  ;;  %v244_v36 = vmax.f32 %v226_v22, 0.0  ;;  %v228_v37 = vadd.f32 %v399_v1, %v203_v23 }
  0x18   : > { %257 = vst [vmem:[%s422_s24] sm:$0xff] %v239_v27  ;;  %258 = vst [vmem:[%s422_s24 + $0x8] sm:$0xff] %v240_v28  ;;  %v245_v39 = vmax.f32 %v227_v30, 0.0  ;;  %v204_v40 = vmul.f32 %v389_v0, %v179_v24  ;;  %v205_v41 = vmul.f32 %v389_v0, %v180_v25  ;;  %v206_v42 = vmul.f32 %v389_v0, %v181_v26 }
  0x19   : > { %259 = vst [vmem:[%s422_s24 + $0x10] sm:$0xff] %v241_v29  ;;  %260 = vst [vmem:[%s422_s24 + $0x18] sm:$0xff] %v242_v34  ;;  %v246_v44 = vmax.f32 %v228_v37, 0.0  ;;  %v207_v45 = vmul.f32 %v389_v0, %v182_v31  ;;  %v208_v46 = vmul.f32 %v389_v0, %v183_v32  ;;  %v209_v47 = vmul.f32 %v389_v0, %v184_v33 }
  0x1a   : > { %261 = vst [vmem:[%s422_s24 + $0x20] sm:$0xff] %v243_v35  ;;  %262 = vst [vmem:[%s422_s24 + $0x28] sm:$0xff] %v244_v36  ;;  %v229_v48 = vadd.f32 %v399_v1, %v204_v40  ;;  %v230_v49 = vadd.f32 %v399_v1, %v205_v41  ;;  %v231_v50 = vadd.f32 %v399_v1, %v206_v42 }
  0x1b   : > { %263 = vst [vmem:[%s422_s24 + $0x30] sm:$0xff] %v245_v39  ;;  %v210_v51 = vmul.f32 %v389_v0, %v185_v38  ;;  %264 = vst [vmem:[%s422_s24 + $0x38] sm:$0xff] %v246_v44  ;;  %v232_v52 = vadd.f32 %v399_v1, %v207_v45  ;;  %v233_v53 = vadd.f32 %v399_v1, %v208_v46 }
  0x1c   : > { %v234_v54 = vadd.f32 %v399_v1, %v209_v47  ;;  %v211_v55 = vmul.f32 %v389_v0, %v186_v43  ;;  %v247_v58 = vmax.f32 %v229_v48, 0.0  ;;  %v248_v59 = vmax.f32 %v230_v49, 0.0 }
  0x1d   : > { %v249_v60 = vmax.f32 %v231_v50, 0.0  ;;  %v235_v61 = vadd.f32 %v399_v1, %v210_v51  ;;  %v250_v62 = vmax.f32 %v232_v52, 0.0  ;;  %v251_v63 = vmax.f32 %v233_v53, 0.0 }
  0x1e   : > { %v252_v2 = vmax.f32 %v234_v54, 0.0  ;;  %v236_v3 = vadd.f32 %v399_v1, %v211_v55  ;;  %265 = vst [vmem:[%s422_s24 + $0x40] sm:$0xff] %v247_v58  ;;  %266 = vst [vmem:[%s422_s24 + $0x48] sm:$0xff] %v248_v59  ;;  %v212_v5 = vmul.f32 %v389_v0, %v187_v56  ;;  %v213_v6 = vmul.f32 %v389_v0, %v188_v57 }
  0x1f   : > { %267 = vst [vmem:[%s422_s24 + $0x50] sm:$0xff] %v249_v60  ;;  %v253_v4 = vmax.f32 %v235_v61, 0.0  ;;  %268 = vst [vmem:[%s422_s24 + $0x58] sm:$0xff] %v250_v62 }
  0x20   : > { %269 = vst [vmem:[%s422_s24 + $0x60] sm:$0xff] %v251_v63  ;;  %270 = vst [vmem:[%s422_s24 + $0x68] sm:$0xff] %v252_v2  ;;  %v254_v7 = vmax.f32 %v236_v3, 0.0  ;;  %v237_v8 = vadd.f32 %v399_v1, %v212_v5  ;;  %v238_v9 = vadd.f32 %v399_v1, %v213_v6 }
  0x21   : > { %271 = vst [vmem:[%s422_s24 + $0x70] sm:$0xff] %v253_v4 }
  0x22   : > { %272 = vst [vmem:[%s422_s24 + $0x78] sm:$0xff] %v254_v7  ;;  %v255_v10 = vmax.f32 %v237_v8, 0.0  ;;  %v256_v11 = vmax.f32 %v238_v9, 0.0 }
  0x24   : > { %273 = vst [vmem:[%s422_s24 + $0x80] sm:$0xff] %v255_v10  ;;  %274 = vst [vmem:[%s422_s24 + $0x88] sm:$0xff] %v256_v11 }
  0x25 PF: > { %s13_s12 = sadd.s32 1, %s356_s12  }
  0x26   : > { %p10_p4 = scmp.ge.s32.totalorder %s13_s12, 4  }
  0x28   :  { %12 = sbr.rel (!%p10_p4) target bundleno = 1 (0x1), region = 62 }

// kernel: a_call__.7
= control target key start
LH: loop header
LB: loop body
LE: loop exit
PB: predicated region body
PF: predicated region fallthrough
CT: control target
= control target key end

     0   :  { %s725_s24 = smov 0   ;;  %s845_s0 = inlined_call_operand.vmem [shape: f32[2,80,128], index: 0, kind: input, shape index: {}]   ;;  %s846_s1 = inlined_call_operand.vmem [shape: f32[1,128], index: 1, kind: input, shape index: {}]   ;;  %s847_s2 = inlined_call_operand.vmem [shape: f32[1,128], index: 2, kind: input, shape index: {}]   ;;  %s848_s3 = inlined_call_operand.vmem [shape: bf16[2,80,4], index: 3, kind: input, shape index: {}]   ;;  %s849_s4 = inlined_call_operand.vmem [shape: bf16[4,128], index: 4, kind: input, shape index: {}]   ;;  %s850_s5 = inlined_call_operand.vmem [shape: f32[1,128], index: 5, kind: input, shape index: {}]   ;;  %s851_s6 = inlined_call_operand.vmem [shape: f32[1,128], index: 6, kind: input, shape index: {}]   ;;  %s852_s7 = inlined_call_operand.vmem [shape: f32[2,80,128], index: 7, kind: output, shape index: {}]  }
   0x1 LB: > { %s604_s25 = sadd.s32 4294967295, %s681_s24   ;;  %p608_p0 = scmp.ge.s32.totalorder %s681_s24, 1  ;;  %s681_s24 = sphi %s725_s24, %s17_s24  }
   0x2   : > { %p247_p1 = scmp.lt.s32.totalorder %s681_s24, 3 }
   0x4   : > { %p248_p2 = pnand %p608_p0, %p247_p1 }
   0x5   : > { %v354_v0 = vld [vmem:[%s849_s4] sm:$0x3] (!%p248_p2)  ;;  %vm396_vm0 = vcmask (!%p248_p2), 1041408   ;;  %p284_p3 = scmp.lt.s32.totalorder (!%p248_p2), %s604_s25, 1  ;;  %v683_v1 = vmov (!%p248_p2), 0.0   ;;  %vm684_vm1 = vmmov (!%p248_p2), 0  }
   0x6   : > { %251 = sbr.rel (%p248_p2) target bundleno = 257 (0x101), region = 48  ;;  %634 = vmatprep.subr.bf16.mxu0 (!%p248_p2), %v683_v1  ;;  %v398_v2 = vsel (!%p248_p2), %vm396_vm0, %v354_v0, 0  ;;  %636 = vmatprep.mubr.msk.bf16.mxu0 (!%p248_p2), %vm684_vm1, %v683_v1  ;;  %vm380_vm2 = vcmask (!%p248_p2), 31744   ;;  %v759_v9 = vld [vmem:[%s846_s1] ss:$0 sm:$0xff] (!%p248_p2) }
   0x7   : > { %635 = vmatpush3.bf16.msra.mxu0 (!%p248_p2), %v398_v2  ;;  %656 = vmatprep.subr.bf16.mxu1 (!%p248_p2), %v683_v1  ;;  %v768_v14 = vld [vmem:[%s847_s2] ss:$0 sm:$0xff] (!%p248_p2) }
   0x8   : > { %657 = vmatpush3.bf16.msra.mxu1 (!%p248_p2), %v398_v2  ;;  %648 = vmatprep.mubr.msk.bf16.mxu1 (!%p248_p2), %vm684_vm1, %v683_v1  ;;  %v773_v15 = vld [vmem:[%s850_s5] ss:$0 sm:$0xff] (!%p248_p2) }
   0x9   : > { %v780_v19 = vld [vmem:[%s851_s6] ss:$0 sm:$0xff] (!%p248_p2) }
   0xd   : > { %s854_s25 = smov (!%p284_p3, %s604_s25), 1 }
   0xe   : > { %s659_s28 = smul.u32 40, %s854_s25 }
   0xf   : > { %s658_s9 = smul.u32 80, %s854_s25 }
  0x10   : > { %s293_s8 = scalar_lea.vmem %s848_s3, %s659_s28 }
  0x11   : > { %v670_v3 = vld [vmem:[%s293_s8] sm:$0xff]   ;;  %v671_v4 = vld [vmem:[%s293_s8 + $0x18] sm:$0xff]   ;;  %v672_v5 = vld [vmem:[%s293_s8 + $0x8] sm:$0xff]   ;;  %s753_s12 = scalar_lea.vmem %s845_s0, %s658_s9  ;;  %s804_s23 = scalar_lea.vmem %s852_s7, %s658_s9 }
  0x12   : > { %637 = vmatmul.mubr.msk.bf16.vlgmr.msra.gmra.mrb[0].mxu0 %vm380_vm2, %v670_v3  ;;  %649 = vmatmul.mubr.msk.bf16.vlgmr.msra.gmra.mrb[0].mxu1 %vm380_vm2, %v671_v4  ;;  %v673_v6 = vld [vmem:[%s293_s8 + $0x20] sm:$0xff]   ;;  %v674_v7 = vld [vmem:[%s293_s8 + $0x10] sm:$0xff]   ;;  %v301_v11 = vld [vmem:[%s753_s12 + $0x8] sm:$0xff] }
  0x13   : > { %640 = vmatprep.mubr.msk.bf16.mxu0 %vm684_vm1, %v683_v1  ;;  %652 = vmatprep.mubr.msk.bf16.mxu1 %vm684_vm1, %v683_v1  ;;  %v300_v8 = vld [vmem:[%s753_s12] sm:$0xff]  ;;  %v306_v10 = vld [vmem:[%s753_s12 + $0x30] sm:$0xff]  ;;  %v307_v13 = vld [vmem:[%s753_s12 + $0x38] sm:$0xff]  ;;  %v318_v17 = vmul.f32 %v759_v9, %v301_v11 }
  0x14   : > { %v317_v12 = vmul.f32 %v759_v9, %v300_v8  ;;  %v323_v16 = vmul.f32 %v759_v9, %v306_v10  ;;  %v324_v20 = vmul.f32 %v759_v9, %v307_v13  ;;  %v302_v29 = vld [vmem:[%s753_s12 + $0x10] sm:$0xff]  ;;  %v308_v35 = vld [vmem:[%s753_s12 + $0x40] sm:$0xff]  ;;  %v303_v40 = vld [vmem:[%s753_s12 + $0x18] sm:$0xff] }
  0x15   : > { %v335_v31 = vadd.f32 %v768_v14, %v318_v17  ;;  %v319_v43 = vmul.f32 %v759_v9, %v302_v29  ;;  %v309_v44 = vld [vmem:[%s753_s12 + $0x48] sm:$0xff]  ;;  %v325_v47 = vmul.f32 %v759_v9, %v308_v35  ;;  %v320_v50 = vmul.f32 %v759_v9, %v303_v40 }
  0x16   : > { %v334_v21 = vadd.f32 %v768_v14, %v317_v12  ;;  %v340_v26 = vadd.f32 %v768_v14, %v323_v16  ;;  %v341_v37 = vadd.f32 %v768_v14, %v324_v20  ;;  %v326_v54 = vmul.f32 %v759_v9, %v309_v44  ;;  %v305_v12 = vld [vmem:[%s753_s12 + $0x28] sm:$0xff] }
  0x17   : > { %v336_v56 = vadd.f32 %v768_v14, %v319_v43  ;;  %v342_v62 = vadd.f32 %v768_v14, %v325_v47  ;;  %v337_v3 = vadd.f32 %v768_v14, %v320_v50 }
  0x18   : > { %v343_v8 = vadd.f32 %v768_v14, %v326_v54 }
  0x1a   : > { %641 = vmatmul.mubr.msk.bf16.gmra.mrb[4].mxu0 %vm380_vm2, %v672_v5  ;;  %653 = vmatmul.mubr.msk.bf16.gmra.mrb[4].mxu1 %vm380_vm2, %v673_v6 }
  0x1b   : > { %644 = vmatprep.mubr.msk.bf16.mxu0 %vm684_vm1, %v683_v1  ;;  %v304_v1 = vld [vmem:[%s753_s12 + $0x20] sm:$0xff] }
  0x1c   : > { %v321_v17 = vmul.f32 %v759_v9, %v304_v1 }
  0x22   : > { %645 = vmatmul.mubr.msk.bf16.gmra.mrb[8].mxu0 %vm380_vm2, %v674_v7 }
  0xe5   : > { %v434_v18 = vpop.f32.mrb[0].mxu0  ;;  %v458_v24 = vpop.f32.mrb[0].mxu1 }
  0xe6   : > { %v480_v22 = vmul.f32 %v773_v15, %v434_v18  ;;  %v638_v23 = vpop.f32.mrb[1].mxu0  ;;  %v486_v27 = vmul.f32 %v773_v15, %v458_v24  ;;  %v650_v28 = vpop.f32.mrb[1].mxu1 }
  0xe7   : > { %v437_v25 = vpop.f32.mrb[2].mxu0  ;;  %v461_v34 = vpop.f32.mrb[2].mxu1  ;;  %v322_v23 = vmul.f32 %v759_v9, %v305_v12  ;;  %v338_v28 = vadd.f32 %v768_v14, %v321_v17 }
  0xe8   : > { %v497_v30 = vadd.f32 %v780_v19, %v480_v22  ;;  %v481_v32 = vmul.f32 %v773_v15, %v437_v25  ;;  %v639_v33 = vpop.f32.mrb[3].mxu0  ;;  %v503_v36 = vadd.f32 %v780_v19, %v486_v27  ;;  %v487_v38 = vmul.f32 %v773_v15, %v461_v34  ;;  %v651_v39 = vpop.f32.mrb[3].mxu1 }
  0xe9   : > { %v339_v9 = vadd.f32 %v768_v14, %v322_v23 }
  0xea   : > { %v507_v41 = vadd.f32 %v497_v30, %v334_v21  ;;  %v498_v42 = vadd.f32 %v780_v19, %v481_v32  ;;  %v513_v45 = vadd.f32 %v503_v36, %v340_v26  ;;  %v504_v46 = vadd.f32 %v780_v19, %v487_v38 }
  0xec   : > { %v517_v48 = vmax.f32 %v507_v41, 0.0  ;;  %v508_v49 = vadd.f32 %v498_v42, %v335_v31  ;;  %v523_v51 = vmax.f32 %v513_v45, 0.0  ;;  %v514_v52 = vadd.f32 %v504_v46, %v341_v37 }
  0xed   : > { %v442_v53 = vpop.f32.mrb[4].mxu0  ;;  %v466_v59 = vpop.f32.mrb[4].mxu1 }
  0xee   : > { %527 = vst [vmem:[%s804_s23] sm:$0xff] %v517_v48  ;;  %v518_v55 = vmax.f32 %v508_v49, 0.0  ;;  %v482_v57 = vmul.f32 %v773_v15, %v442_v53  ;;  %v642_v58 = vpop.f32.mrb[5].mxu0  ;;  %533 = vst [vmem:[%s804_s23 + $0x30] sm:$0xff] %v523_v51  ;;  %v524_v60 = vmax.f32 %v514_v52, 0.0  ;;  %v488_v63 = vmul.f32 %v773_v15, %v466_v59  ;;  %v654_v0 = vpop.f32.mrb[5].mxu1 }
  0xef   : > { %v445_v61 = vpop.f32.mrb[6].mxu0  ;;  %v469_v6 = vpop.f32.mrb[6].mxu1 }
  0xf0   : > { %528 = vst [vmem:[%s804_s23 + $0x8] sm:$0xff] %v518_v55  ;;  %v499_v2 = vadd.f32 %v780_v19, %v482_v57  ;;  %v483_v4 = vmul.f32 %v773_v15, %v445_v61  ;;  %v643_v5 = vpop.f32.mrb[7].mxu0  ;;  %534 = vst [vmem:[%s804_s23 + $0x38] sm:$0xff] %v524_v60  ;;  %v505_v7 = vadd.f32 %v780_v19, %v488_v63  ;;  %v655_v11 = vpop.f32.mrb[7].mxu1 }
  0xf1   : > { %v489_v10 = vmul.f32 %v773_v15, %v469_v6 }
  0xf2   : > { %v509_v13 = vadd.f32 %v499_v2, %v336_v56  ;;  %v500_v16 = vadd.f32 %v780_v19, %v483_v4  ;;  %v515_v18 = vadd.f32 %v505_v7, %v342_v62 }
  0xf3   : > { %v506_v20 = vadd.f32 %v780_v19, %v489_v10 }
  0xf4   : > { %v519_v21 = vmax.f32 %v509_v13, 0.0  ;;  %v510_v22 = vadd.f32 %v500_v16, %v337_v3  ;;  %v525_v24 = vmax.f32 %v515_v18, 0.0 }
  0xf5   : > { %v516_v25 = vadd.f32 %v506_v20, %v343_v8  ;;  %v450_v26 = vpop.f32.mrb[8].mxu0 }
  0xf6   : > { %529 = vst [vmem:[%s804_s23 + $0x10] sm:$0xff] %v519_v21  ;;  %v520_v27 = vmax.f32 %v510_v22, 0.0  ;;  %v484_v29 = vmul.f32 %v773_v15, %v450_v26  ;;  %v646_v30 = vpop.f32.mrb[9].mxu0  ;;  %535 = vst [vmem:[%s804_s23 + $0x40] sm:$0xff] %v525_v24 }
  0xf7   : > { %v526_v31 = vmax.f32 %v516_v25, 0.0  ;;  %v453_v32 = vpop.f32.mrb[10].mxu0 }
  0xf8   : > { %530 = vst [vmem:[%s804_s23 + $0x18] sm:$0xff] %v520_v27  ;;  %v501_v33 = vadd.f32 %v780_v19, %v484_v29  ;;  %v485_v34 = vmul.f32 %v773_v15, %v453_v32  ;;  %v647_v35 = vpop.f32.mrb[11].mxu0 }
  0xf9   : > { %536 = vst [vmem:[%s804_s23 + $0x48] sm:$0xff] %v526_v31 }
  0xfa   : > { %v511_v36 = vadd.f32 %v501_v33, %v338_v28  ;;  %v502_v37 = vadd.f32 %v780_v19, %v485_v34 }
  0xfc   : > { %v521_v38 = vmax.f32 %v511_v36, 0.0  ;;  %v512_v39 = vadd.f32 %v502_v37, %v339_v9 }
  0xfe   : > { %531 = vst [vmem:[%s804_s23 + $0x20] sm:$0xff] %v521_v38  ;;  %v522_v40 = vmax.f32 %v512_v39, 0.0 }
 0x100   : > { %532 = vst [vmem:[%s804_s23 + $0x28] sm:$0xff] %v522_v40 }
 0x101 PF: > { %s17_s24 = sadd.s32 1, %s681_s24  }
 0x102   : > { %p14_p4 = scmp.ge.s32.totalorder %s17_s24, 4  }
 0x104   :  { %16 = sbr.rel (!%p14_p4) target bundleno = 1 (0x1), region = 81 }

// kernel: a_call__.4
= control target key start
LH: loop header
LB: loop body
LE: loop exit
PB: predicated region body
PF: predicated region fallthrough
CT: control target
= control target key end

     0   :  { %s3780_s21 = smov 0   ;;  %s4522_s0 = inlined_call_operand.vmem [shape: bf16[2,163,4], index: 0, kind: input, shape index: {}]   ;;  %s4523_s1 = inlined_call_operand.vmem [shape: bf16[2,163,4], index: 1, kind: input, shape index: {}]   ;;  %s4524_s2 = inlined_call_operand.vmem [shape: bf16[9,4,128], index: 2, kind: input, shape index: {}]   ;;  %s4525_s3 = inlined_call_operand.vmem [shape: f32[144,1], index: 3, kind: input, shape index: {}]   ;;  %s4526_s4 = inlined_call_operand.vmem [shape: f32[2,144,128], index: 4, kind: output, shape index: {0}]   ;;  %s4527_s5 = inlined_call_operand.vmem [shape: f32[1,128], index: 5, kind: output, shape index: {1}]   ;;  %s4528_s6 = inlined_call_operand.vmem [shape: f32[1,128], index: 6, kind: output, shape index: {2}]  }
   0x1 LB: > { %s3786_s22 = sadd.s32 4294967295, %s3739_s21   ;;  %p2777_p0 = scmp.ge.s32.totalorder %s3739_s21, 1  ;;  %s3739_s21 = sphi %s3780_s21, %s17_s21  }
   0x2   : > { %p217_p1 = scmp.lt.s32.totalorder %s3739_s21, 3 }
   0x4   : > { %p218_p2 = pnand %p2777_p0, %p217_p1 }
   0x5   : > { %v2781_v0 = vld [vmem:[%s4524_s2 + $0x2] sm:$0x3] (!%p218_p2)  ;;  %vm380_vm0 = vcmask (!%p218_p2), 1041408   ;;  %p252_p3 = scmp.lt.s32.totalorder (!%p218_p2), %s3786_s22, 1  ;;  %v3741_v1 = vmov (!%p218_p2), 0.0   ;;  %vm3742_vm1 = vmmov (!%p218_p2), 0  }
   0x6   : > { %221 = sbr.rel (%p218_p2) target bundleno = 751 (0x2ef), region = 36  ;;  %3033 = vmatprep.subr.bf16.mxu1 (!%p218_p2), %v3741_v1  ;;  %v382_v2 = vsel (!%p218_p2), %vm380_vm0, %v2781_v0, 0  ;;  %3035 = vmatprep.mubr.msk.bf16.mxu1 (!%p218_p2), %vm3742_vm1, %v3741_v1  ;;  %v2858_v3 = vld [vmem:[%s4524_s2 + $0x8] sm:$0x3] (!%p218_p2)  ;;  %v286_v5 = vld [vmem:[%s4524_s2] sm:$0x3] (!%p218_p2) }
   0x7   : > { %3034 = vmatpush3.bf16.msra.mxu1 (!%p218_p2), %v382_v2  ;;  %3185 = vmatprep.subr.bf16.mxu0 (!%p218_p2), %v3741_v1  ;;  %v3806_v4 = vsel (!%p218_p2), %vm380_vm0, %v2858_v3, 0  ;;  %vm352_vm2 = vcmask (!%p218_p2), 31744   ;;  %v562_v7 = vsel (!%p218_p2), %vm380_vm0, %v286_v5, 0  ;;  %v2878_v14 = vld [vmem:[%s4524_s2 + $0xa] sm:$0x3] (!%p218_p2)  ;;  %vm1570_vm4 = vcmask (!%p218_p2), 1046528  }
   0x8   : > { %3186 = vmatpush3.bf16.msra.mxu0 (!%p218_p2), %v3806_v4  ;;  %3187 = vmatprep.mubr.msk.bf16.mxu0 (!%p218_p2), %vm3742_vm1, %v3741_v1  ;;  %vm738_vm3 = vsmask.f32 (!%p218_p2), 7424  ;;  %v1618_v21 = vsel (!%p218_p2), %vm380_vm0, %v2878_v14, 0  ;;  %v2889_v56 = vld [vmem:[%s4524_s2 + $0xc] sm:$0x3] (!%p218_p2)  ;;  %p2940_p4 = scmp.ne.s32.totalorder (!%p218_p2), %s3786_s22, 0 }
   0x9   : > { %3223 = vmatprep.subr.bf16.mxu0 (!%p218_p2), %v3741_v1  ;;  %3071 = vmatprep.subr.bf16.mxu1 (!%p218_p2), %v3741_v1  ;;  %v1859_v60 = vsel (!%p218_p2), %vm380_vm0, %v2889_v56, 0  ;;  %vm2231_vm5 = vsmask.f32 (!%p218_p2), 6400 }
   0xd   : > { %s3802_s27 = scalar_select %p252_p3, %s3786_s22, 1 }
   0xf   : > { %s3647_s28 = smul.u32 84, %s3802_s27 }
  0x11   : > { %s3822_s9 = scalar_lea.vmem %s4523_s1, %s3647_s28  ;;  %s3852_s14 = scalar_lea.vmem %s4522_s0, %s3647_s28 }
  0x12   : > { %v3661_v6 = vld [vmem:[%s3822_s9] sm:$0xff]   ;;  %v3663_v9 = vld [vmem:[%s3822_s9 + $0xc] sm:$0xff]   ;;  %v3665_v13 = vld [vmem:[%s3822_s9 + $0x14] sm:$0xff]   ;;  %s3648_s28 = smul.u32 144, %s3802_s27 }
  0x13   : > { %3036 = vmatmul.mubr.msk.bf16.vlgmr.msra.gmra.mrb[0].mxu1 %vm352_vm2, %v3661_v6  ;;  %v3662_v8 = vld [vmem:[%s3822_s9 + $0x4] sm:$0xff]   ;;  %v1343_v12 = vshll.u32 %v3663_v9, 16  ;;  %v1347_v19 = vshrl.u32 %v3663_v9, 16  ;;  %v1351_v20 = vshll.u32 %v3665_v13, 16  ;;  %v3671_v23 = vld [vmem:[%s3822_s9 + $0x2c] sm:$0xff]   ;;  %v3667_v26 = vld [vmem:[%s3822_s9 + $0x1c] sm:$0xff]  }
  0x14   : > { %3039 = vmatprep.mubr.msk.bf16.mxu1 %vm3742_vm1, %v3741_v1  ;;  %3072 = vmatpush3.bf16.msra.mxu1 %v562_v7  ;;  %v1336_v10 = vshrl.u32 %v3662_v8, 16  ;;  %v1338_v11 = vshll.u32 %v3662_v8, 16  ;;  %v3664_v17 = vld [vmem:[%s3822_s9 + $0x8] sm:$0xff]   ;;  %v1375_v27 = vshll.u32 %v3671_v23, 16  ;;  %v1379_v28 = vshrl.u32 %v3671_v23, 16  ;;  %v3666_v29 = vld [vmem:[%s3822_s9 + $0x10] sm:$0xff]   ;;  %s4336_s7 = scalar_lea.vmem %s4526_s4, %s3648_s28 }
  0x15   : > { %3109 = vmatprep.subr.bf16.mxu1 %v3741_v1  ;;  %v1345_v16 = vrot.slane %v1343_v12, 1  ;;  %v1353_v25 = vrot.slane %v1351_v20, 1  ;;  %v1355_v32 = vshrl.u32 %v3665_v13, 16  ;;  %v1359_v33 = vshll.u32 %v3667_v26, 16  ;;  %v3669_v37 = vld [vmem:[%s3822_s9 + $0x24] sm:$0xff]   ;;  %v3668_v38 = vld [vmem:[%s3822_s9 + $0x18] sm:$0xff]  }
  0x16   : > { %v1340_v15 = vrot.slane %v1338_v11, 1  ;;  %v1377_v30 = vrot.slane %v1375_v27, 1  ;;  %v1363_v40 = vshrl.u32 %v3667_v26, 16  ;;  %v1367_v41 = vshll.u32 %v3669_v37, 16  ;;  %v3670_v44 = vld [vmem:[%s3822_s9 + $0x20] sm:$0xff]   ;;  %v3672_v50 = vld [vmem:[%s3822_s9 + $0x28] sm:$0xff]  }
  0x17   : > { %v1349_v24 = vor.u32 %v1347_v19, %v1345_v16  ;;  %v1357_v35 = vor.u32 %v1355_v32, %v1353_v25  ;;  %v1361_v36 = vrot.slane %v1359_v33, 1  ;;  %v1371_v46 = vshrl.u32 %v3669_v37, 16  ;;  %v3883_v48 = vld [vmem:[%s3852_s14 + $0x8] sm:$0xf]  ;;  %v1564_v49 = vld [vmem:[%s3852_s14 + $0x4] sm:$0xe] }
  0x18   : > { %v1341_v18 = vor.u32 %v1340_v15, %v1336_v10  ;;  %v3857_v34 = vor.u32 %v1379_v28, %v1377_v30  ;;  %v1369_v43 = vrot.slane %v1367_v41, 1  ;;  %v3888_v51 = vld [vmem:[%s3852_s14 + $0xc] sm:$0xff]   ;;  %v2879_v53 = vcombine.low %v1564_v49, %v3883_v48  ;;  %v3905_v59 = vld [vmem:[%s3852_s14 + $0x14] sm:$0xff]   ;;  %v3919_v0 = vld [vmem:[%s3852_s14 + $0x1c] sm:$0xff]  }
  0x19   : > { %v1354_v31 = vsel %vm738_vm3, %v1349_v24, %v1353_v25  ;;  %v1362_v39 = vsel %vm738_vm3, %v1357_v35, %v1361_v36  ;;  %v1365_v42 = vor.u32 %v1363_v40, %v1361_v36  ;;  %v1572_v55 = vrot.slane %v3888_v51, 1  ;;  %v3676_v57 = vld [vmem:[%s3822_s9 + $0x30] sm:$0xff]   ;;  %v3678_v62 = vld [vmem:[%s3822_s9 + $0x38] sm:$0xff]   ;;  %v3680_v3 = vld [vmem:[%s3822_s9 + $0x40] sm:$0xff]  }
  0x1a   : > { %v1346_v22 = vsel %vm738_vm3, %v1341_v18, %v1345_v16  ;;  %v1373_v47 = vor.u32 %v1371_v46, %v1369_v43  ;;  %v1571_v54 = vrot.slane %v2879_v53, 1  ;;  %v1574_v61 = vrot.slane %v3905_v59, 1  ;;  %v3930_v5 = vld [vmem:[%s3852_s14 + $0x24] sm:$0xff]   ;;  %v3946_v11 = vld [vmem:[%s3852_s14 + $0x2c] sm:$0xff]   ;;  %v3960_v16 = vld [vmem:[%s3852_s14 + $0x34] sm:$0xff]  }
  0x1b   : > { %3040 = vmatmul.mubr.msk.bf16.gmra.mrb[4].mxu1 %vm352_vm2, %v3664_v17  ;;  %3188 = vmatmul.mubr.msk.bf16.vlgmr.msra.gmra.mrb[0].mxu0 %vm352_vm2, %v1346_v22  ;;  %v1370_v45 = vsel %vm738_vm3, %v1365_v42, %v1369_v43  ;;  %v1576_v2 = vrot.slane %v3919_v0, 1  ;;  %v1578_v7 = vrot.slane %v3930_v5, 1  ;;  %v3682_v8 = vld [vmem:[%s3852_s14] sm:$0xff]   ;;  %v1580_v13 = vrot.slane %v3946_v11, 1  ;;  %v3684_v14 = vld [vmem:[%s3852_s14 + $0x8] sm:$0xff]   ;;  %v3686_v18 = vld [vmem:[%s3852_s14 + $0x10] sm:$0xff]  }
  0x1c   : > { %3043 = vmatprep.mubr.msk.bf16.mxu1 %vm3742_vm1, %v3741_v1  ;;  %3224 = vmatpush3.bf16.msra.mxu0 %v1618_v21  ;;  %v1378_v52 = vsel %vm738_vm3, %v1373_v47, %v1377_v30  ;;  %v1573_v58 = vsel %vm1570_vm4, %v1571_v54, %v1572_v55  ;;  %v1575_v63 = vsel %vm1570_vm4, %v1572_v55, %v1574_v61  ;;  %v2818_v9 = vld [vmem:[%s4524_s2 + $0x4] sm:$0x3]  ;;  %v1582_v17 = vrot.slane %v3960_v16, 1  ;;  %v3972_v20 = vld [vmem:[%s3852_s14 + $0x3c] sm:$0xff]   ;;  %v3692_v30 = vld [vmem:[%s3852_s14 + $0x28] sm:$0xff]  }
  0x1d   : > { %3191 = vmatprep.mubr.msk.bf16.mxu0 %vm3742_vm1, %v3741_v1  ;;  %3261 = vmatprep.subr.bf16.mxu0 %v3741_v1  ;;  %v1577_v6 = vsel %vm1570_vm4, %v1574_v61, %v1576_v2  ;;  %v1579_v10 = vsel %vm1570_vm4, %v1576_v2, %v1578_v7  ;;  %v843_v12 = vsel %vm380_vm0, %v2818_v9, 0  ;;  %v1581_v15 = vsel %vm1570_vm4, %v1578_v7, %v1580_v13  ;;  %v3688_v22 = vld [vmem:[%s3852_s14 + $0x18] sm:$0xff]   ;;  %v3984_v24 = vld [vmem:[%s3852_s14 + $0x44] sm:$0xff]   ;;  %v3996_v28 = vld [vmem:[%s3852_s14 + $0x4c] ss:$0 sps:$4 sm:$0x11]  }
  0x1e   : > { %v1583_v19 = vsel %vm1570_vm4, %v1580_v13, %v1582_v17  ;;  %v1584_v21 = vrot.slane %v3972_v20, 1  ;;  %v1586_v25 = vrot.slane %v3984_v24, 1  ;;  %v3690_v26 = vld [vmem:[%s3852_s14 + $0x20] sm:$0xff]   ;;  %v4008_v32 = vld [vmem:[%s3852_s14 + $0x8] sm:$0xfe]   ;;  %v4011_v33 = vld [vmem:[%s3852_s14 + $0x10] sm:$0xff]  }
  0x1f   : > { %v1812_v35 = vrot.slane %v4008_v32, 1  ;;  %v1813_v36 = vrot.slane %v4011_v33, 1  ;;  %v2909_v37 = vld [vmem:[%s4524_s2 + $0xe] sm:$0x3]  ;;  %v4027_v40 = vld [vmem:[%s3852_s14 + $0x18] sm:$0xff]   ;;  %v4042_v46 = vld [vmem:[%s3852_s14 + $0x20] sm:$0xff]  }
  0x20   : > { %v1585_v23 = vsel %vm1570_vm4, %v1582_v17, %v1584_v21  ;;  %v1587_v27 = vsel %vm1570_vm4, %v1584_v21, %v1586_v25  ;;  %v2100_v41 = vsel %vm380_vm0, %v2909_v37, 0  ;;  %v1815_v42 = vrot.slane %v4027_v40, 1  ;;  %v3697_v43 = vld [vmem:[%s3852_s14 + $0x38] sm:$0xff]   ;;  %v3702_v47 = vld [vmem:[%s3852_s14 + $0x8] sm:$0xff]   ;;  %v3704_v61 = vld [vmem:[%s3852_s14 + $0x10] sm:$0xff]  }
  0x21   : > { %v747_v55 = vshll.u32 %v3702_v47, 16  ;;  %v3706_v13 = vld [vmem:[%s3852_s14 + $0x18] sm:$0xff]   ;;  %v759_v17 = vshrl.u32 %v3704_v61, 16 }
  0x22   : > { %v4086_v21 = vld [vmem:[%s3852_s14 + $0x38] sm:$0xff]  }
  0x23   : > { %3044 = vmatmul.mubr.msk.bf16.gmra.mrb[8].mxu1 %vm352_vm2, %v3666_v29  ;;  %3192 = vmatmul.mubr.msk.bf16.gmra.mrb[4].mxu0 %vm352_vm2, %v1354_v31  ;;  %v1588_v29 = vrot.slane %v3996_v28, 1 }
  0x24   : > { %3047 = vmatprep.mubr.msk.bf16.mxu1 %vm3742_vm1, %v3741_v1  ;;  %3195 = vmatprep.mubr.msk.bf16.mxu0 %vm3742_vm1, %v3741_v1 }
  0x25   : > { %v1589_v31 = vsel %vm1570_vm4, %v1586_v25, %v1588_v29  ;;  %v3708_v25 = vld [vmem:[%s3852_s14 + $0x20] sm:$0xff]   ;;  %v767_v29 = vshrl.u32 %v3706_v13, 16 }
  0x2b   : > { %3048 = vmatmul.mubr.msk.bf16.gmra.mrb[12].mxu1 %vm352_vm2, %v3668_v38  ;;  %3196 = vmatmul.mubr.msk.bf16.gmra.mrb[8].mxu0 %vm352_vm2, %v1362_v39  ;;  %v3695_v38 = vld [vmem:[%s3852_s14 + $0x30] sm:$0xff]   ;;  %v1814_v39 = vsel %vm1570_vm4, %v1812_v35, %v1813_v36  ;;  %v4099_v35 = vld [vmem:[%s3852_s14 + $0x40] sm:$0xff]  }
  0x2c   : > { %3051 = vmatprep.mubr.msk.bf16.mxu1 %vm3742_vm1, %v3741_v1  ;;  %3199 = vmatprep.mubr.msk.bf16.mxu0 %vm3742_vm1, %v3741_v1 }
  0x33   : > { %3052 = vmatmul.mubr.msk.bf16.gmra.mrb[16].mxu1 %vm352_vm2, %v3670_v44  ;;  %3200 = vmatmul.mubr.msk.bf16.gmra.mrb[12].mxu0 %vm352_vm2, %v1370_v45  ;;  %v3701_v44 = vld [vmem:[%s3852_s14] sm:$0xff]   ;;  %v1816_v45 = vsel %vm1570_vm4, %v1813_v36, %v1815_v42 }
  0x34   : > { %3055 = vmatprep.mubr.msk.bf16.mxu1 %vm3742_vm1, %v3741_v1  ;;  %3203 = vmatprep.mubr.msk.bf16.mxu0 %vm3742_vm1, %v3741_v1  ;;  %v742_v49 = vshll.u32 %v3701_v44, 16  ;;  %v740_v53 = vshrl.u32 %v3701_v44, 16 }
  0x36   : > { %v744_v54 = vrot.slane %v742_v49, 1 }
  0x3b   : > { %3056 = vmatmul.mubr.msk.bf16.gmra.mrb[20].mxu1 %vm352_vm2, %v3672_v50  ;;  %3204 = vmatmul.mubr.msk.bf16.gmra.mrb[16].mxu0 %vm352_vm2, %v1378_v52  ;;  %v1817_v50 = vrot.slane %v4042_v46, 1  ;;  %v3699_v52 = vld [vmem:[%s3852_s14 + $0x40] sm:$0xff]  }
  0x3c   : > { %3059 = vmatprep.mubr.msk.bf16.mxu1 %vm3742_vm1, %v3741_v1  ;;  %3225 = vmatprep.mubr.msk.bf16.mxu0 %vm3742_vm1, %v3741_v1 }
  0x3d   : > { %v1818_v56 = vsel %vm1570_vm4, %v1815_v42, %v1817_v50  ;;  %v775_v42 = vshrl.u32 %v3708_v25, 16 }
  0x43   : > { %3060 = vmatmul.mubr.msk.bf16.gmra.mrb[24].mxu1 %vm352_vm2, %v3676_v57  ;;  %3226 = vmatmul.mubr.msk.bf16.vlgmr.msra.gmra.mrb[0].mxu0 %vm352_vm2, %v1573_v58  ;;  %v4055_v57 = vld [vmem:[%s3852_s14 + $0x28] sm:$0xff]   ;;  %v745_v58 = vor.u32 %v744_v54, %v740_v53 }
  0x44   : > { %3063 = vmatprep.mubr.msk.bf16.mxu1 %vm3742_vm1, %v3741_v1  ;;  %3262 = vmatpush3.bf16.msra.mxu0 %v1859_v60  ;;  %v749_v60 = vrot.slane %v747_v55, 1 }
  0x45   : > { %3229 = vmatprep.mubr.msk.bf16.mxu0 %vm3742_vm1, %v3741_v1  ;;  %3299 = vmatprep.subr.bf16.mxu0 %v3741_v1 }
  0x46   : > { %v750_v2 = vsel %vm738_vm3, %v745_v58, %v749_v60  ;;  %v3711_v58 = vld [vmem:[%s3852_s14 + $0x50] ss:$0 sps:$4 sm:$0x11]  }
  0x4b   : > { %3064 = vmatmul.mubr.msk.bf16.gmra.mrb[28].mxu1 %vm352_vm2, %v3678_v62  ;;  %3230 = vmatmul.mubr.msk.bf16.gmra.mrb[4].mxu0 %vm352_vm2, %v1575_v63  ;;  %v1819_v62 = vrot.slane %v4055_v57, 1  ;;  %v2838_v63 = vld [vmem:[%s4524_s2 + $0x6] sm:$0x3] }
  0x4c   : > { %3067 = vmatprep.mubr.msk.bf16.mxu1 %vm3742_vm1, %v3741_v1  ;;  %3233 = vmatprep.mubr.msk.bf16.mxu0 %vm3742_vm1, %v3741_v1  ;;  %v1141_v9 = vsel %vm380_vm0, %v2838_v63, 0  ;;  %v1829_v63 = vrot.slane %v3711_v58, 1  ;;  %v3720_v58 = vld [vmem:[%s3822_s9 + $0x28] sm:$0xff]  }
  0x4d   : > { %v1820_v7 = vsel %vm1570_vm4, %v1817_v50, %v1819_v62  ;;  %v3712_v50 = vld [vmem:[%s3852_s14 + $0x30] sm:$0xff]  }
  0x4e   : > { %v787_v55 = vshll.u32 %v3712_v50, 16 }
  0x53   : > { %3068 = vmatmul.mubr.msk.bf16.gmra.mrb[32].mxu1 %vm352_vm2, %v3680_v3  ;;  %3234 = vmatmul.mubr.msk.bf16.gmra.mrb[8].mxu0 %vm352_vm2, %v1577_v6  ;;  %v751_v3 = vshrl.u32 %v3702_v47, 16  ;;  %v755_v6 = vshll.u32 %v3704_v61, 16  ;;  %v789_v61 = vrot.slane %v787_v55, 1  ;;  %v1045_v55 = vshll.u32 %v3888_v51, 16 }
  0x54   : > { %3073 = vmatprep.mubr.msk.bf16.mxu1 %vm3742_vm1, %v3741_v1  ;;  %3237 = vmatprep.mubr.msk.bf16.mxu0 %vm3742_vm1, %v3741_v1 }
  0x5b   : > { %3074 = vmatmul.mubr.msk.bf16.vlgmr.msra.gmra.mrb[0].mxu1 %vm352_vm2, %v3682_v8  ;;  %3238 = vmatmul.mubr.msk.bf16.gmra.mrb[12].mxu0 %vm352_vm2, %v1579_v10  ;;  %v4071_v8 = vld [vmem:[%s3852_s14 + $0x30] sm:$0xff]   ;;  %v753_v10 = vor.u32 %v751_v3, %v749_v60  ;;  %v791_v3 = vshrl.u32 %v3712_v50, 16 }
  0x5c   : > { %3077 = vmatprep.mubr.msk.bf16.mxu1 %vm3742_vm1, %v3741_v1  ;;  %3241 = vmatprep.mubr.msk.bf16.mxu0 %vm3742_vm1, %v3741_v1 }
  0x5d   : > { %3110 = vmatpush3.bf16.msra.mxu1 %v843_v12  ;;  %v757_v12 = vrot.slane %v755_v6, 1 }
  0x5e   : > { %3147 = vmatprep.subr.bf16.mxu1 %v3741_v1 }
  0x63   : > { %3078 = vmatmul.mubr.msk.bf16.gmra.mrb[4].mxu1 %vm352_vm2, %v3684_v14  ;;  %3242 = vmatmul.mubr.msk.bf16.gmra.mrb[16].mxu0 %vm352_vm2, %v1581_v15  ;;  %v1821_v14 = vrot.slane %v4071_v8, 1  ;;  %v758_v15 = vsel %vm738_vm3, %v753_v10, %v757_v12  ;;  %v3714_v10 = vld [vmem:[%s3822_s9 + $0x10] sm:$0xff]  }
  0x64   : > { %3081 = vmatprep.mubr.msk.bf16.mxu1 %vm3742_vm1, %v3741_v1  ;;  %3245 = vmatprep.mubr.msk.bf16.mxu0 %vm3742_vm1, %v3741_v1 }
  0x6b   : > { %3082 = vmatmul.mubr.msk.bf16.gmra.mrb[8].mxu1 %vm352_vm2, %v3686_v18  ;;  %3246 = vmatmul.mubr.msk.bf16.gmra.mrb[20].mxu0 %vm352_vm2, %v1583_v19  ;;  %v763_v18 = vshll.u32 %v3706_v13, 16  ;;  %v1822_v19 = vsel %vm1570_vm4, %v1819_v62, %v1821_v14  ;;  %v3715_v62 = vld [vmem:[%s3852_s14 + $0x38] sm:$0xff]  }
  0x6c   : > { %3085 = vmatprep.mubr.msk.bf16.mxu1 %vm3742_vm1, %v3741_v1  ;;  %3249 = vmatprep.mubr.msk.bf16.mxu0 %vm3742_vm1, %v3741_v1  ;;  %v795_v6 = vshll.u32 %v3715_v62, 16 }
  0x6e   : > { %v797_v13 = vrot.slane %v795_v6, 1 }
  0x73   : > { %3086 = vmatmul.mubr.msk.bf16.gmra.mrb[12].mxu1 %vm352_vm2, %v3688_v22  ;;  %3250 = vmatmul.mubr.msk.bf16.gmra.mrb[24].mxu0 %vm352_vm2, %v1585_v23  ;;  %v761_v22 = vor.u32 %v759_v17, %v757_v12  ;;  %v765_v23 = vrot.slane %v763_v18, 1  ;;  %v793_v12 = vor.u32 %v791_v3, %v789_v61  ;;  %v2054_v17 = vrot.slane %v3714_v10, 1  ;;  %v2929_v18 = vld [vmem:[%s4524_s2 + $0x10] sm:$0x3] }
  0x74   : > { %3089 = vmatprep.mubr.msk.bf16.mxu1 %vm3742_vm1, %v3741_v1  ;;  %3253 = vmatprep.mubr.msk.bf16.mxu0 %vm3742_vm1, %v3741_v1  ;;  %v1053_v3 = vshll.u32 %v3905_v59, 16 }
  0x75   : > { %v769_v36 = vor.u32 %v767_v29, %v765_v23 }
  0x76   : > { %v1055_v10 = vrot.slane %v1053_v3, 1 }
  0x7b   : > { %3090 = vmatmul.mubr.msk.bf16.gmra.mrb[16].mxu1 %vm352_vm2, %v3690_v26  ;;  %3254 = vmatmul.mubr.msk.bf16.gmra.mrb[28].mxu0 %vm352_vm2, %v1587_v27  ;;  %v1823_v26 = vrot.slane %v4086_v21, 1  ;;  %v766_v27 = vsel %vm738_vm3, %v761_v22, %v765_v23  ;;  %v799_v22 = vshrl.u32 %v3715_v62, 16  ;;  %v2060_v62 = vrot.slane %v3720_v58, 1 }
  0x7c   : > { %3093 = vmatprep.mubr.msk.bf16.mxu1 %vm3742_vm1, %v3741_v1  ;;  %3257 = vmatprep.mubr.msk.bf16.mxu0 %vm3742_vm1, %v3741_v1 }
  0x7d   : > { %v801_v29 = vor.u32 %v799_v22, %v797_v13  ;;  %v1065_v22 = vshrl.u32 %v3919_v0, 16 }
  0x83   : > { %3094 = vmatmul.mubr.msk.bf16.gmra.mrb[20].mxu1 %vm352_vm2, %v3692_v30  ;;  %3258 = vmatmul.mubr.msk.bf16.gmra.mrb[32].mxu0 %vm352_vm2, %v1589_v31  ;;  %v771_v30 = vshll.u32 %v3708_v25, 16  ;;  %v1824_v31 = vsel %vm1570_vm4, %v1821_v14, %v1823_v26  ;;  %v3717_v14 = vld [vmem:[%s3852_s14 + $0x40] sm:$0xff]  }
  0x84   : > { %3097 = vmatprep.mubr.msk.bf16.mxu1 %vm3742_vm1, %v3741_v1  ;;  %3263 = vmatprep.mubr.msk.bf16.mxu0 %vm3742_vm1, %v3741_v1  ;;  %v803_v23 = vshll.u32 %v3717_v14, 16 }
  0x85   : > { %v773_v37 = vrot.slane %v771_v30, 1 }
  0x86   : > { %v805_v30 = vrot.slane %v803_v23, 1  ;;  %v1069_v23 = vshll.u32 %v3930_v5, 16 }
  0x87   : > { %v777_v47 = vor.u32 %v775_v42, %v773_v37 }
  0x8b   : > { %3098 = vmatmul.mubr.msk.bf16.gmra.mrb[24].mxu1 %vm352_vm2, %v3695_v38  ;;  %3264 = vmatmul.mubr.msk.bf16.vlgmr.msra.gmra.mrb[0].mxu0 %vm352_vm2, %v1814_v39  ;;  %v3710_v38 = vld [vmem:[%s3852_s14 + $0x28] sm:$0xff]   ;;  %v1825_v39 = vrot.slane %v4099_v35, 1 }
  0x8c   : > { %3101 = vmatprep.mubr.msk.bf16.mxu1 %vm3742_vm1, %v3741_v1  ;;  %3300 = vmatpush3.bf16.msra.mxu0 %v2100_v41  ;;  %v774_v41 = vsel %vm738_vm3, %v769_v36, %v773_v37  ;;  %v783_v54 = vshrl.u32 %v3710_v38, 16  ;;  %v968_v36 = vld [vmem:[%s3852_s14 + $0x4] sm:$0xf] }
  0x8d   : > { %3267 = vmatprep.mubr.msk.bf16.mxu0 %vm3742_vm1, %v3741_v1  ;;  %3337 = vmatprep.subr.bf16.mxu0 %v3741_v1  ;;  %v1826_v44 = vsel %vm1570_vm4, %v1823_v26, %v1825_v39  ;;  %v3716_v26 = vld [vmem:[%s3822_s9 + $0x18] sm:$0xff]  }
  0x8e   : > { %v2056_v37 = vrot.slane %v3716_v26, 1  ;;  %v3723_v26 = vld [vmem:[%s3822_s9 + $0x40] sm:$0xff]  }
  0x93   : > { %3102 = vmatmul.mubr.msk.bf16.gmra.mrb[28].mxu1 %vm352_vm2, %v3697_v43  ;;  %3268 = vmatmul.mubr.msk.bf16.gmra.mrb[4].mxu0 %vm352_vm2, %v1816_v45  ;;  %v779_v43 = vshll.u32 %v3710_v38, 16  ;;  %v4112_v45 = vld [vmem:[%s3852_s14 + $0x48] sm:$0xff]   ;;  %v2839_v38 = vcombine.low %v968_v36, %v3883_v48  ;;  %v1077_v36 = vshll.u32 %v3946_v11, 16 }
  0x94   : > { %3105 = vmatprep.mubr.msk.bf16.mxu1 %vm3742_vm1, %v3741_v1  ;;  %3271 = vmatprep.mubr.msk.bf16.mxu0 %vm3742_vm1, %v3741_v1 }
  0x95   : > { %v781_v49 = vrot.slane %v779_v43, 1  ;;  %v2057_v43 = vsel %vm1570_vm4, %v2054_v17, %v2056_v37  ;;  %v1040_v50 = vshll.u32 %v2839_v38, 16 }
  0x97   : > { %v782_v53 = vsel %vm738_vm3, %v777_v47, %v781_v49  ;;  %v785_v60 = vor.u32 %v783_v54, %v781_v49  ;;  %v1042_v54 = vrot.slane %v1040_v50, 1 }
  0x9b   : > { %3106 = vmatmul.mubr.msk.bf16.gmra.mrb[32].mxu1 %vm352_vm2, %v3699_v52  ;;  %3272 = vmatmul.mubr.msk.bf16.gmra.mrb[8].mxu0 %vm352_vm2, %v1818_v56  ;;  %v1827_v52 = vrot.slane %v4112_v45, 1 }
  0x9c   : > { %3111 = vmatprep.mubr.msk.bf16.mxu1 %vm3742_vm1, %v3741_v1  ;;  %3275 = vmatprep.mubr.msk.bf16.mxu0 %vm3742_vm1, %v3741_v1 }
  0x9d   : > { %v1828_v56 = vsel %vm1570_vm4, %v1825_v39, %v1827_v52  ;;  %v806_v39 = vsel %vm738_vm3, %v801_v29, %v805_v30  ;;  %v1071_v29 = vrot.slane %v1069_v23, 1 }
  0xa3   : > { %3112 = vmatmul.mubr.msk.bf16.vlgmr.msra.gmra.mrb[0].mxu1 %vm352_vm2, %v750_v2  ;;  %3276 = vmatmul.mubr.msk.bf16.gmra.mrb[12].mxu0 %vm352_vm2, %v1820_v7  ;;  %v790_v2 = vsel %vm738_vm3, %v785_v60, %v789_v61  ;;  %v1830_v7 = vsel %vm1570_vm4, %v1827_v52, %v1829_v63  ;;  %v1047_v61 = vrot.slane %v1045_v55, 1  ;;  %v2244_v55 = vshll.u32 %v4011_v33, 16 }
  0xa4   : > { %3115 = vmatprep.mubr.msk.bf16.mxu1 %vm3742_vm1, %v3741_v1  ;;  %3279 = vmatprep.mubr.msk.bf16.mxu0 %vm3742_vm1, %v3741_v1 }
  0xa5   : > { %3148 = vmatpush3.bf16.msra.mxu1 %v1141_v9  ;;  %v3713_v9 = vld [vmem:[%s3822_s9 + $0x8] sm:$0xfe]   ;;  %v2246_v3 = vrot.slane %v2244_v55, 2 }
  0xa6   : > { %3375 = vmatprep.subr.bf16.mxu1 %v3741_v1 }
  0xab   : > { %3116 = vmatmul.mubr.msk.bf16.gmra.mrb[4].mxu1 %vm352_vm2, %v758_v15  ;;  %3280 = vmatmul.mubr.msk.bf16.gmra.mrb[16].mxu0 %vm352_vm2, %v1822_v19  ;;  %v2053_v15 = vrot.slane %v3713_v9, 1  ;;  %v798_v19 = vsel %vm738_vm3, %v793_v12, %v797_v13  ;;  %v1057_v13 = vshrl.u32 %v3905_v59, 16 }
  0xac   : > { %3119 = vmatprep.mubr.msk.bf16.mxu1 %vm3742_vm1, %v3741_v1  ;;  %3283 = vmatprep.mubr.msk.bf16.mxu0 %vm3742_vm1, %v3741_v1 }
  0xad   : > { %v2055_v25 = vsel %vm1570_vm4, %v2053_v15, %v2054_v17  ;;  %v3722_v17 = vld [vmem:[%s3822_s9 + $0x38] sm:$0xff]  }
  0xb3   : > { %3120 = vmatmul.mubr.msk.bf16.gmra.mrb[8].mxu1 %vm352_vm2, %v766_v27  ;;  %3284 = vmatmul.mubr.msk.bf16.gmra.mrb[20].mxu0 %vm352_vm2, %v1824_v31  ;;  %v2349_v27 = vsel %vm380_vm0, %v2929_v18, 0  ;;  %v3719_v31 = vld [vmem:[%s3852_s14 + $0x48] ss:$0 sps:$4 sm:$0x11]   ;;  %v1059_v18 = vor.u32 %v1057_v13, %v1055_v10 }
  0xb4   : > { %3123 = vmatprep.mubr.msk.bf16.mxu1 %vm3742_vm1, %v3741_v1  ;;  %3287 = vmatprep.mubr.msk.bf16.mxu0 %vm3742_vm1, %v3741_v1  ;;  %v811_v42 = vshll.u32 %v3719_v31, 16  ;;  %v1073_v31 = vshrl.u32 %v3930_v5, 16 }
  0xb6   : > { %v813_v49 = vrot.slane %v811_v42, 1 }
  0xbb   : > { %3124 = vmatmul.mubr.msk.bf16.gmra.mrb[12].mxu1 %vm352_vm2, %v774_v41  ;;  %3288 = vmatmul.mubr.msk.bf16.gmra.mrb[24].mxu0 %vm352_vm2, %v1826_v44  ;;  %v807_v41 = vshrl.u32 %v3717_v14, 16  ;;  %v3718_v44 = vld [vmem:[%s3822_s9 + $0x20] sm:$0xff]   ;;  %v1061_v14 = vshll.u32 %v3919_v0, 16 }
  0xbc   : > { %3127 = vmatprep.mubr.msk.bf16.mxu1 %vm3742_vm1, %v3741_v1  ;;  %3291 = vmatprep.mubr.msk.bf16.mxu0 %vm3742_vm1, %v3741_v1  ;;  %v2058_v48 = vrot.slane %v3718_v44, 1  ;;  %v1081_v44 = vshrl.u32 %v3946_v11, 16  ;;  %v2236_v11 = vshll.u32 %v4008_v32, 16 }
  0xbd   : > { %v809_v47 = vor.u32 %v807_v41, %v805_v30  ;;  %v2066_v30 = vrot.slane %v3723_v26, 1  ;;  %v1079_v41 = vrot.slane %v1077_v36, 1 }
  0xbe   : > { %v2061_v6 = vsel %vm1570_vm4, %v2058_v48, %v2060_v62 }
  0xbf   : > { %v814_v52 = vsel %vm738_vm3, %v809_v47, %v813_v49  ;;  %v1085_v47 = vshll.u32 %v3960_v16, 16 }
  0xc3   : > { %3128 = vmatmul.mubr.msk.bf16.gmra.mrb[16].mxu1 %vm352_vm2, %v782_v53  ;;  %3292 = vmatmul.mubr.msk.bf16.gmra.mrb[28].mxu0 %vm352_vm2, %v1828_v56  ;;  %v1038_v53 = vshrl.u32 %v2839_v38, 16  ;;  %v2059_v56 = vsel %vm1570_vm4, %v2056_v37, %v2058_v48  ;;  %v3724_v38 = vld [vmem:[%s3822_s9 + $0x48] sm:$0xff]   ;;  %v1083_v48 = vor.u32 %v1081_v44, %v1079_v41 }
  0xc4   : > { %3131 = vmatprep.mubr.msk.bf16.mxu1 %vm3742_vm1, %v3741_v1  ;;  %3295 = vmatprep.mubr.msk.bf16.mxu0 %vm3742_vm1, %v3741_v1  ;;  %v2068_v42 = vrot.slane %v3724_v38, 1 }
  0xc5   : > { %v1043_v60 = vor.u32 %v1042_v54, %v1038_v53  ;;  %v2233_v53 = vshrl.u32 %v4008_v32, 16  ;;  %v2241_v54 = vshrl.u32 %v4011_v33, 16 }
  0xc6   : > { %v2069_v49 = vsel %vm1570_vm4, %v2066_v30, %v2068_v42 }
  0xc7   : > { %v1048_v63 = vsel %vm738_vm3, %v1043_v60, %v1047_v61  ;;  %v1089_v60 = vshrl.u32 %v3960_v16, 16 }
  0xcb   : > { %3132 = vmatmul.mubr.msk.bf16.gmra.mrb[20].mxu1 %vm352_vm2, %v790_v2  ;;  %3296 = vmatmul.mubr.msk.bf16.gmra.mrb[32].mxu0 %vm352_vm2, %v1830_v7  ;;  %v1049_v2 = vshrl.u32 %v3888_v51, 16  ;;  %v3721_v7 = vld [vmem:[%s3822_s9 + $0x30] sm:$0xff]  }
  0xcc   : > { %3135 = vmatprep.mubr.msk.bf16.mxu1 %vm3742_vm1, %v3741_v1  ;;  %3301 = vmatprep.mubr.msk.bf16.mxu0 %vm3742_vm1, %v3741_v1  ;;  %v2062_v12 = vrot.slane %v3721_v7, 1  ;;  %v2250_v7 = vshrl.u32 %v4027_v40, 16 }
  0xcd   : > { %v1051_v9 = vor.u32 %v1049_v2, %v1047_v61  ;;  %v1093_v61 = vshll.u32 %v3972_v20, 16  ;;  %v2243_v2 = vrot.slane %v2241_v54, 1  ;;  %v2289_v54 = vshll.u32 %v4086_v21, 16 }
  0xce   : > { %v2063_v15 = vsel %vm1570_vm4, %v2060_v62, %v2062_v12  ;;  %v2235_v62 = vrot.slane %v2233_v53, 1 }
  0xcf   : > { %v1056_v51 = vsel %vm738_vm3, %v1051_v9, %v1055_v10  ;;  %v1095_v33 = vrot.slane %v1093_v61, 1  ;;  %v2247_v16 = vor.u32 %v2246_v3, %v2243_v2  ;;  %v2253_v9 = vshll.u32 %v4027_v40, 16  ;;  %v3729_v3 = vld [vmem:[%s3822_s9 + $0x4c] ss:$0 sps:$4 sm:$0x11]  }
  0xd3   : > { %3136 = vmatmul.mubr.msk.bf16.gmra.mrb[24].mxu1 %vm352_vm2, %v798_v19  ;;  %3302 = vmatmul.mubr.msk.bf16.vlgmr.msra.gmra.mrb[0].mxu0 %vm352_vm2, %v2055_v25  ;;  %v1063_v19 = vrot.slane %v1061_v14, 1  ;;  %v2252_v14 = vrot.slane %v2250_v7, 1  ;;  %v1407_v7 = vshll.u32 %v3729_v3, 16 }
  0xd4   : > { %3139 = vmatprep.mubr.msk.bf16.mxu1 %vm3742_vm1, %v3741_v1  ;;  %3338 = vmatpush3.bf16.msra.mxu0 %v2349_v27 }
  0xd5   : > { %3305 = vmatprep.mubr.msk.bf16.mxu0 %vm3742_vm1, %v3741_v1  ;;  %v1064_v59 = vsel %vm738_vm3, %v1059_v18, %v1063_v19  ;;  %v1067_v27 = vor.u32 %v1065_v22, %v1063_v19  ;;  %v2259_v18 = vshrl.u32 %v4042_v46, 16  ;;  %v2262_v19 = vshll.u32 %v4042_v46, 16 }
  0xd6   : > { %v1109_v22 = vshll.u32 %v3996_v28, 16  ;;  %v2268_v28 = vshrl.u32 %v4055_v57, 16 }
  0xd7   : > { %v1072_v0 = vsel %vm738_vm3, %v1067_v27, %v1071_v29  ;;  %v2264_v26 = vrot.slane %v2262_v19, 2  ;;  %v3730_v19 = vld [vmem:[%s3852_s14 + $0x50] ss:$0 sps:$4 sm:$0x33]  }
  0xd8   : > { %v1111_v46 = vrot.slane %v1109_v22, 1  ;;  %v2316_v22 = vshll.u32 %v3730_v19, 16 }
  0xdb   : > { %3140 = vmatmul.mubr.msk.bf16.gmra.mrb[28].mxu1 %vm352_vm2, %v806_v39  ;;  %3306 = vmatmul.mubr.msk.bf16.gmra.mrb[4].mxu0 %vm352_vm2, %v2057_v43  ;;  %v1075_v39 = vor.u32 %v1073_v31, %v1071_v29  ;;  %v3725_v43 = vld [vmem:[%s3822_s9 + $0x50] ss:$0 sps:$4 sm:$0x11]   ;;  %v3726_v29 = vld [vmem:[%s3822_s9 + $0x34] sm:$0xff]  }
  0xdc   : > { %3143 = vmatprep.mubr.msk.bf16.mxu1 %vm3742_vm1, %v3741_v1  ;;  %3309 = vmatprep.mubr.msk.bf16.mxu0 %vm3742_vm1, %v3741_v1  ;;  %v2070_v50 = vrot.slane %v3725_v43, 1  ;;  %v1383_v31 = vshll.u32 %v3726_v29, 16  ;;  %v1387_v44 = vshrl.u32 %v3726_v29, 16 }
  0xdd   : > { %v1080_v5 = vsel %vm738_vm3, %v1075_v39, %v1079_v41  ;;  %v3727_v41 = vld [vmem:[%s3822_s9 + $0x3c] sm:$0xff]  }
  0xde   : > { %v1385_v39 = vrot.slane %v1383_v31, 1 }
  0xe0   : > { %v1386_v43 = vsel %vm738_vm3, %v3857_v34, %v1385_v39 }
  0xe3   : > { %3144 = vmatmul.mubr.msk.bf16.gmra.mrb[32].mxu1 %vm352_vm2, %v814_v52  ;;  %3310 = vmatmul.mubr.msk.bf16.gmra.mrb[8].mxu0 %vm352_vm2, %v2059_v56  ;;  %v1087_v52 = vrot.slane %v1085_v47, 1  ;;  %v2071_v56 = vsel %vm1570_vm4, %v2068_v42, %v2070_v50  ;;  %v2277_v42 = vshrl.u32 %v4071_v8, 16  ;;  %v1391_v47 = vshll.u32 %v3727_v41, 16 }
  0xe4   : > { %3149 = vmatprep.mubr.msk.bf16.mxu1 %vm3742_vm1, %v3741_v1  ;;  %3313 = vmatprep.mubr.msk.bf16.mxu0 %vm3742_vm1, %v3741_v1 }
  0xe5   : > { %v1088_v58 = vsel %vm738_vm3, %v1083_v48, %v1087_v52  ;;  %v1091_v32 = vor.u32 %v1089_v60, %v1087_v52  ;;  %v2279_v50 = vrot.slane %v2277_v42, 1  ;;  %v1389_v52 = vor.u32 %v1387_v44, %v1385_v39 }
  0xe6   : > { %v1393_v53 = vrot.slane %v1391_v47, 1 }
  0xe7   : > { %v1096_v10 = vsel %vm738_vm3, %v1091_v32, %v1095_v33  ;;  %v2295_v32 = vshrl.u32 %v4099_v35, 16 }
  0xe8   : > { %v1394_v55 = vsel %vm738_vm3, %v1389_v52, %v1393_v53 }
  0xeb   : > { %3150 = vmatmul.mubr.msk.bf16.vlgmr.msra.gmra.mrb[0].mxu1 %vm352_vm2, %v1048_v63  ;;  %3314 = vmatmul.mubr.msk.bf16.gmra.mrb[12].mxu0 %vm352_vm2, %v2061_v6  ;;  %v2238_v63 = vrot.slane %v2236_v11, 2  ;;  %v3728_v11 = vld [vmem:[%s3822_s9 + $0x44] sm:$0xff]  }
  0xec   : > { %3153 = vmatprep.mubr.msk.bf16.mxu1 %vm3742_vm1, %v3741_v1  ;;  %3317 = vmatprep.mubr.msk.bf16.mxu0 %vm3742_vm1, %v3741_v1 }
  0xed   : > { %3376 = vmatpush3.bf16.msra.mxu1 %v3806_v4  ;;  %v2064_v4 = vrot.slane %v3722_v17, 1  ;;  %v2239_v6 = vor.u32 %v2238_v63, %v2235_v62  ;;  %v2291_v62 = vrot.slane %v2289_v54, 2 }
  0xef   : > { %v2065_v25 = vsel %vm1570_vm4, %v2062_v12, %v2064_v4  ;;  %v2067_v37 = vsel %vm1570_vm4, %v2064_v4, %v2066_v30  ;;  %v1097_v12 = vshrl.u32 %v3972_v20, 16  ;;  %v2248_v13 = vsel %vm2231_vm5, %v2239_v6, %v2247_v16 }
  0xf0   : > { %v2271_v30 = vshll.u32 %v4055_v57, 16 }
  0xf1   : > { %v1099_v17 = vor.u32 %v1097_v12, %v1095_v33  ;;  %v2298_v33 = vshll.u32 %v4099_v35, 16 }
  0xf2   : > { %v2273_v38 = vrot.slane %v2271_v30, 2 }
  0xf3   : > { %3154 = vmatmul.mubr.msk.bf16.gmra.mrb[4].mxu1 %vm352_vm2, %v1056_v51  ;;  %3318 = vmatmul.mubr.msk.bf16.gmra.mrb[16].mxu0 %vm352_vm2, %v2063_v15  ;;  %v1101_v51 = vshll.u32 %v3984_v24, 16  ;;  %v2255_v15 = vrot.slane %v2253_v9, 2  ;;  %v2300_v12 = vrot.slane %v2298_v33, 2 }
  0xf4   : > { %3157 = vmatprep.mubr.msk.bf16.mxu1 %vm3742_vm1, %v3741_v1  ;;  %3321 = vmatprep.mubr.msk.bf16.mxu0 %vm3742_vm1, %v3741_v1 }
  0xf5   : > { %v1103_v40 = vrot.slane %v1101_v51, 1  ;;  %v2256_v20 = vor.u32 %v2255_v15, %v2252_v14  ;;  %v2304_v14 = vshrl.u32 %v4112_v45, 16  ;;  %v2307_v15 = vshll.u32 %v4112_v45, 16 }
  0xf7   : > { %v1104_v4 = vsel %vm738_vm3, %v1099_v17, %v1103_v40  ;;  %v2257_v23 = vsel %vm2231_vm5, %v2247_v16, %v2256_v20  ;;  %v1403_v16 = vshrl.u32 %v3728_v11, 16 }
  0xfb   : > { %3158 = vmatmul.mubr.msk.bf16.gmra.mrb[8].mxu1 %vm352_vm2, %v1064_v59  ;;  %3322 = vmatmul.mubr.msk.bf16.gmra.mrb[20].mxu0 %vm352_vm2, %v2065_v25  ;;  %v1105_v59 = vshrl.u32 %v3984_v24, 16  ;;  %v2261_v25 = vrot.slane %v2259_v18, 1  ;;  %v2309_v18 = vrot.slane %v2307_v15, 2 }
  0xfc   : > { %3161 = vmatprep.mubr.msk.bf16.mxu1 %vm3742_vm1, %v3741_v1  ;;  %3325 = vmatprep.mubr.msk.bf16.mxu0 %vm3742_vm1, %v3741_v1 }
  0xfd   : > { %v1107_v27 = vor.u32 %v1105_v59, %v1103_v40  ;;  %v2265_v24 = vor.u32 %v2264_v26, %v2261_v25  ;;  %v2313_v59 = vshrl.u32 %v3730_v19, 16  ;;  %v2318_v25 = vrot.slane %v2316_v22, 2 }
  0xff   : > { %v2266_v36 = vsel %vm2231_vm5, %v2256_v20, %v2265_v24  ;;  %v2306_v20 = vrot.slane %v2304_v14, 1  ;;  %v2315_v45 = vrot.slane %v2313_v59, 1 }
 0x101   : > { %v2319_v26 = vor.u32 %v2318_v25, %v2315_v45 }
 0x103   : > { %3162 = vmatmul.mubr.msk.bf16.gmra.mrb[12].mxu1 %vm352_vm2, %v1072_v0  ;;  %3326 = vmatmul.mubr.msk.bf16.gmra.mrb[24].mxu0 %vm352_vm2, %v2067_v37  ;;  %v1112_v0 = vsel %vm738_vm3, %v1107_v27, %v1111_v46  ;;  %v2270_v37 = vrot.slane %v2268_v28, 1 }
 0x104   : > { %3165 = vmatprep.mubr.msk.bf16.mxu1 %vm3742_vm1, %v3741_v1  ;;  %3329 = vmatprep.mubr.msk.bf16.mxu0 %vm3742_vm1, %v3741_v1 }
 0x105   : > { %v2274_v57 = vor.u32 %v2273_v38, %v2270_v37 }
 0x10b   : > { %3166 = vmatmul.mubr.msk.bf16.gmra.mrb[16].mxu1 %vm352_vm2, %v1080_v5  ;;  %3330 = vmatmul.mubr.msk.bf16.gmra.mrb[28].mxu0 %vm352_vm2, %v2069_v49  ;;  %v2280_v5 = vshll.u32 %v4071_v8, 16  ;;  %v2275_v49 = vsel %vm2231_vm5, %v2265_v24, %v2274_v57  ;;  %v2286_v8 = vshrl.u32 %v4086_v21, 16 }
 0x10c   : > { %3169 = vmatprep.mubr.msk.bf16.mxu1 %vm3742_vm1, %v3741_v1  ;;  %3333 = vmatprep.mubr.msk.bf16.mxu0 %vm3742_vm1, %v3741_v1 }
 0x10d   : > { %v2282_v48 = vrot.slane %v2280_v5, 2  ;;  %v2288_v61 = vrot.slane %v2286_v8, 1 }
 0x10f   : > { %v2283_v34 = vor.u32 %v2282_v48, %v2279_v50  ;;  %v2292_v21 = vor.u32 %v2291_v62, %v2288_v61 }
 0x111   : > { %v2284_v60 = vsel %vm2231_vm5, %v2274_v57, %v2283_v34  ;;  %v2293_v9 = vsel %vm2231_vm5, %v2283_v34, %v2292_v21 }
 0x113   : > { %3170 = vmatmul.mubr.msk.bf16.gmra.mrb[20].mxu1 %vm352_vm2, %v1088_v58  ;;  %3334 = vmatmul.mubr.msk.bf16.gmra.mrb[32].mxu0 %vm352_vm2, %v2071_v56  ;;  %v1395_v56 = vshrl.u32 %v3727_v41, 16  ;;  %v1399_v58 = vshll.u32 %v3728_v11, 16 }
 0x114   : > { %3173 = vmatprep.mubr.msk.bf16.mxu1 %vm3742_vm1, %v3741_v1  ;;  %3339 = vmatprep.mubr.msk.bf16.mxu0 %vm3742_vm1, %v3741_v1 }
 0x115   : > { %v1397_v63 = vor.u32 %v1395_v56, %v1393_v53  ;;  %v1401_v2 = vrot.slane %v1399_v58, 1 }
 0x117   : > { %v1402_v6 = vsel %vm738_vm3, %v1397_v63, %v1401_v2  ;;  %v1405_v51 = vor.u32 %v1403_v16, %v1401_v2 }
 0x11b   : > { %3174 = vmatmul.mubr.msk.bf16.gmra.mrb[24].mxu1 %vm352_vm2, %v1096_v10  ;;  %3340 = vmatmul.mubr.msk.bf16.vlgmr.msra.gmra.mrb[0].mxu0 %vm352_vm2, %v2248_v13  ;;  %v2297_v10 = vrot.slane %v2295_v32, 1  ;;  %v1409_v13 = vrot.slane %v1407_v7, 1 }
 0x11c   : > { %3177 = vmatprep.mubr.msk.bf16.mxu1 %vm3742_vm1, %v3741_v1  ;;  %3343 = vmatprep.mubr.msk.bf16.mxu0 %vm3742_vm1, %v3741_v1 }
 0x11d   : > { %v2301_v35 = vor.u32 %v2300_v12, %v2297_v10  ;;  %v1410_v17 = vsel %vm738_vm3, %v1405_v51, %v1409_v13 }
 0x11f   : > { %v2302_v40 = vsel %vm2231_vm5, %v2292_v21, %v2301_v35 }
 0x123   : > { %3178 = vmatmul.mubr.msk.bf16.gmra.mrb[28].mxu1 %vm352_vm2, %v1104_v4  ;;  %3344 = vmatmul.mubr.msk.bf16.gmra.mrb[4].mxu0 %vm352_vm2, %v2257_v23  ;;  %v2310_v4 = vor.u32 %v2309_v18, %v2306_v20 }
 0x124   : > { %3181 = vmatprep.mubr.msk.bf16.mxu1 %vm3742_vm1, %v3741_v1  ;;  %3347 = vmatprep.mubr.msk.bf16.mxu0 %vm3742_vm1, %v3741_v1 }
 0x125   : > { %v2311_v23 = vsel %vm2231_vm5, %v2301_v35, %v2310_v4  ;;  %v2320_v27 = vsel %vm2231_vm5, %v2310_v4, %v2319_v26 }
 0x12b   : > { %3182 = vmatmul.mubr.msk.bf16.gmra.mrb[32].mxu1 %vm352_vm2, %v1112_v0  ;;  %3348 = vmatmul.mubr.msk.bf16.gmra.mrb[8].mxu0 %vm352_vm2, %v2266_v36 }
 0x12c   : > { %3207 = vmatprep.mubr.msk.bf16.mxu1 %vm3742_vm1, %v3741_v1  ;;  %3351 = vmatprep.mubr.msk.bf16.mxu0 %vm3742_vm1, %v3741_v1 }
 0x133   : > { %3208 = vmatmul.mubr.msk.bf16.vlgmr.msra.gmra.mrb[20].mxu1 %vm352_vm2, %v1386_v43  ;;  %3352 = vmatmul.mubr.msk.bf16.gmra.mrb[12].mxu0 %vm352_vm2, %v2275_v49 }
 0x134   : > { %3211 = vmatprep.mubr.msk.bf16.mxu1 %vm3742_vm1, %v3741_v1  ;;  %3355 = vmatprep.mubr.msk.bf16.mxu0 %vm3742_vm1, %v3741_v1 }
 0x13b   : > { %3212 = vmatmul.mubr.msk.bf16.gmra.mrb[24].mxu1 %vm352_vm2, %v1394_v55  ;;  %3356 = vmatmul.mubr.msk.bf16.gmra.mrb[16].mxu0 %vm352_vm2, %v2284_v60 }
 0x13c   : > { %3215 = vmatprep.mubr.msk.bf16.mxu1 %vm3742_vm1, %v3741_v1  ;;  %3359 = vmatprep.mubr.msk.bf16.mxu0 %vm3742_vm1, %v3741_v1 }
 0x143   : > { %3216 = vmatmul.mubr.msk.bf16.gmra.mrb[28].mxu1 %vm352_vm2, %v1402_v6  ;;  %3360 = vmatmul.mubr.msk.bf16.gmra.mrb[20].mxu0 %vm352_vm2, %v2293_v9 }
 0x144   : > { %3219 = vmatprep.mubr.msk.bf16.mxu1 %vm3742_vm1, %v3741_v1  ;;  %3363 = vmatprep.mubr.msk.bf16.mxu0 %vm3742_vm1, %v3741_v1 }
 0x14b   : > { %3220 = vmatmul.mubr.msk.bf16.gmra.mrb[32].mxu1 %vm352_vm2, %v1410_v17  ;;  %3364 = vmatmul.mubr.msk.bf16.gmra.mrb[24].mxu0 %vm352_vm2, %v2302_v40 }
 0x14c   : > { %3367 = vmatprep.mubr.msk.bf16.mxu0 %vm3742_vm1, %v3741_v1 }
 0x153   : > { %3368 = vmatmul.mubr.msk.bf16.gmra.mrb[28].mxu0 %vm352_vm2, %v2311_v23 }
 0x154   : > { %3371 = vmatprep.mubr.msk.bf16.mxu0 %vm3742_vm1, %v3741_v1 }
 0x15b   : > { %3372 = vmatmul.mubr.msk.bf16.gmra.mrb[32].mxu0 %vm352_vm2, %v2320_v27 }
 0x1be   : > { %v1177_v46 = vpop.f32.mrb[0].mxu1 }
 0x1bf   : > { %v3151_v29 = vpop.f32.mrb[1].mxu1 }
 0x1c0   : > { %v1180_v24 = vpop.f32.mrb[2].mxu1 }
 0x1c1   : > { %v3152_v28 = vpop.f32.mrb[3].mxu1 }
 0x1c6   : > { %v1185_v30 = vpop.f32.mrb[4].mxu1 }
 0x1c7   : > { %v3155_v0 = vpop.f32.mrb[5].mxu1 }
 0x1c8   : > { %v1188_v31 = vpop.f32.mrb[6].mxu1 }
 0x1c9   : > { %v3156_v36 = vpop.f32.mrb[7].mxu1 }
 0x1ce   : > { %v1193_v37 = vpop.f32.mrb[8].mxu1 }
 0x1cf   : > { %v3159_v38 = vpop.f32.mrb[9].mxu1 }
 0x1d0   : > { %v1196_v39 = vpop.f32.mrb[10].mxu1 }
 0x1d1   : > { %v3160_v41 = vpop.f32.mrb[11].mxu1 }
 0x1d6   : > { %v1201_v57 = vpop.f32.mrb[12].mxu1 }
 0x1d7   : > { %v3163_v1 = vpop.f32.mrb[13].mxu1 }
 0x1d8   : > { %v1204_v42 = vpop.f32.mrb[14].mxu1 }
 0x1d9   : > { %v3164_v5 = vpop.f32.mrb[15].mxu1 }
 0x1de   : > { %v1209_v43 = vpop.f32.mrb[16].mxu1 }
 0x1df   : > { %v3167_v44 = vpop.f32.mrb[17].mxu1 }
 0x1e0   : > { %v1212_v47 = vpop.f32.mrb[18].mxu1 }
 0x1e1   : > { %v3168_v49 = vpop.f32.mrb[19].mxu1 }
 0x1ee   : > { %v2385_v50 = vpop.f32.mrb[0].mxu0 }
 0x1ef   : > { %v4338_v48 = vadd.f32 %v2385_v50, %v1177_v46  ;;  %v3341_v52 = vpop.f32.mrb[1].mxu0 }
 0x1f0   : > { %v2388_v53 = vpop.f32.mrb[2].mxu0 }
 0x1f1   : > { %2474 = vst [vmem:[%s4336_s7] sm:$0xff] %v4338_v48  ;;  %v4342_v11 = vadd.f32 %v2388_v53, %v1180_v24  ;;  %v3342_v34 = vpop.f32.mrb[3].mxu0 }
 0x1f3   : > { %2475 = vst [vmem:[%s4336_s7 + $0x8] sm:$0xff] %v4342_v11 }
 0x1f6   : > { %v2393_v8 = vpop.f32.mrb[4].mxu0 }
 0x1f7   : > { %v4346_v54 = vadd.f32 %v2393_v8, %v1185_v30  ;;  %v3345_v55 = vpop.f32.mrb[5].mxu0 }
 0x1f8   : > { %v2396_v56 = vpop.f32.mrb[6].mxu0 }
 0x1f9   : > { %2476 = vst [vmem:[%s4336_s7 + $0x10] sm:$0xff] %v4346_v54  ;;  %v4350_v58 = vadd.f32 %v2396_v56, %v1188_v31  ;;  %v3346_v60 = vpop.f32.mrb[7].mxu0  ;;  %v3743_v56 = vmov (!%p2940_p4), 0.0  }
 0x1fa   : > { %2496 = vst [vmem:[%s4527_s5] sm:$0x1] (!%p2940_p4), %v3743_v56  ;;  %2497 = vst [vmem:[%s4528_s6] sm:$0x1] (!%p2940_p4), %v3743_v56 }
 0x1fb   : > { %2477 = vst [vmem:[%s4336_s7 + $0x18] sm:$0xff] %v4350_v58 }
 0x1fe   : > { %v2401_v61 = vpop.f32.mrb[8].mxu0 }
 0x1ff   : > { %v4354_v62 = vadd.f32 %v2401_v61, %v1193_v37  ;;  %v3349_v63 = vpop.f32.mrb[9].mxu0 }
 0x200   : > { %v2404_v2 = vpop.f32.mrb[10].mxu0 }
 0x201   : > { %2478 = vst [vmem:[%s4336_s7 + $0x20] sm:$0xff] %v4354_v62  ;;  %v4358_v3 = vadd.f32 %v2404_v2, %v1196_v39  ;;  %v3350_v21 = vpop.f32.mrb[11].mxu0 }
 0x203   : > { %2479 = vst [vmem:[%s4336_s7 + $0x28] sm:$0xff] %v4358_v3 }
 0x206   : > { %v1515_v32 = vpop.f32.mrb[20].mxu1  ;;  %v2409_v33 = vpop.f32.mrb[12].mxu0 }
 0x207   : > { %v3209_v6 = vpop.f32.mrb[21].mxu1  ;;  %v4362_v16 = vadd.f32 %v2409_v33, %v1201_v57  ;;  %v3353_v7 = vpop.f32.mrb[13].mxu0 }
 0x208   : > { %v1518_v9 = vpop.f32.mrb[22].mxu1  ;;  %v2412_v10 = vpop.f32.mrb[14].mxu0 }
 0x209   : > { %v3210_v12 = vpop.f32.mrb[23].mxu1  ;;  %2480 = vst [vmem:[%s4336_s7 + $0x30] sm:$0xff] %v4362_v16  ;;  %v4366_v51 = vadd.f32 %v2412_v10, %v1204_v42  ;;  %v3354_v13 = vpop.f32.mrb[15].mxu0 }
 0x20b   : > { %2481 = vst [vmem:[%s4336_s7 + $0x38] sm:$0xff] %v4366_v51 }
 0x20e   : > { %v1523_v35 = vpop.f32.mrb[24].mxu1  ;;  %v2417_v14 = vpop.f32.mrb[16].mxu0 }
 0x20f   : > { %v3213_v15 = vpop.f32.mrb[25].mxu1  ;;  %v4370_v17 = vadd.f32 %v2417_v14, %v1209_v43  ;;  %v3357_v40 = vpop.f32.mrb[17].mxu0 }
 0x210   : > { %v1526_v20 = vpop.f32.mrb[26].mxu1  ;;  %v2420_v18 = vpop.f32.mrb[18].mxu0 }
 0x211   : > { %v3214_v19 = vpop.f32.mrb[27].mxu1  ;;  %2482 = vst [vmem:[%s4336_s7 + $0x40] sm:$0xff] %v4370_v17  ;;  %v4374_v4 = vadd.f32 %v2420_v18, %v1212_v47  ;;  %v3358_v59 = vpop.f32.mrb[19].mxu0 }
 0x213   : > { %2483 = vst [vmem:[%s4336_s7 + $0x48] sm:$0xff] %v4374_v4 }
 0x216   : > { %v1531_v22 = vpop.f32.mrb[28].mxu1  ;;  %v2425_v23 = vpop.f32.mrb[20].mxu0 }
 0x217   : > { %v3217_v45 = vpop.f32.mrb[29].mxu1  ;;  %v4378_v25 = vadd.f32 %v2425_v23, %v1515_v32  ;;  %v3361_v26 = vpop.f32.mrb[21].mxu0 }
 0x218   : > { %v1534_v27 = vpop.f32.mrb[30].mxu1  ;;  %v2428_v46 = vpop.f32.mrb[22].mxu0 }
 0x219   : > { %v3218_v29 = vpop.f32.mrb[31].mxu1  ;;  %2484 = vst [vmem:[%s4336_s7 + $0x50] sm:$0xff] %v4378_v25  ;;  %v4382_v24 = vadd.f32 %v2428_v46, %v1518_v9  ;;  %v3362_v28 = vpop.f32.mrb[23].mxu0 }
 0x21b   : > { %2485 = vst [vmem:[%s4336_s7 + $0x58] sm:$0xff] %v4382_v24 }
 0x21e   : > { %v1539_v30 = vpop.f32.mrb[32].mxu1  ;;  %v2433_v0 = vpop.f32.mrb[24].mxu0 }
 0x21f   : > { %v3221_v31 = vpop.f32.mrb[33].mxu1  ;;  %v4386_v36 = vadd.f32 %v2433_v0, %v1523_v35  ;;  %v3365_v37 = vpop.f32.mrb[25].mxu0 }
 0x220   : > { %v1542_v38 = vpop.f32.mrb[34].mxu1  ;;  %v2436_v39 = vpop.f32.mrb[26].mxu0 }
 0x221   : > { %v3222_v41 = vpop.f32.mrb[35].mxu1  ;;  %2486 = vst [vmem:[%s4336_s7 + $0x60] sm:$0xff] %v4386_v36  ;;  %v4390_v57 = vadd.f32 %v2436_v39, %v1526_v20  ;;  %v3366_v1 = vpop.f32.mrb[27].mxu0 }
 0x223   : > { %2487 = vst [vmem:[%s4336_s7 + $0x68] sm:$0xff] %v4390_v57 }
 0x226   : > { %v2441_v42 = vpop.f32.mrb[28].mxu0 }
 0x227   : > { %v4394_v5 = vadd.f32 %v2441_v42, %v1531_v22  ;;  %v3369_v43 = vpop.f32.mrb[29].mxu0 }
 0x228   : > { %v2444_v44 = vpop.f32.mrb[30].mxu0 }
 0x229   : > { %2488 = vst [vmem:[%s4336_s7 + $0x70] sm:$0xff] %v4394_v5  ;;  %v4398_v47 = vadd.f32 %v2444_v44, %v1534_v27  ;;  %v3370_v49 = vpop.f32.mrb[31].mxu0 }
 0x22b   : > { %2489 = vst [vmem:[%s4336_s7 + $0x78] sm:$0xff] %v4398_v47 }
 0x22d   : > { %2495 = sbr.rel (%p2940_p4) target bundleno = 564 (0x234), region = 40 }
 0x22e   : > { %v2449_v50 = vpop.f32.mrb[32].mxu0 }
 0x22f   : > { %v4402_v52 = vadd.f32 %v2449_v50, %v1539_v30  ;;  %v3373_v53 = vpop.f32.mrb[33].mxu0 }
 0x230   : > { %v2452_v34 = vpop.f32.mrb[34].mxu0 }
 0x231   : > { %2490 = vst [vmem:[%s4336_s7 + $0x80] sm:$0xff] %v4402_v52  ;;  %v4406_v8 = vadd.f32 %v2452_v34, %v1542_v38  ;;  %v3374_v55 = vpop.f32.mrb[35].mxu0 }
 0x233   : > { %2491 = vst [vmem:[%s4336_s7 + $0x88] sm:$0xff] %v4406_v8 }
 0x234 PF: > { %v2500_v60 = vld [vmem:[%s4525_s3 + $0x10] sm:$0xff]  ;;  %v2498_v61 = vld [vmem:[%s4525_s3] sm:$0xff]  ;;  %v3744_v63 = vmov 0   ;;  %v2501_v2 = vld [vmem:[%s4525_s3 + $0x18] sm:$0xff] }
 0x235   : > { %3732 = vset.pattern.permute.xlu1 %v3744_v63  ;;  %3731 = vset.pattern.permute.xlu0 %v3744_v63  ;;  %v2499_v21 = vld [vmem:[%s4525_s3 + $0x8] sm:$0xff]  ;;  %v2502_v33 = vld [vmem:[%s4525_s3 + $0x20] sm:$0xff]  ;;  %v2505_v6 = vld [vmem:[%s4525_s3 + $0x38] sm:$0xff] }
 0x236   : > { %2528 = vperm.xlu1 %3732, %v2500_v60   ;;  %2518 = vperm.xlu0 %3731, %v2498_v61   ;;  %v2503_v32 = vld [vmem:[%s4525_s3 + $0x28] sm:$0xff]  ;;  %v2504_v7 = vld [vmem:[%s4525_s3 + $0x30] sm:$0xff]  ;;  %v2506_v10 = vld [vmem:[%s4525_s3 + $0x40] sm:$0xff] }
 0x237   : > { %v2507_v9 = vld [vmem:[%s4525_s3 + $0x48] sm:$0xff]  ;;  %v2509_v12 = vld [vmem:[%s4525_s3 + $0x58] sm:$0xff]  ;;  %v2508_v13 = vld [vmem:[%s4525_s3 + $0x50] sm:$0xff] }
 0x238   : > { %v2511_v35 = vld [vmem:[%s4525_s3 + $0x68] sm:$0xff]  ;;  %v2510_v14 = vld [vmem:[%s4525_s3 + $0x60] sm:$0xff]  ;;  %v2513_v15 = vld [vmem:[%s4525_s3 + $0x78] sm:$0xff] }
 0x239   : > { %v2512_v40 = vld [vmem:[%s4525_s3 + $0x70] sm:$0xff]  ;;  %v2515_v20 = vld [vmem:[%s4525_s3 + $0x88] sm:$0xff]  ;;  %v2514_v18 = vld [vmem:[%s4525_s3 + $0x80] sm:$0xff] }
 0x23a   : > { %2533 = vperm.xlu1 %3732, %v2501_v2   ;;  %2523 = vperm.xlu0 %3731, %v2499_v21  }
 0x23e   : > { %2543 = vperm.xlu1 %3732, %v2503_v32   ;;  %2538 = vperm.xlu0 %3731, %v2502_v33  }
 0x242   : > { %2553 = vperm.xlu1 %3732, %v2505_v6   ;;  %2548 = vperm.xlu0 %3731, %v2504_v7  }
 0x246   : > { %2563 = vperm.xlu1 %3732, %v2507_v9   ;;  %2558 = vperm.xlu0 %3731, %v2506_v10  }
 0x24a   : > { %2573 = vperm.xlu1 %3732, %v2509_v12   ;;  %2568 = vperm.xlu0 %3731, %v2508_v13  }
 0x24e   : > { %2583 = vperm.xlu1 %3732, %v2511_v35   ;;  %2578 = vperm.xlu0 %3731, %v2510_v14  }
 0x252   : > { %2593 = vperm.xlu1 %3732, %v2513_v15   ;;  %2588 = vperm.xlu0 %3731, %v2512_v40  }
 0x256   : > { %2603 = vperm.xlu1 %3732, %v2515_v20   ;;  %2598 = vperm.xlu0 %3731, %v2514_v18  }
 0x2b5   : > { %v2529_v19 = vpop.permute.xlu1 %2528  ;;  %v2519_v59 = vpop.permute.xlu0 %2518 }
 0x2b6   : > { %v2606_v22 = vmul.f32 %v4338_v48, %v2519_v59  ;;  %v2608_v26 = vmul.f32 %v4346_v54, %v2529_v19 }
 0x2b8   : > { %v2651_v46 = vmul.f32 %v4338_v48, %v2606_v22  ;;  %v2653_v37 = vmul.f32 %v4346_v54, %v2608_v26 }
 0x2b9   : > { %v2534_v23 = vpop.permute.xlu1 %2533  ;;  %v2524_v45 = vpop.permute.xlu0 %2523 }
 0x2ba   : > { %v2607_v27 = vmul.f32 %v4342_v11, %v2524_v45  ;;  %v2609_v29 = vmul.f32 %v4350_v58, %v2534_v23 }
 0x2bc   : > { %v2625_v28 = vadd.f32 %v2607_v27, %v2606_v22  ;;  %v2652_v30 = vmul.f32 %v4342_v11, %v2607_v27  ;;  %v2654_v1 = vmul.f32 %v4350_v58, %v2609_v29 }
 0x2bd   : > { %v2544_v0 = vpop.permute.xlu1 %2543  ;;  %v2539_v31 = vpop.permute.xlu0 %2538 }
 0x2be   : > { %v2626_v38 = vadd.f32 %v2625_v28, %v2608_v26  ;;  %v2669_v39 = vadd.f32 %v2652_v30, %v2651_v46  ;;  %v2610_v41 = vmul.f32 %v4354_v62, %v2539_v31  ;;  %v2611_v43 = vmul.f32 %v4358_v3, %v2544_v0 }
 0x2c0   : > { %v2670_v42 = vadd.f32 %v2669_v39, %v2653_v37  ;;  %v2627_v44 = vadd.f32 %v2626_v38, %v2609_v29  ;;  %v2655_v11 = vmul.f32 %v4354_v62, %v2610_v41  ;;  %v2656_v54 = vmul.f32 %v4358_v3, %v2611_v43 }
 0x2c1   : > { %v2554_v48 = vpop.permute.xlu1 %2553  ;;  %v2549_v49 = vpop.permute.xlu0 %2548 }
 0x2c2   : > { %v2671_v50 = vadd.f32 %v2670_v42, %v2654_v1  ;;  %v2628_v53 = vadd.f32 %v2627_v44, %v2610_v41  ;;  %v2612_v34 = vmul.f32 %v4362_v16, %v2549_v49  ;;  %v2613_v56 = vmul.f32 %v4366_v51, %v2554_v48 }
 0x2c4   : > { %v2672_v55 = vadd.f32 %v2671_v50, %v2655_v11  ;;  %v2629_v60 = vadd.f32 %v2628_v53, %v2611_v43  ;;  %v2657_v21 = vmul.f32 %v4362_v16, %v2612_v34  ;;  %v2658_v33 = vmul.f32 %v4366_v51, %v2613_v56 }
 0x2c5   : > { %v2564_v61 = vpop.permute.xlu1 %2563  ;;  %v2559_v58 = vpop.permute.xlu0 %2558 }
 0x2c6   : > { %v2673_v63 = vadd.f32 %v2672_v55, %v2656_v54  ;;  %v2630_v2 = vadd.f32 %v2629_v60, %v2612_v34  ;;  %v2614_v32 = vmul.f32 %v4370_v17, %v2559_v58  ;;  %v2615_v62 = vmul.f32 %v4374_v4, %v2564_v61 }
 0x2c8   : > { %v2674_v6 = vadd.f32 %v2673_v63, %v2657_v21  ;;  %v2631_v7 = vadd.f32 %v2630_v2, %v2613_v56  ;;  %v2659_v13 = vmul.f32 %v4370_v17, %v2614_v32  ;;  %v2660_v14 = vmul.f32 %v4374_v4, %v2615_v62  ;;  %v2624_v21 = vld [vmem:[%s4527_s5] sm:$0x1] }
 0x2c9   : > { %v2574_v9 = vpop.permute.xlu1 %2573  ;;  %v2569_v3 = vpop.permute.xlu0 %2568 }
 0x2ca   : > { %v2675_v10 = vadd.f32 %v2674_v6, %v2658_v33  ;;  %v2632_v12 = vadd.f32 %v2631_v7, %v2614_v32  ;;  %v2616_v35 = vmul.f32 %v4378_v25, %v2569_v3  ;;  %v2617_v16 = vmul.f32 %v4382_v24, %v2574_v9 }
 0x2cc   : > { %v2676_v15 = vadd.f32 %v2675_v10, %v2659_v13  ;;  %v2633_v40 = vadd.f32 %v2632_v12, %v2615_v62  ;;  %v2661_v59 = vmul.f32 %v4378_v25, %v2616_v35  ;;  %v2662_v23 = vmul.f32 %v4382_v24, %v2617_v16 }
 0x2cd   : > { %v2584_v20 = vpop.permute.xlu1 %2583  ;;  %v2579_v51 = vpop.permute.xlu0 %2578 }
 0x2ce   : > { %v2677_v18 = vadd.f32 %v2676_v15, %v2660_v14  ;;  %v2634_v19 = vadd.f32 %v2633_v40, %v2616_v35  ;;  %v2618_v22 = vmul.f32 %v4386_v36, %v2579_v51  ;;  %v2619_v17 = vmul.f32 %v4390_v57, %v2584_v20 }
 0x2d0   : > { %v2678_v45 = vadd.f32 %v2677_v18, %v2661_v59  ;;  %v2635_v26 = vadd.f32 %v2634_v19, %v2617_v16  ;;  %v2663_v28 = vmul.f32 %v4386_v36, %v2618_v22  ;;  %v2664_v0 = vmul.f32 %v4390_v57, %v2619_v17 }
 0x2d1   : > { %v2594_v27 = vpop.permute.xlu1 %2593  ;;  %v2589_v4 = vpop.permute.xlu0 %2588 }
 0x2d2   : > { %v2679_v46 = vadd.f32 %v2678_v45, %v2662_v23  ;;  %v2636_v29 = vadd.f32 %v2635_v26, %v2618_v22  ;;  %v2620_v30 = vmul.f32 %v4394_v5, %v2589_v4  ;;  %v2621_v25 = vmul.f32 %v4398_v47, %v2594_v27 }
 0x2d4   : > { %v2680_v31 = vadd.f32 %v2679_v46, %v2663_v28  ;;  %v2637_v37 = vadd.f32 %v2636_v29, %v2619_v17  ;;  %v2665_v1 = vmul.f32 %v4394_v5, %v2620_v30  ;;  %v2666_v43 = vmul.f32 %v4398_v47, %v2621_v25 }
 0x2d5   : > { %v2604_v38 = vpop.permute.xlu1 %2603  ;;  %v2599_v24 = vpop.permute.xlu0 %2598 }
 0x2d6   : > { %v2681_v39 = vadd.f32 %v2680_v31, %v2664_v0  ;;  %v2638_v41 = vadd.f32 %v2637_v37, %v2620_v30  ;;  %v2622_v42 = vmul.f32 %v4402_v52, %v2599_v24  ;;  %v2623_v36 = vmul.f32 %v4406_v8, %v2604_v38 }
 0x2d8   : > { %v2682_v44 = vadd.f32 %v2681_v39, %v2665_v1  ;;  %v2639_v48 = vadd.f32 %v2638_v41, %v2621_v25  ;;  %v2667_v50 = vmul.f32 %v4402_v52, %v2622_v42  ;;  %v2668_v53 = vmul.f32 %v4406_v8, %v2623_v36  ;;  %v2650_v8 = vld [vmem:[%s4528_s6] sm:$0x1] }
 0x2da   : > { %v2683_v49 = vadd.f32 %v2682_v44, %v2666_v43  ;;  %v2640_v57 = vadd.f32 %v2639_v48, %v2622_v42 }
 0x2dc   : > { %v2641_v11 = vadd.f32 %v2640_v57, %v2623_v36  ;;  %v2684_v34 = vadd.f32 %v2683_v49, %v2667_v50 }
 0x2de   : > { %v2642_v54 = vrot.slane %v2641_v11, 4  ;;  %v2685_v55 = vadd.f32 %v2684_v34, %v2668_v53 }
 0x2e0   : > { %v2643_v56 = vadd.f32 %v2642_v54, %v2641_v11  ;;  %v2686_v5 = vrot.slane %v2685_v55, 4 }
 0x2e2   : > { %v2644_v60 = vrot.slane %v2643_v56, 2  ;;  %v2687_v61 = vadd.f32 %v2686_v5, %v2685_v55 }
 0x2e4   : > { %v2645_v58 = vadd.f32 %v2644_v60, %v2643_v56  ;;  %v2688_v47 = vrot.slane %v2687_v61, 2 }
 0x2e6   : > { %v2646_v63 = vrot.slane %v2645_v58, 1  ;;  %v2689_v2 = vadd.f32 %v2688_v47, %v2687_v61 }
 0x2e8   : > { %v2647_v32 = vadd.f32 %v2646_v63, %v2645_v58  ;;  %v2690_v52 = vrot.slane %v2689_v2, 1 }
 0x2ea   : > { %v2648_v33 = vadd.f32 %v2647_v32, %v2624_v21  ;;  %v2691_v6 = vadd.f32 %v2690_v52, %v2689_v2 }
 0x2ec   : > { %2649 = vst [vmem:[%s4527_s5] sm:$0x1] %v2648_v33  ;;  %v2692_v62 = vadd.f32 %v2691_v6, %v2650_v8 }
 0x2ee   : > { %2693 = vst [vmem:[%s4528_s6] sm:$0x1] %v2692_v62 }
 0x2ef PF: > { %s17_s21 = sadd.s32 1, %s3739_s21  }
 0x2f0   : > { %p14_p5 = scmp.ge.s32.totalorder %s17_s21, 4  }
 0x2f2   :  { %16 = sbr.rel (!%p14_p5) target bundleno = 1 (0x1), region = 97 }

// kernel: a_call__.6
= control target key start
LH: loop header
LB: loop body
LE: loop exit
PB: predicated region body
PF: predicated region fallthrough
CT: control target
= control target key end

     0   :  { %s2638_s30 = smov 0   ;;  %s3271_s0 = inlined_call_operand.vmem [shape: bf16[2,102,8], index: 0, kind: input, shape index: {}]   ;;  %s3272_s1 = inlined_call_operand.vmem [shape: bf16[9,8,128], index: 1, kind: input, shape index: {}]   ;;  %s3273_s2 = inlined_call_operand.vmem [shape: f32[80,1], index: 2, kind: input, shape index: {}]   ;;  %s3274_s3 = inlined_call_operand.vmem [shape: bf16[2,80,4], index: 3, kind: input, shape index: {}]   ;;  %s3275_s4 = inlined_call_operand.vmem [shape: bf16[4,128], index: 4, kind: input, shape index: {}]   ;;  %s3276_s5 = inlined_call_operand.vmem [shape: f32[2,80,128], index: 5, kind: output, shape index: {0}]   ;;  %s3277_s6 = inlined_call_operand.vmem [shape: f32[1,128], index: 6, kind: output, shape index: {1}]   ;;  %s3278_s7 = inlined_call_operand.vmem [shape: f32[1,128], index: 7, kind: output, shape index: {2}]   ;;  %s3279_s8 = inlined_call_operand.vmem [shape: f32[1,128], index: 8, kind: output, shape index: {3}]   ;;  %s3280_s9 = inlined_call_operand.vmem [shape: f32[1,128], index: 9, kind: output, shape index: {4}]  }
   0x1 LB: > { %s2644_s10 = sadd.s32 4294967295, %s2582_s30   ;;  %p2008_p0 = scmp.ge.s32.totalorder %s2582_s30, 1  ;;  %s2582_s30 = sphi %s2638_s30, %s20_s30  }
   0x2   : > { %p286_p1 = scmp.lt.s32.totalorder %s2582_s30, 3 }
   0x4   : > { %p287_p2 = pnand %p2008_p0, %p286_p1 }
   0x5   : > { %vm446_vm0 = vcmask (!%p287_p2), 1043456   ;;  %v2048_v0 = vld [vmem:[%s3272_s1 + $0x10] sm:$0xf] (!%p287_p2)  ;;  %v2012_v1 = vld [vmem:[%s3272_s1 + $0x4] sm:$0xf] (!%p287_p2)  ;;  %v2584_v2 = vmov (!%p287_p2), 0.0  }
   0x6   : > { %290 = sbr.rel (%p287_p2) target bundleno = 711 (0x2c7), region = 40  ;;  %2249 = vmatprep.subr.bf16.mxu0 (!%p287_p2), %v2584_v2  ;;  %2161 = vmatprep.subr.bf16.mxu1 (!%p287_p2), %v2584_v2  ;;  %v957_v3 = vsel (!%p287_p2), %vm446_vm0, %v2048_v0, 0  ;;  %v448_v4 = vsel (!%p287_p2), %vm446_vm0, %v2012_v1, 0  ;;  %p327_p3 = scmp.lt.s32.totalorder (!%p287_p2), %s2644_s10, 1  ;;  %vm2585_vm1 = vmmov (!%p287_p2), 0   ;;  %vm430_vm4 = vcmask (!%p287_p2), 64512  }
   0x7   : > { %2250 = vmatpush3.bf16.msra.mxu0 (!%p287_p2), %v957_v3  ;;  %2162 = vmatpush3.bf16.msra.mxu1 (!%p287_p2), %v448_v4  ;;  %vm385_vm2 = vsmask.f32 (!%p287_p2), 7424  ;;  %vm887_vm3 = vsmask.f32 (!%p287_p2), 6400  ;;  %v353_v16 = vld [vmem:[%s3272_s1] sm:$0xf] (!%p287_p2) }
   0x8   : > { %2163 = vmatprep.mubr.msk.bf16.mxu1 (!%p287_p2), %vm2585_vm1, %v2584_v2  ;;  %2251 = vmatprep.mubr.msk.bf16.mxu0 (!%p287_p2), %vm2585_vm1, %v2584_v2  ;;  %v2055_v24 = vld [vmem:[%s3272_s1 + $0x14] sm:$0xf] (!%p287_p2)  ;;  %v534_v34 = vsel (!%p287_p2), %vm446_vm0, %v353_v16, 0  ;;  %vm1048_vm5 = vcmask (!%p287_p2), 1045504   ;;  %vm615_vm6 = vcmask (!%p287_p2), 1046528   ;;  %vm1481_vm7 = vcmask (!%p287_p2), 1044480  }
   0x9   : > { %2271 = vmatprep.subr.bf16.mxu0 (!%p287_p2), %v2584_v2  ;;  %2183 = vmatprep.subr.bf16.mxu1 (!%p287_p2), %v2584_v2  ;;  %v1076_v41 = vsel (!%p287_p2), %vm446_vm0, %v2055_v24, 0  ;;  %vm1320_vm8 = vsmask.f32 (!%p287_p2), 5376  ;;  %p2088_p4 = scmp.ne.s32.totalorder (!%p287_p2), %s2644_s10, 0 }
   0xd   : > { %s2664_s15 = scalar_select %p327_p3, %s2644_s10, 1 }
   0xf   : > { %s2531_s16 = smul.u32 52, %s2664_s15 }
  0x10   : > { %s2532_s17 = smul.u32 40, %s2664_s15 }
  0x11   : > { %s2673_s20 = scalar_lea.vmem %s3271_s0, %s2531_s16 }
  0x12   : > { %s2678_s23 = scalar_lea.vmem %s3274_s3, %s2532_s17  ;;  %v343_v5 = vld [vmem:[%s2673_s20] sm:$0xf]  ;;  %v2682_v6 = vld [vmem:[%s2673_s20 + $0x4] sm:$0xf]  ;;  %v2688_v8 = vld [vmem:[%s2673_s20 + $0x8] sm:$0xff]  }
  0x13   : > { %v2685_v7 = vcombine.low %v343_v5, %v2682_v6  ;;  %v728_v9 = vld [vmem:[%s2673_s20 + $0x4] sm:$0xe]  ;;  %v2692_v10 = vld [vmem:[%s2673_s20 + $0x8] sm:$0xf]  ;;  %v394_v13 = vshll.u32 %v2688_v8, 16  ;;  %v2701_v15 = vld [vmem:[%s2673_s20 + $0xc] sm:$0xff]  }
  0x14   : > { %v2698_v14 = vcombine.low %v728_v9, %v2692_v10  ;;  %v2707_v17 = vld [vmem:[%s2673_s20 + $0x10] sm:$0xff]   ;;  %v897_v22 = vshrl.u32 %v2701_v15, 16  ;;  %v900_v23 = vshll.u32 %v2701_v15, 16  ;;  %v398_v25 = vshrl.u32 %v2688_v8, 16  ;;  %v2726_v38 = vld [vmem:[%s2673_s20 + $0x1c] sm:$0xff]   ;;  %v2750_v54 = vld [vmem:[%s2673_s20 + $0x24] sm:$0xff]  }
  0x15   : > { %v387_v11 = vshrl.u32 %v2685_v7, 16  ;;  %v389_v12 = vshll.u32 %v2685_v7, 16  ;;  %v396_v19 = vrot.slane %v394_v13, 1  ;;  %v2718_v26 = vld [vmem:[%s2673_s20 + $0x14] sm:$0xff]   ;;  %v402_v30 = vshll.u32 %v2707_v17, 16  ;;  %v2746_v53 = vld [vmem:[%s2673_s20 + $0x20] sm:$0xff]  }
  0x16   : > { %v889_v20 = vshrl.u32 %v2698_v14, 16  ;;  %v892_v21 = vshll.u32 %v2698_v14, 16  ;;  %v899_v31 = vrot.slane %v897_v22, 1  ;;  %v902_v32 = vrot.slane %v900_v23, 2  ;;  %v2733_v45 = vld [vmem:[%s2673_s20 + $0x18] sm:$0xff]   ;;  %v2762_v1 = vld [vmem:[%s2673_s20 + $0x20] sm:$0xff]  }
  0x17   : > { %v391_v18 = vrot.slane %v389_v12, 1  ;;  %v906_v33 = vshrl.u32 %v2718_v26, 16  ;;  %v909_v37 = vshll.u32 %v2718_v26, 16  ;;  %v400_v42 = vor.u32 %v398_v25, %v396_v19  ;;  %v609_v61 = vld [vmem:[%s2673_s20] sm:$0xe]  ;;  %v2769_v5 = vld [vmem:[%s2673_s20 + $0x28] sm:$0xff]  }
  0x18   : > { %v891_v28 = vrot.slane %v889_v20, 1  ;;  %v894_v29 = vrot.slane %v892_v21, 2  ;;  %v903_v39 = vor.u32 %v902_v32, %v899_v31  ;;  %v404_v43 = vrot.slane %v402_v30, 1  ;;  %v2565_v23 = vld [vmem:[%s2673_s20 + $0x30] ss:$0 sps:$4 sm:$0x33]  }
  0x19   : > { %v392_v27 = vor.u32 %v391_v18, %v387_v11  ;;  %v908_v40 = vrot.slane %v906_v33, 1  ;;  %v911_v44 = vrot.slane %v909_v37, 2  ;;  %v915_v47 = vshrl.u32 %v2726_v38, 16  ;;  %v2797_v30 = vld [vmem:[%s2673_s20 + $0x28] ss:$0 sps:$4 sm:$0x11]  }
  0x1a   : > { %v895_v36 = vor.u32 %v894_v29, %v891_v28  ;;  %v918_v48 = vshll.u32 %v2726_v38, 16  ;;  %v405_v50 = vsel %vm385_vm2, %v400_v42, %v404_v43  ;;  %v406_v51 = vshrl.u32 %v2707_v17, 16 }
  0x1b   : > { %v397_v35 = vsel %vm385_vm2, %v392_v27, %v396_v19  ;;  %v912_v49 = vor.u32 %v911_v44, %v908_v40  ;;  %v410_v52 = vshll.u32 %v2733_v45, 16  ;;  %v917_v55 = vrot.slane %v915_v47, 1 }
  0x1c   : > { %2164 = vmatmul.mubr.msk.bf16.vlgmr.msra.gmra.mrb[0].mxu1 %vm430_vm4, %v397_v35  ;;  %v904_v46 = vsel %vm887_vm3, %v895_v36, %v903_v39  ;;  %v920_v56 = vrot.slane %v918_v48, 2  ;;  %v408_v58 = vor.u32 %v406_v51, %v404_v43  ;;  %v418_v60 = vshll.u32 %v2746_v53, 16 }
  0x1d   : > { %2167 = vmatprep.mubr.msk.bf16.mxu1 %vm2585_vm1, %v2584_v2  ;;  %2184 = vmatpush3.bf16.msra.mxu1 %v534_v34  ;;  %v913_v57 = vsel %vm887_vm3, %v903_v39, %v912_v49  ;;  %v412_v59 = vrot.slane %v410_v52, 1  ;;  %v924_v62 = vshrl.u32 %v2750_v54, 16  ;;  %v927_v63 = vshll.u32 %v2750_v54, 16 }
  0x1e   : > { %2205 = vmatprep.subr.bf16.mxu1 %v2584_v2  ;;  %2252 = vmatmul.mubr.msk.bf16.vlgmr.msra.gmra.mrb[0].mxu0 %vm430_vm4, %v904_v46  ;;  %v921_v0 = vor.u32 %v920_v56, %v917_v55  ;;  %v2030_v3 = vcombine.low %v609_v61, %v2682_v6  ;;  %v617_v4 = vrot.slane %v2688_v8, 1  ;;  %v414_v11 = vshrl.u32 %v2733_v45, 16  ;;  %v2777_v6 = vld [vmem:[%s2673_s20 + $0x2c] ss:$0 sps:$4 sm:$0x33]   ;;  %v2844_v61 = vld [vmem:[%s2673_s20 + $0x10] sm:$0xff]  }
  0x1f   : > { %2272 = vmatpush3.bf16.msra.mxu0 %v1076_v41  ;;  %2255 = vmatprep.mubr.msk.bf16.mxu0 %vm2585_vm1, %v2584_v2  ;;  %v413_v9 = vsel %vm385_vm2, %v408_v58, %v412_v59  ;;  %v420_v12 = vrot.slane %v418_v60, 1  ;;  %v619_v13 = vrot.slane %v2707_v17, 1  ;;  %v926_v16 = vrot.slane %v924_v62, 1  ;;  %v2566_v46 = vld [vmem:[%s2673_s20 + $0x2c] ss:$0 sps:$4 sm:$0x11]  }
  0x20   : > { %2293 = vmatprep.subr.bf16.mxu0 %v2584_v2  ;;  %v929_v18 = vrot.slane %v927_v63, 2  ;;  %v616_v19 = vrot.slane %v2030_v3, 1  ;;  %v621_v20 = vrot.slane %v2733_v45, 1  ;;  %v922_v21 = vsel %vm887_vm3, %v912_v49, %v921_v0  ;;  %v2841_v60 = vld [vmem:[%s2673_s20 + $0xc] sm:$0xf] }
  0x21   : > { %v2780_v22 = vsel %vm615_vm6, %v617_v4, %v619_v13  ;;  %v1207_v27 = vrot.slane %v2762_v1, 2  ;;  %v1209_v28 = vrot.slane %v2769_v5, 2  ;;  %v416_v29 = vor.u32 %v414_v11, %v412_v59  ;;  %v1475_v63 = vld [vmem:[%s2673_s20 + $0x8] sm:$0x8]  ;;  %v1042_v3 = vld [vmem:[%s2673_s20 + $0x4] sm:$0xc] }
  0x22   : > { %v2785_v24 = vsel %vm615_vm6, %v616_v19, %v617_v4  ;;  %v2790_v25 = vsel %vm615_vm6, %v619_v13, %v621_v20  ;;  %v1211_v31 = vrot.slane %v2565_v23, 2  ;;  %v769_v33 = vrot.slane %v2698_v14, 1  ;;  %v2029_v19 = vld [vmem:[%s3272_s1 + $0x8] sm:$0xf] }
  0x23   : > { %v2802_v32 = vsel %vm1048_vm5, %v1207_v27, %v1209_v28  ;;  %v770_v34 = vrot.slane %v2701_v15, 1  ;;  %v930_v36 = vor.u32 %v929_v18, %v926_v16  ;;  %v933_v37 = vshrl.u32 %v2777_v6, 16  ;;  %v2863_v18 = vld [vmem:[%s2673_s20 + $0x18] sm:$0xff]  }
  0x24   : > { %2168 = vmatmul.mubr.msk.bf16.gmra.mrb[4].mxu1 %vm430_vm4, %v405_v50  ;;  %v2808_v35 = vsel %vm1048_vm5, %v1209_v28, %v1211_v31  ;;  %v936_v39 = vshll.u32 %v2777_v6, 16  ;;  %v421_v14 = vsel %vm385_vm2, %v416_v29, %v420_v12  ;;  %v422_v41 = vshrl.u32 %v2746_v53, 16  ;;  %v2062_v28 = vld [vmem:[%s3272_s1 + $0x18] sm:$0xf] }
  0x25   : > { %2171 = vmatprep.mubr.msk.bf16.mxu1 %vm2585_vm1, %v2584_v2  ;;  %v2815_v40 = vsel %vm615_vm6, %v769_v33, %v770_v34  ;;  %v426_v42 = vshll.u32 %v2797_v30, 16  ;;  %v772_v43 = vrot.slane %v2718_v26, 1  ;;  %v774_v44 = vrot.slane %v2726_v38, 1 }
  0x26   : > { %2256 = vmatmul.mubr.msk.bf16.gmra.mrb[4].mxu0 %vm430_vm4, %v913_v57  ;;  %v931_v48 = vsel %vm887_vm3, %v921_v0, %v930_v36  ;;  %v935_v49 = vrot.slane %v933_v37, 1  ;;  %v938_v50 = vrot.slane %v936_v39, 2  ;;  %v424_v52 = vor.u32 %v422_v41, %v420_v12  ;;  %v2915_v41 = vld [vmem:[%s2673_s20 + $0x30] ss:$0 sps:$4 sm:$0x77]  }
  0x27   : > { %2259 = vmatprep.mubr.msk.bf16.mxu0 %vm2585_vm1, %v2584_v2  ;;  %v2824_v47 = vsel %vm615_vm6, %v770_v34, %v772_v43  ;;  %v2829_v51 = vsel %vm615_vm6, %v772_v43, %v774_v44  ;;  %v428_v55 = vrot.slane %v426_v42, 1  ;;  %v776_v56 = vrot.slane %v2750_v54, 1 }
  0x28   : > { %v778_v57 = vrot.slane %v2566_v46, 1  ;;  %v939_v59 = vor.u32 %v938_v50, %v935_v49  ;;  %v2082_v4 = vcombine.low %v1475_v63, %v2841_v60  ;;  %v2056_v13 = vcombine.low %v1042_v3, %v2692_v10  ;;  %v2036_v49 = vld [vmem:[%s3272_s1 + $0xc] sm:$0xf] }
  0x29   : > { %v2836_v58 = vsel %vm615_vm6, %v774_v44, %v776_v56  ;;  %v429_v0 = vsel %vm385_vm2, %v424_v52, %v428_v55  ;;  %v1050_v10 = vrot.slane %v2701_v15, 2  ;;  %v1485_v23 = vrot.slane %v2863_v18, 3  ;;  %v1161_v44 = vld [vmem:[%s2673_s20 + $0x8] sm:$0xc]  ;;  %v2074_v52 = vld [vmem:[%s3272_s1 + $0x1c] sm:$0xf] }
  0x2a   : > { %v2847_v62 = vsel %vm615_vm6, %v776_v56, %v778_v57  ;;  %v1482_v11 = vrot.slane %v2082_v4, 3  ;;  %v940_v12 = vsel %vm887_vm3, %v930_v36, %v939_v59  ;;  %v643_v29 = vsel %vm446_vm0, %v2029_v19, 0  ;;  %s2533_s20 = smul.u32 80, %s2664_s15 }
  0x2b   : > { %v1229_v34 = vsel %vm446_vm0, %v2062_v28, 0  ;;  %v1052_v15 = vrot.slane %v2718_v26, 2  ;;  %v1054_v26 = vrot.slane %v2726_v38, 2  ;;  %v1489_v39 = vrot.slane %v2769_v5, 3 }
  0x2c   : > { %2172 = vmatmul.mubr.msk.bf16.gmra.mrb[8].mxu1 %vm430_vm4, %v413_v9  ;;  %v1483_v9 = vrot.slane %v2844_v61, 3  ;;  %v1056_v38 = vrot.slane %v2750_v54, 2  ;;  %v1491_v42 = vrot.slane %v2915_v41, 3  ;;  %v1058_v54 = vrot.slane %v2777_v6, 2  ;;  %s3075_s24 = scalar_lea.vmem %s3276_s5, %s2533_s20 }
  0x2d   : > { %2175 = vmatprep.mubr.msk.bf16.mxu1 %vm2585_vm1, %v2584_v2  ;;  %v1053_v37 = vsel %vm1048_vm5, %v1050_v10, %v1052_v15  ;;  %v1203_v50 = vrot.slane %v2844_v61, 2  ;;  %v796_v55 = vsel %vm446_vm0, %v2036_v49, 0  ;;  %v1390_v57 = vsel %vm446_vm0, %v2074_v52, 0 }
  0x2e   : > { %2260 = vmatmul.mubr.msk.bf16.gmra.mrb[8].mxu0 %vm430_vm4, %v922_v21  ;;  %v2860_v16 = vsel %vm1481_vm7, %v1482_v11, %v1483_v9  ;;  %v1049_v21 = vrot.slane %v2056_v13, 2  ;;  %v2878_v31 = vsel %vm1481_vm7, %v1483_v9, %v1485_v23  ;;  %v2923_v43 = vsel %vm1481_vm7, %v1489_v39, %v1491_v42  ;;  %v2081_v13 = vld [vmem:[%s3272_s1 + $0x20] sm:$0xf] }
  0x2f   : > { %2263 = vmatprep.mubr.msk.bf16.mxu0 %vm2585_vm1, %v2584_v2  ;;  %v1059_v46 = vsel %vm1048_vm5, %v1056_v38, %v1058_v54  ;;  %v1205_v59 = vrot.slane %v2863_v18, 2 }
  0x30   : > { %v1051_v33 = vsel %vm1048_vm5, %v1049_v21, %v1050_v10  ;;  %v1509_v10 = vsel %vm446_vm0, %v2081_v13, 0 }
  0x34   : > { %2176 = vmatmul.mubr.msk.bf16.gmra.mrb[12].mxu1 %vm430_vm4, %v421_v14 }
  0x35   : > { %2179 = vmatprep.mubr.msk.bf16.mxu1 %vm2585_vm1, %v2584_v2 }
  0x36   : > { %2264 = vmatmul.mubr.msk.bf16.gmra.mrb[12].mxu0 %vm430_vm4, %v931_v48  ;;  %v2063_v48 = vcombine.low %v1161_v44, %v2841_v60  ;;  %v1208_v60 = vsel %vm1048_vm5, %v1205_v59, %v1207_v27 }
  0x37   : > { %2267 = vmatprep.mubr.msk.bf16.mxu0 %vm2585_vm1, %v2584_v2 }
  0x38   : > { %v1202_v6 = vrot.slane %v2063_v48, 2  ;;  %v1325_v27 = vshll.u32 %v2063_v48, 16 }
  0x3a   : > { %v1204_v56 = vsel %vm1048_vm5, %v1202_v6, %v1203_v50  ;;  %v1327_v4 = vrot.slane %v1325_v27, 3 }
  0x3c   : > { %2180 = vmatmul.mubr.msk.bf16.gmra.mrb[16].mxu1 %vm430_vm4, %v429_v0  ;;  %v1330_v0 = vshrl.u32 %v2844_v61, 16 }
  0x3d   : > { %2185 = vmatprep.mubr.msk.bf16.mxu1 %vm2585_vm1, %v2584_v2 }
  0x3e   : > { %2268 = vmatmul.mubr.msk.bf16.gmra.mrb[16].mxu0 %vm430_vm4, %v940_v12  ;;  %v1332_v9 = vrot.slane %v1330_v0, 2  ;;  %v1342_v12 = vshll.u32 %v2863_v18, 16 }
  0x3f   : > { %2273 = vmatprep.mubr.msk.bf16.mxu0 %vm2585_vm1, %v2584_v2 }
  0x40   : > { %v1344_v21 = vrot.slane %v1342_v12, 3 }
  0x44   : > { %2186 = vmatmul.mubr.msk.bf16.vlgmr.msra.gmra.mrb[0].mxu1 %vm430_vm4, %v2685_v7  ;;  %v1487_v7 = vrot.slane %v2762_v1, 3 }
  0x45   : > { %2189 = vmatprep.mubr.msk.bf16.mxu1 %vm2585_vm1, %v2584_v2  ;;  %2206 = vmatpush3.bf16.msra.mxu1 %v643_v29 }
  0x46   : > { %2227 = vmatprep.subr.bf16.mxu1 %v2584_v2  ;;  %2274 = vmatmul.mubr.msk.bf16.vlgmr.msra.gmra.mrb[0].mxu0 %vm430_vm4, %v1051_v33  ;;  %v2894_v36 = vsel %vm1481_vm7, %v1485_v23, %v1487_v7  ;;  %v2907_v14 = vsel %vm1481_vm7, %v1487_v7, %v1489_v39  ;;  %v1348_v23 = vshrl.u32 %v2762_v1, 16  ;;  %v1366_v39 = vshrl.u32 %v2915_v41, 16 }
  0x47   : > { %2294 = vmatpush3.bf16.msra.mxu0 %v1229_v34  ;;  %2277 = vmatprep.mubr.msk.bf16.mxu0 %vm2585_vm1, %v2584_v2 }
  0x48   : > { %2315 = vmatprep.subr.bf16.mxu0 %v2584_v2  ;;  %v1350_v29 = vrot.slane %v1348_v23, 2 }
  0x4c   : > { %2190 = vmatmul.mubr.msk.bf16.gmra.mrb[4].mxu1 %vm430_vm4, %v2688_v8  ;;  %v1055_v8 = vsel %vm1048_vm5, %v1052_v15, %v1054_v26  ;;  %v1357_v15 = vshrl.u32 %v2769_v5, 16 }
  0x4d   : > { %2193 = vmatprep.mubr.msk.bf16.mxu1 %vm2585_vm1, %v2584_v2 }
  0x4e   : > { %2278 = vmatmul.mubr.msk.bf16.gmra.mrb[4].mxu0 %vm430_vm4, %v1053_v37  ;;  %v1359_v7 = vrot.slane %v1357_v15, 2  ;;  %v2586_v15 = vmov (!%p2088_p4), 0.0  }
  0x4f   : > { %2281 = vmatprep.mubr.msk.bf16.mxu0 %vm2585_vm1, %v2584_v2  ;;  %1608 = vst [vmem:[%s3277_s6] sm:$0x1] (!%p2088_p4), %v2586_v15  ;;  %1609 = vst [vmem:[%s3278_s7] sm:$0x1] (!%p2088_p4), %v2586_v15 }
  0x50   : > { %1610 = vst [vmem:[%s3279_s8] sm:$0x1] (!%p2088_p4), %v2586_v15  ;;  %1611 = vst [vmem:[%s3280_s9] sm:$0x1] (!%p2088_p4), %v2586_v15 }
  0x54   : > { %2194 = vmatmul.mubr.msk.bf16.gmra.mrb[8].mxu1 %vm430_vm4, %v2707_v17  ;;  %v1057_v17 = vsel %vm1048_vm5, %v1054_v26, %v1056_v38 }
  0x55   : > { %2197 = vmatprep.mubr.msk.bf16.mxu1 %vm2585_vm1, %v2584_v2 }
  0x56   : > { %2282 = vmatmul.mubr.msk.bf16.gmra.mrb[8].mxu0 %vm430_vm4, %v1055_v8  ;;  %v1368_v8 = vrot.slane %v1366_v39, 2 }
  0x57   : > { %2285 = vmatprep.mubr.msk.bf16.mxu0 %vm2585_vm1, %v2584_v2 }
  0x5c   : > { %2198 = vmatmul.mubr.msk.bf16.gmra.mrb[12].mxu1 %vm430_vm4, %v2733_v45  ;;  %v1333_v45 = vshll.u32 %v2844_v61, 16  ;;  %v1339_v61 = vshrl.u32 %v2863_v18, 16 }
  0x5d   : > { %2201 = vmatprep.mubr.msk.bf16.mxu1 %vm2585_vm1, %v2584_v2 }
  0x5e   : > { %2286 = vmatmul.mubr.msk.bf16.gmra.mrb[12].mxu0 %vm430_vm4, %v1057_v17 }
  0x5f   : > { %2289 = vmatprep.mubr.msk.bf16.mxu0 %vm2585_vm1, %v2584_v2 }
  0x64   : > { %2202 = vmatmul.mubr.msk.bf16.gmra.mrb[16].mxu1 %vm430_vm4, %v2746_v53 }
  0x65   : > { %2207 = vmatprep.mubr.msk.bf16.mxu1 %vm2585_vm1, %v2584_v2 }
  0x66   : > { %2290 = vmatmul.mubr.msk.bf16.gmra.mrb[16].mxu0 %vm430_vm4, %v1059_v46 }
  0x67   : > { %2295 = vmatprep.mubr.msk.bf16.mxu0 %vm2585_vm1, %v2584_v2 }
  0x6c   : > { %2208 = vmatmul.mubr.msk.bf16.vlgmr.msra.gmra.mrb[0].mxu1 %vm430_vm4, %v2785_v24  ;;  %v1206_v24 = vsel %vm1048_vm5, %v1203_v50, %v1205_v59 }
  0x6d   : > { %2211 = vmatprep.mubr.msk.bf16.mxu1 %vm2585_vm1, %v2584_v2  ;;  %2228 = vmatpush3.bf16.msra.mxu1 %v796_v55 }
  0x6e   : > { %2296 = vmatmul.mubr.msk.bf16.vlgmr.msra.gmra.mrb[0].mxu0 %vm430_vm4, %v1204_v56 }
  0x6f   : > { %2316 = vmatpush3.bf16.msra.mxu0 %v1390_v57  ;;  %2299 = vmatprep.mubr.msk.bf16.mxu0 %vm2585_vm1, %v2584_v2 }
  0x70   : > { %2337 = vmatprep.subr.bf16.mxu0 %v2584_v2 }
  0x74   : > { %2212 = vmatmul.mubr.msk.bf16.gmra.mrb[4].mxu1 %vm430_vm4, %v2780_v22  ;;  %v623_v22 = vrot.slane %v2746_v53, 1  ;;  %v1322_v53 = vshrl.u32 %v2063_v48, 16 }
  0x75   : > { %2215 = vmatprep.mubr.msk.bf16.mxu1 %vm2585_vm1, %v2584_v2 }
  0x76   : > { %2300 = vmatmul.mubr.msk.bf16.gmra.mrb[4].mxu0 %vm430_vm4, %v1206_v24  ;;  %v624_v63 = vsel %vm615_vm6, %v621_v20, %v623_v22  ;;  %v1324_v3 = vrot.slane %v1322_v53, 2 }
  0x77   : > { %2303 = vmatprep.mubr.msk.bf16.mxu0 %vm2585_vm1, %v2584_v2 }
  0x7c   : > { %2216 = vmatmul.mubr.msk.bf16.gmra.mrb[8].mxu1 %vm430_vm4, %v2790_v25  ;;  %v625_v25 = vrot.slane %v2797_v30, 1  ;;  %v1335_v30 = vrot.slane %v1333_v45, 3 }
  0x7d   : > { %2219 = vmatprep.mubr.msk.bf16.mxu1 %vm2585_vm1, %v2584_v2 }
  0x7e   : > { %2304 = vmatmul.mubr.msk.bf16.gmra.mrb[8].mxu0 %vm430_vm4, %v1208_v60  ;;  %v626_v20 = vsel %vm615_vm6, %v623_v22, %v625_v25  ;;  %v1336_v11 = vor.u32 %v1335_v30, %v1332_v9 }
  0x7f   : > { %2307 = vmatprep.mubr.msk.bf16.mxu0 %vm2585_vm1, %v2584_v2 }
  0x84   : > { %2220 = vmatmul.mubr.msk.bf16.gmra.mrb[12].mxu1 %vm430_vm4, %v624_v63 }
  0x85   : > { %2223 = vmatprep.mubr.msk.bf16.mxu1 %vm2585_vm1, %v2584_v2 }
  0x86   : > { %2308 = vmatmul.mubr.msk.bf16.gmra.mrb[12].mxu0 %vm430_vm4, %v2802_v32  ;;  %v1328_v32 = vor.u32 %v1327_v4, %v1324_v3 }
  0x87   : > { %2311 = vmatprep.mubr.msk.bf16.mxu0 %vm2585_vm1, %v2584_v2 }
  0x88   : > { %v1337_v19 = vsel %vm1320_vm8, %v1328_v32, %v1336_v11 }
  0x8c   : > { %2224 = vmatmul.mubr.msk.bf16.gmra.mrb[16].mxu1 %vm430_vm4, %v626_v20 }
  0x8d   : > { %2229 = vmatprep.mubr.msk.bf16.mxu1 %vm2585_vm1, %v2584_v2 }
  0x8e   : > { %2312 = vmatmul.mubr.msk.bf16.gmra.mrb[16].mxu0 %vm430_vm4, %v2808_v35  ;;  %v1341_v35 = vrot.slane %v1339_v61, 2 }
  0x8f   : > { %2317 = vmatprep.mubr.msk.bf16.mxu0 %vm2585_vm1, %v2584_v2 }
  0x90   : > { %v1345_v18 = vor.u32 %v1344_v21, %v1341_v35 }
  0x92   : > { %v1346_v28 = vsel %vm1320_vm8, %v1336_v11, %v1345_v18 }
  0x94   : > { %2230 = vmatmul.mubr.msk.bf16.vlgmr.msra.gmra.mrb[0].mxu1 %vm430_vm4, %v2815_v40  ;;  %v1351_v40 = vshll.u32 %v2762_v1, 16  ;;  %v1360_v1 = vshll.u32 %v2769_v5, 16  ;;  %v1369_v5 = vshll.u32 %v2915_v41, 16 }
  0x95   : > { %2233 = vmatprep.mubr.msk.bf16.mxu1 %vm2585_vm1, %v2584_v2 }
  0x96   : > { %2318 = vmatmul.mubr.msk.bf16.vlgmr.msra.gmra.mrb[0].mxu0 %vm430_vm4, %v1337_v19  ;;  %v1353_v33 = vrot.slane %v1351_v40, 3  ;;  %v1362_v37 = vrot.slane %v1360_v1, 3  ;;  %v1371_v38 = vrot.slane %v1369_v5, 3 }
  0x97   : > { %2338 = vmatpush3.bf16.msra.mxu0 %v1509_v10  ;;  %2321 = vmatprep.mubr.msk.bf16.mxu0 %vm2585_vm1, %v2584_v2 }
  0x98   : > { %v1354_v34 = vor.u32 %v1353_v33, %v1350_v29  ;;  %v1363_v26 = vor.u32 %v1362_v37, %v1359_v7  ;;  %v1372_v42 = vor.u32 %v1371_v38, %v1368_v8 }
  0x9a   : > { %v1373_v41 = vsel %vm1320_vm8, %v1363_v26, %v1372_v42 }
  0x9c   : > { %2234 = vmatmul.mubr.msk.bf16.gmra.mrb[4].mxu1 %vm430_vm4, %v2824_v47  ;;  %v1355_v47 = vsel %vm1320_vm8, %v1345_v18, %v1354_v34 }
  0x9d   : > { %2237 = vmatprep.mubr.msk.bf16.mxu1 %vm2585_vm1, %v2584_v2 }
  0x9e   : > { %2322 = vmatmul.mubr.msk.bf16.gmra.mrb[4].mxu0 %vm430_vm4, %v1346_v28 }
  0x9f   : > { %2325 = vmatprep.mubr.msk.bf16.mxu0 %vm2585_vm1, %v2584_v2 }
  0xa4   : > { %2238 = vmatmul.mubr.msk.bf16.gmra.mrb[8].mxu1 %vm430_vm4, %v2829_v51  ;;  %v1364_v51 = vsel %vm1320_vm8, %v1354_v34, %v1363_v26 }
  0xa5   : > { %2241 = vmatprep.mubr.msk.bf16.mxu1 %vm2585_vm1, %v2584_v2 }
  0xa6   : > { %2326 = vmatmul.mubr.msk.bf16.gmra.mrb[8].mxu0 %vm430_vm4, %v1355_v47 }
  0xa7   : > { %2329 = vmatprep.mubr.msk.bf16.mxu0 %vm2585_vm1, %v2584_v2 }
  0xac   : > { %2242 = vmatmul.mubr.msk.bf16.gmra.mrb[12].mxu1 %vm430_vm4, %v2836_v58 }
  0xad   : > { %2245 = vmatprep.mubr.msk.bf16.mxu1 %vm2585_vm1, %v2584_v2 }
  0xae   : > { %2330 = vmatmul.mubr.msk.bf16.gmra.mrb[12].mxu0 %vm430_vm4, %v1364_v51 }
  0xaf   : > { %2333 = vmatprep.mubr.msk.bf16.mxu0 %vm2585_vm1, %v2584_v2 }
  0xb4   : > { %2246 = vmatmul.mubr.msk.bf16.gmra.mrb[16].mxu1 %vm430_vm4, %v2847_v62 }
  0xb6   : > { %2334 = vmatmul.mubr.msk.bf16.gmra.mrb[16].mxu0 %vm430_vm4, %v1373_v41 }
  0xb7   : > { %2339 = vmatprep.mubr.msk.bf16.mxu0 %vm2585_vm1, %v2584_v2 }
  0xbe   : > { %2340 = vmatmul.mubr.msk.bf16.vlgmr.msra.gmra.mrb[0].mxu0 %vm430_vm4, %v2860_v16 }
  0xbf   : > { %2343 = vmatprep.mubr.msk.bf16.mxu0 %vm2585_vm1, %v2584_v2 }
  0xc6   : > { %2344 = vmatmul.mubr.msk.bf16.gmra.mrb[4].mxu0 %vm430_vm4, %v2878_v31 }
  0xc7   : > { %2347 = vmatprep.mubr.msk.bf16.mxu0 %vm2585_vm1, %v2584_v2 }
  0xce   : > { %2348 = vmatmul.mubr.msk.bf16.gmra.mrb[8].mxu0 %vm430_vm4, %v2894_v36 }
  0xcf   : > { %2351 = vmatprep.mubr.msk.bf16.mxu0 %vm2585_vm1, %v2584_v2 }
  0xd6   : > { %2352 = vmatmul.mubr.msk.bf16.gmra.mrb[12].mxu0 %vm430_vm4, %v2907_v14 }
  0xd7   : > { %2355 = vmatprep.mubr.msk.bf16.mxu0 %vm2585_vm1, %v2584_v2 }
  0xde   : > { %2356 = vmatmul.mubr.msk.bf16.gmra.mrb[16].mxu0 %vm430_vm4, %v2923_v43 }
 0x167   : > { %v832_v58 = vpop.f32.mrb[0].mxu1 }
 0x168   : > { %v2231_v62 = vpop.f32.mrb[1].mxu1 }
 0x169   : > { %v835_v16 = vpop.f32.mrb[2].mxu1 }
 0x16a   : > { %v2232_v31 = vpop.f32.mrb[3].mxu1 }
 0x16f   : > { %v840_v17 = vpop.f32.mrb[4].mxu1 }
 0x170   : > { %v2235_v54 = vpop.f32.mrb[5].mxu1 }
 0x171   : > { %v843_v36 = vpop.f32.mrb[6].mxu1 }
 0x172   : > { %v2236_v44 = vpop.f32.mrb[7].mxu1 }
 0x177   : > { %v848_v46 = vpop.f32.mrb[8].mxu1 }
 0x178   : > { %v2239_v48 = vpop.f32.mrb[9].mxu1 }
 0x179   : > { %v851_v49 = vpop.f32.mrb[10].mxu1 }
 0x17a   : > { %v2240_v6 = vpop.f32.mrb[11].mxu1 }
 0x17f   : > { %v856_v14 = vpop.f32.mrb[12].mxu1 }
 0x180   : > { %v2243_v50 = vpop.f32.mrb[13].mxu1 }
 0x181   : > { %v859_v52 = vpop.f32.mrb[14].mxu1 }
 0x182   : > { %v2244_v55 = vpop.f32.mrb[15].mxu1 }
 0x187   : > { %v864_v56 = vpop.f32.mrb[16].mxu1 }
 0x188   : > { %v2247_v57 = vpop.f32.mrb[17].mxu1 }
 0x189   : > { %v867_v43 = vpop.f32.mrb[18].mxu1 }
 0x18a   : > { %v2248_v59 = vpop.f32.mrb[19].mxu1 }
 0x191   : > { %v1545_v24 = vpop.f32.mrb[0].mxu0 }
 0x192   : > { %v3077_v60 = vadd.f32 %v1545_v24, %v832_v58  ;;  %v2341_v22 = vpop.f32.mrb[1].mxu0 }
 0x193   : > { %v1548_v63 = vpop.f32.mrb[2].mxu0 }
 0x194   : > { %1594 = vst [vmem:[%s3075_s24] sm:$0xff] %v3077_v60  ;;  %v3081_v25 = vadd.f32 %v1548_v63, %v835_v16  ;;  %v2342_v53 = vpop.f32.mrb[3].mxu0 }
 0x196   : > { %1595 = vst [vmem:[%s3075_s24 + $0x8] sm:$0xff] %v3081_v25 }
 0x199   : > { %v1553_v27 = vpop.f32.mrb[4].mxu0 }
 0x19a   : > { %v3085_v0 = vadd.f32 %v1553_v27, %v840_v17  ;;  %v2345_v45 = vpop.f32.mrb[5].mxu0 }
 0x19b   : > { %v1556_v20 = vpop.f32.mrb[6].mxu0 }
 0x19c   : > { %1596 = vst [vmem:[%s3075_s24 + $0x10] sm:$0xff] %v3085_v0  ;;  %v3089_v3 = vadd.f32 %v1556_v20, %v843_v36  ;;  %v2346_v4 = vpop.f32.mrb[7].mxu0 }
 0x19e   : > { %1597 = vst [vmem:[%s3075_s24 + $0x18] sm:$0xff] %v3089_v3 }
 0x1a1   : > { %v1561_v9 = vpop.f32.mrb[8].mxu0 }
 0x1a2   : > { %v3093_v30 = vadd.f32 %v1561_v9, %v848_v46  ;;  %v2349_v32 = vpop.f32.mrb[9].mxu0 }
 0x1a3   : > { %v1564_v11 = vpop.f32.mrb[10].mxu0 }
 0x1a4   : > { %1598 = vst [vmem:[%s3075_s24 + $0x20] sm:$0xff] %v3093_v30  ;;  %v3097_v61 = vadd.f32 %v1564_v11, %v851_v49  ;;  %v2350_v12 = vpop.f32.mrb[11].mxu0 }
 0x1a6   : > { %1599 = vst [vmem:[%s3075_s24 + $0x28] sm:$0xff] %v3097_v61 }
 0x1a9   : > { %v1569_v13 = vpop.f32.mrb[12].mxu0 }
 0x1aa   : > { %v3101_v19 = vadd.f32 %v1569_v13, %v856_v14  ;;  %v2353_v35 = vpop.f32.mrb[13].mxu0 }
 0x1ab   : > { %v1572_v21 = vpop.f32.mrb[14].mxu0 }
 0x1ac   : > { %1600 = vst [vmem:[%s3075_s24 + $0x30] sm:$0xff] %v3101_v19  ;;  %v3105_v10 = vadd.f32 %v1572_v21, %v859_v52  ;;  %v2354_v18 = vpop.f32.mrb[15].mxu0 }
 0x1ae   : > { %1601 = vst [vmem:[%s3075_s24 + $0x38] sm:$0xff] %v3105_v10 }
 0x1b0   : > { %1607 = sbr.rel (%p2088_p4) target bundleno = 439 (0x1b7), region = 44 }
 0x1b1   : > { %v1577_v23 = vpop.f32.mrb[16].mxu0 }
 0x1b2   : > { %v3109_v40 = vadd.f32 %v1577_v23, %v864_v56  ;;  %v2357_v28 = vpop.f32.mrb[17].mxu0 }
 0x1b3   : > { %v1580_v29 = vpop.f32.mrb[18].mxu0 }
 0x1b4   : > { %1602 = vst [vmem:[%s3075_s24 + $0x40] sm:$0xff] %v3109_v40  ;;  %v3113_v33 = vadd.f32 %v1580_v29, %v867_v43  ;;  %v2358_v34 = vpop.f32.mrb[19].mxu0 }
 0x1b6   : > { %1603 = vst [vmem:[%s3075_s24 + $0x48] sm:$0xff] %v3113_v33 }
 0x1b7 PF: > { %2359 = vmatprep.subr.bf16.mxu1 %v2584_v2  ;;  %v1738_v1 = vld [vmem:[%s3275_s4] sm:$0x3]  ;;  %vm1780_vm9 = vcmask 1041408   ;;  %2361 = vmatprep.mubr.msk.bf16.mxu1 %vm2585_vm1, %v2584_v2  ;;  %vm1764_vm10 = vcmask 31744   ;;  %v2587_v37 = vmov 0   ;;  %v1614_v39 = vld [vmem:[%s3273_s2 + $0x10] sm:$0xff] }
 0x1b8   : > { %v1782_v47 = vsel %vm1780_vm9, %v1738_v1, 0  ;;  %v2571_v7 = vld [vmem:[%s2678_s23] sm:$0xff]   ;;  %2569 = vset.pattern.permute.xlu0 %v2587_v37  ;;  %2570 = vset.pattern.permute.xlu1 %v2587_v37  ;;  %v1613_v5 = vld [vmem:[%s3273_s2 + $0x8] sm:$0xff]  ;;  %v1615_v51 = vld [vmem:[%s3273_s2 + $0x18] sm:$0xff] }
 0x1b9   : > { %2360 = vmatpush3.bf16.msra.mxu1 %v1782_v47  ;;  %v1612_v26 = vld [vmem:[%s3273_s2] sm:$0xff]  ;;  %1634 = vperm.xlu1 %2570, %v1614_v39   ;;  %v2572_v8 = vld [vmem:[%s2678_s23 + $0x8] sm:$0xff]   ;;  %v1618_v41 = vld [vmem:[%s3273_s2 + $0x30] sm:$0xff] }
 0x1ba   : > { %1624 = vperm.xlu0 %2569, %v1612_v26   ;;  %v1616_v38 = vld [vmem:[%s3273_s2 + $0x20] sm:$0xff]  ;;  %v1617_v42 = vld [vmem:[%s3273_s2 + $0x28] sm:$0xff]  ;;  %v1619_v58 = vld [vmem:[%s3273_s2 + $0x38] sm:$0xff] }
 0x1bb   : > { %v2573_v62 = vld [vmem:[%s2678_s23 + $0x10] sm:$0xff]   ;;  %v1620_v16 = vld [vmem:[%s3273_s2 + $0x40] sm:$0xff]  ;;  %v1621_v31 = vld [vmem:[%s3273_s2 + $0x48] sm:$0xff] }
 0x1bc   : > { %2362 = vmatmul.mubr.msk.bf16.vlgmr.msra.gmra.mrb[20].mxu1 %vm1764_vm10, %v2571_v7  ;;  %v2574_v17 = vld [vmem:[%s2678_s23 + $0x18] sm:$0xff]   ;;  %v2575_v54 = vld [vmem:[%s2678_s23 + $0x20] sm:$0xff]  }
 0x1bd   : > { %2365 = vmatprep.mubr.msk.bf16.mxu1 %vm2585_vm1, %v2584_v2  ;;  %1639 = vperm.xlu1 %2570, %v1615_v51  }
 0x1be   : > { %1629 = vperm.xlu0 %2569, %v1613_v5  }
 0x1c1   : > { %1649 = vperm.xlu1 %2570, %v1617_v42  }
 0x1c2   : > { %1644 = vperm.xlu0 %2569, %v1616_v38  }
 0x1c4   : > { %2366 = vmatmul.mubr.msk.bf16.gmra.mrb[24].mxu1 %vm1764_vm10, %v2572_v8 }
 0x1c5   : > { %2369 = vmatprep.mubr.msk.bf16.mxu1 %vm2585_vm1, %v2584_v2  ;;  %1659 = vperm.xlu1 %2570, %v1619_v58  }
 0x1c6   : > { %1654 = vperm.xlu0 %2569, %v1618_v41  }
 0x1c9   : > { %1669 = vperm.xlu1 %2570, %v1621_v31  }
 0x1ca   : > { %1664 = vperm.xlu0 %2569, %v1620_v16  }
 0x1cc   : > { %2370 = vmatmul.mubr.msk.bf16.gmra.mrb[28].mxu1 %vm1764_vm10, %v2573_v62 }
 0x1cd   : > { %2373 = vmatprep.mubr.msk.bf16.mxu1 %vm2585_vm1, %v2584_v2 }
 0x1d4   : > { %2374 = vmatmul.mubr.msk.bf16.gmra.mrb[32].mxu1 %vm1764_vm10, %v2574_v17 }
 0x1d5   : > { %2377 = vmatprep.mubr.msk.bf16.mxu1 %vm2585_vm1, %v2584_v2 }
 0x1dc   : > { %2378 = vmatmul.mubr.msk.bf16.gmra.mrb[36].mxu1 %vm1764_vm10, %v2575_v54 }
 0x238   : > { %v3188_v46 = vpop.permute.xlu1 %1634 }
 0x239   : > { %v3184_v36 = vpop.permute.xlu0 %1624  ;;  %v1674_v48 = vmul.f32 %v3085_v0, %v3188_v46 }
 0x23a   : > { %v1672_v44 = vmul.f32 %v3077_v60, %v3184_v36 }
 0x23b   : > { %v1703_v52 = vmul.f32 %v3085_v0, %v1674_v48 }
 0x23c   : > { %v1701_v6 = vmul.f32 %v3077_v60, %v1672_v44  ;;  %v3197_v14 = vpop.permute.xlu1 %1639 }
 0x23d   : > { %v3192_v49 = vpop.permute.xlu0 %1629  ;;  %v1675_v50 = vmul.f32 %v3089_v3, %v3197_v14 }
 0x23e   : > { %v1673_v2 = vmul.f32 %v3081_v25, %v3192_v49 }
 0x23f   : > { %v1704_v24 = vmul.f32 %v3089_v3, %v1675_v50 }
 0x240   : > { %v1683_v55 = vadd.f32 %v1673_v2, %v1672_v44  ;;  %v1702_v56 = vmul.f32 %v3081_v25, %v1673_v2  ;;  %v3208_v22 = vpop.permute.xlu1 %1649 }
 0x241   : > { %v3203_v57 = vpop.permute.xlu0 %1644  ;;  %v1677_v63 = vmul.f32 %v3097_v61, %v3208_v22 }
 0x242   : > { %v1711_v43 = vadd.f32 %v1702_v56, %v1701_v6  ;;  %v1684_v59 = vadd.f32 %v1683_v55, %v1674_v48  ;;  %v1676_v60 = vmul.f32 %v3093_v30, %v3203_v57 }
 0x243   : > { %v1706_v4 = vmul.f32 %v3097_v61, %v1677_v63 }
 0x244   : > { %v1685_v53 = vadd.f32 %v1684_v59, %v1675_v50  ;;  %v1712_v27 = vadd.f32 %v1711_v43, %v1703_v52  ;;  %v1705_v0 = vmul.f32 %v3093_v30, %v1676_v60  ;;  %v3218_v9 = vpop.permute.xlu1 %1659 }
 0x245   : > { %v3213_v45 = vpop.permute.xlu0 %1654  ;;  %v1679_v32 = vmul.f32 %v3105_v10, %v3218_v9 }
 0x246   : > { %v1713_v25 = vadd.f32 %v1712_v27, %v1704_v24  ;;  %v1686_v20 = vadd.f32 %v1685_v53, %v1676_v60  ;;  %v1678_v3 = vmul.f32 %v3101_v19, %v3213_v45 }
 0x247   : > { %v1708_v18 = vmul.f32 %v3105_v10, %v1679_v32 }
 0x248   : > { %v1714_v11 = vadd.f32 %v1713_v25, %v1705_v0  ;;  %v1687_v12 = vadd.f32 %v1686_v20, %v1677_v63  ;;  %v1707_v13 = vmul.f32 %v3101_v19, %v1678_v3  ;;  %v3228_v23 = vpop.permute.xlu1 %1669 }
 0x249   : > { %v3223_v35 = vpop.permute.xlu0 %1664  ;;  %v1681_v28 = vmul.f32 %v3113_v33, %v3228_v23 }
 0x24a   : > { %v1715_v30 = vadd.f32 %v1714_v11, %v1706_v4  ;;  %v1688_v21 = vadd.f32 %v1687_v12, %v1678_v3  ;;  %v1680_v61 = vmul.f32 %v3109_v40, %v3223_v35 }
 0x24b   : > { %v1710_v47 = vmul.f32 %v3113_v33, %v1681_v28  ;;  %v1700_v33 = vld [vmem:[%s3278_s7] sm:$0x1] }
 0x24c   : > { %v1716_v29 = vadd.f32 %v1715_v30, %v1707_v13  ;;  %v1689_v34 = vadd.f32 %v1688_v21, %v1679_v32  ;;  %v1709_v15 = vmul.f32 %v3109_v40, %v1680_v61  ;;  %v1682_v40 = vld [vmem:[%s3277_s6] sm:$0x1] }
 0x24e   : > { %v1717_v1 = vadd.f32 %v1716_v29, %v1708_v18  ;;  %v1690_v19 = vadd.f32 %v1689_v34, %v1680_v61 }
 0x250   : > { %v1718_v7 = vadd.f32 %v1717_v1, %v1709_v15  ;;  %v1691_v37 = vadd.f32 %v1690_v19, %v1681_v28 }
 0x252   : > { %v1692_v26 = vrot.slane %v1691_v37, 4  ;;  %v1719_v10 = vadd.f32 %v1718_v7, %v1710_v47 }
 0x254   : > { %v1693_v39 = vadd.f32 %v1692_v26, %v1691_v37  ;;  %v1720_v5 = vrot.slane %v1719_v10, 4 }
 0x256   : > { %v1694_v51 = vrot.slane %v1693_v39, 2  ;;  %v1721_v8 = vadd.f32 %v1720_v5, %v1719_v10 }
 0x258   : > { %v1695_v38 = vadd.f32 %v1694_v51, %v1693_v39  ;;  %v1722_v42 = vrot.slane %v1721_v8, 2 }
 0x25a   : > { %v1696_v41 = vrot.slane %v1695_v38, 1  ;;  %v1723_v58 = vadd.f32 %v1722_v42, %v1721_v8 }
 0x25c   : > { %v1697_v62 = vadd.f32 %v1696_v41, %v1695_v38  ;;  %v1724_v16 = vrot.slane %v1723_v58, 1 }
 0x25e   : > { %v1698_v31 = vadd.f32 %v1697_v62, %v1682_v40  ;;  %v1725_v17 = vadd.f32 %v1724_v16, %v1723_v58 }
 0x260   : > { %1699 = vst [vmem:[%s3277_s6] sm:$0x1] %v1698_v31  ;;  %v1726_v54 = vadd.f32 %v1725_v17, %v1700_v33 }
 0x262   : > { %1727 = vst [vmem:[%s3278_s7] sm:$0x1] %v1726_v54 }
 0x28f   : > { %v1818_v44 = vpop.f32.mrb[20].mxu1 }
 0x290   : > { %v1857_v48 = vmul.f32 %v1818_v44, %v3184_v36  ;;  %v2363_v6 = vpop.f32.mrb[21].mxu1 }
 0x291   : > { %v1821_v2 = vpop.f32.mrb[22].mxu1 }
 0x292   : > { %v1858_v50 = vmul.f32 %v1821_v2, %v3192_v49  ;;  %v2364_v52 = vpop.f32.mrb[23].mxu1  ;;  %v1886_v55 = vmul.f32 %v1857_v48, %v1818_v44 }
 0x294   : > { %v1868_v56 = vadd.f32 %v1858_v50, %v1857_v48  ;;  %v1887_v43 = vmul.f32 %v1858_v50, %v1821_v2  ;;  %v1867_v50 = vld [vmem:[%s3279_s8] sm:$0x1] }
 0x296   : > { %v1896_v59 = vadd.f32 %v1887_v43, %v1886_v55  ;;  %v1885_v55 = vld [vmem:[%s3280_s9] sm:$0x1] }
 0x297   : > { %v1826_v24 = vpop.f32.mrb[24].mxu1 }
 0x298   : > { %v1859_v60 = vmul.f32 %v1826_v24, %v3188_v46  ;;  %v2367_v63 = vpop.f32.mrb[25].mxu1 }
 0x299   : > { %v1829_v53 = vpop.f32.mrb[26].mxu1 }
 0x29a   : > { %v1869_v27 = vadd.f32 %v1868_v56, %v1859_v60  ;;  %v1888_v0 = vmul.f32 %v1859_v60, %v1826_v24  ;;  %v1860_v25 = vmul.f32 %v1829_v53, %v3197_v14  ;;  %v2368_v20 = vpop.f32.mrb[27].mxu1 }
 0x29c   : > { %v1897_v36 = vadd.f32 %v1896_v59, %v1888_v0  ;;  %v1870_v4 = vadd.f32 %v1869_v27, %v1860_v25  ;;  %v1889_v3 = vmul.f32 %v1860_v25, %v1829_v53 }
 0x29e   : > { %v1898_v32 = vadd.f32 %v1897_v36, %v1889_v3 }
 0x29f   : > { %v1834_v49 = vpop.f32.mrb[28].mxu1 }
 0x2a0   : > { %v1861_v11 = vmul.f32 %v1834_v49, %v3203_v57  ;;  %v2371_v12 = vpop.f32.mrb[29].mxu1 }
 0x2a1   : > { %v1837_v13 = vpop.f32.mrb[30].mxu1 }
 0x2a2   : > { %v1871_v30 = vadd.f32 %v1870_v4, %v1861_v11  ;;  %v1890_v21 = vmul.f32 %v1861_v11, %v1834_v49  ;;  %v1862_v46 = vmul.f32 %v1837_v13, %v3208_v22  ;;  %v2372_v18 = vpop.f32.mrb[31].mxu1 }
 0x2a4   : > { %v1899_v61 = vadd.f32 %v1898_v32, %v1890_v21  ;;  %v1872_v28 = vadd.f32 %v1871_v30, %v1862_v46  ;;  %v1891_v29 = vmul.f32 %v1862_v46, %v1837_v13 }
 0x2a6   : > { %v1900_v34 = vadd.f32 %v1899_v61, %v1891_v29 }
 0x2a7   : > { %v1842_v14 = vpop.f32.mrb[32].mxu1 }
 0x2a8   : > { %v1863_v15 = vmul.f32 %v1842_v14, %v3213_v45  ;;  %v2375_v1 = vpop.f32.mrb[33].mxu1 }
 0x2a9   : > { %v1845_v19 = vpop.f32.mrb[34].mxu1 }
 0x2aa   : > { %v1873_v47 = vadd.f32 %v1872_v28, %v1863_v15  ;;  %v1892_v7 = vmul.f32 %v1863_v15, %v1842_v14  ;;  %v1864_v57 = vmul.f32 %v1845_v19, %v3218_v9  ;;  %v2376_v37 = vpop.f32.mrb[35].mxu1 }
 0x2ac   : > { %v1901_v26 = vadd.f32 %v1900_v34, %v1892_v7  ;;  %v1874_v10 = vadd.f32 %v1873_v47, %v1864_v57  ;;  %v1893_v39 = vmul.f32 %v1864_v57, %v1845_v19 }
 0x2ae   : > { %v1902_v5 = vadd.f32 %v1901_v26, %v1893_v39 }
 0x2af   : > { %v1850_v22 = vpop.f32.mrb[36].mxu1 }
 0x2b0   : > { %v1865_v51 = vmul.f32 %v1850_v22, %v3223_v35  ;;  %v2379_v8 = vpop.f32.mrb[37].mxu1 }
 0x2b1   : > { %v1853_v38 = vpop.f32.mrb[38].mxu1 }
 0x2b2   : > { %v1875_v42 = vadd.f32 %v1874_v10, %v1865_v51  ;;  %v1894_v41 = vmul.f32 %v1865_v51, %v1850_v22  ;;  %v1866_v45 = vmul.f32 %v1853_v38, %v3228_v23  ;;  %v2380_v58 = vpop.f32.mrb[39].mxu1 }
 0x2b4   : > { %v1903_v40 = vadd.f32 %v1902_v5, %v1894_v41  ;;  %v1876_v62 = vadd.f32 %v1875_v42, %v1866_v45  ;;  %v1895_v16 = vmul.f32 %v1866_v45, %v1853_v38 }
 0x2b6   : > { %v1877_v33 = vrot.slane %v1876_v62, 4  ;;  %v1904_v9 = vadd.f32 %v1903_v40, %v1895_v16 }
 0x2b8   : > { %v1878_v31 = vadd.f32 %v1877_v33, %v1876_v62  ;;  %v1905_v17 = vrot.slane %v1904_v9, 4 }
 0x2ba   : > { %v1879_v54 = vrot.slane %v1878_v31, 2  ;;  %v1906_v44 = vadd.f32 %v1905_v17, %v1904_v9 }
 0x2bc   : > { %v1880_v48 = vadd.f32 %v1879_v54, %v1878_v31  ;;  %v1907_v6 = vrot.slane %v1906_v44, 2 }
 0x2be   : > { %v1881_v2 = vrot.slane %v1880_v48, 1  ;;  %v1908_v35 = vadd.f32 %v1907_v6, %v1906_v44 }
 0x2c0   : > { %v1882_v52 = vadd.f32 %v1881_v2, %v1880_v48  ;;  %v1909_v23 = vrot.slane %v1908_v35, 1 }
 0x2c2   : > { %v1883_v56 = vadd.f32 %v1882_v52, %v1867_v50  ;;  %v1910_v43 = vadd.f32 %v1909_v23, %v1908_v35 }
 0x2c4   : > { %1884 = vst [vmem:[%s3279_s8] sm:$0x1] %v1883_v56  ;;  %v1911_v59 = vadd.f32 %v1910_v43, %v1885_v55 }
 0x2c6   : > { %1912 = vst [vmem:[%s3280_s9] sm:$0x1] %v1911_v59 }
 0x2c7 PF: > { %s20_s30 = sadd.s32 1, %s2582_s30  }
 0x2c8   : > { %p17_p5 = scmp.ge.s32.totalorder %s20_s30, 4  }
 0x2ca   :  { %19 = sbr.rel (!%p17_p5) target bundleno = 1 (0x1), region = 117 }

</bundles_post_ra>
